<compile_context>
chip_gen: v7x
topology: tpu7x:2x2x1
jax: 0.10.0
libtpu: 0.0.40
codegen_flags: <defaults>
</compile_context>

<pallas_src>
import functools
import math

import jax
import jax.numpy as jnp
from jax.experimental import pallas as pl
from jax.experimental.pallas import tpu as pltpu

# ------------------ small, module-consistent config (reference: 20/512/256/8) ------------------
NUM_VARS = 4
HIDDEN = 32
NUM_LATENTS = 8
DEPTH = 2
CROSS_HEADS = 4
SELF_HEADS = 8
FF_MULT = 4
ADAPTER_REDUCTION = 16
PDE_DT = 0.1
OUT_PAD = 128          # lane-dense decoder output width; sliced back to NUM_VARS in the wrapper


# =============================== trace-time helpers (run inside kernels) ===============================

def _ln(x, g, b):
    mu = jnp.mean(x, axis=-1, keepdims=True)
    xc = x - mu
    var = jnp.mean(xc * xc, axis=-1, keepdims=True)
    return xc * jax.lax.rsqrt(var + 1e-5) * g + b


def _softmax_rows(s):
    s = s - jnp.max(s, axis=-1, keepdims=True)
    p = jnp.exp(s)
    return p * pl.reciprocal(jnp.sum(p, axis=-1, keepdims=True), approx=True)


def _multihead(q_all, k_all, v_all, heads, dh):
    """All heads of softmax(q k^T / sqrt(dh)) v, kept in the lane-dense (L, heads*dh) layout."""
    scale = 1.0 / math.sqrt(dh)
    outs = []
    for h in range(heads):
        sl = slice(h * dh, (h + 1) * dh)
        q, k, v = q_all[:, sl], k_all[:, sl], v_all[:, sl]
        s = jax.lax.dot_general(q, k, (((1,), (1,)), ((), ())),
                                preferred_element_type=jnp.float32) * scale
        p = _softmax_rows(s)
        outs.append(jnp.dot(p, v, preferred_element_type=jnp.float32))
    return jnp.concatenate(outs, axis=-1)


# =============================== fused Pallas kernels ===============================

def _cross_block_kernel(lat_ref, tok_ref,
                        lnq_g_ref, lnq_b_ref, lnkv_g_ref, lnkv_b_ref,
                        wq_ref, wkv_ref, wo_ref, bo_ref,
                        ffg_ref, ffb_ref, w1_ref, b1_ref, w2_ref, b2_ref,
                        o_ref, *, heads):
    """Perceiver cross-attention + FF block for one batch element (whole block fused)."""
    inner = wq_ref.shape[1]
    dh = inner // heads
    lat0 = lat_ref[...]                                   # (N_LAT, D), shared across batch
    tok = tok_ref[0]                                      # (S, C)
    qn = _ln(lat0, lnq_g_ref[...], lnq_b_ref[...])
    kn = _ln(tok, lnkv_g_ref[...], lnkv_b_ref[...])
    q_all = jnp.dot(qn, wq_ref[...], preferred_element_type=jnp.float32)
    kv = jnp.dot(kn, wkv_ref[...], preferred_element_type=jnp.float32)   # packed K|V
    attn = _multihead(q_all, kv[:, :inner], kv[:, inner:], heads, dh)
    lat1 = lat0 + jnp.dot(attn, wo_ref[...], preferred_element_type=jnp.float32) + bo_ref[...]
    ffn = _ln(lat1, ffg_ref[...], ffb_ref[...])
    # TODO(synk): PyTorch nn.GELU defaults to the exact erf form; tanh approx used here.
    h = jax.nn.gelu(jnp.dot(ffn, w1_ref[...], preferred_element_type=jnp.float32) + b1_ref[...],
                    approximate=True)
    o_ref[0] = lat1 + jnp.dot(h, w2_ref[...], preferred_element_type=jnp.float32) + b2_ref[...]


def _self_block_kernel(x_ref,
                       ln1_g_ref, ln1_b_ref, wqkv_ref, wo_ref, bo_ref,
                       ln2_g_ref, ln2_b_ref, w1_ref, b1_ref, w2_ref, b2_ref,
                       o_ref, *, heads):
    """Latent self-attention + FF block for one batch element (whole block fused)."""
    inner = wo_ref.shape[0]
    dh = inner // heads
    x0 = x_ref[0]                                         # (N_LAT, D)
    xn = _ln(x0, ln1_g_ref[...], ln1_b_ref[...])
    qkv = jnp.dot(xn, wqkv_ref[...], preferred_element_type=jnp.float32)  # packed Q|K|V
    attn = _multihead(qkv[:, :inner], qkv[:, inner:2 * inner], qkv[:, 2 * inner:], heads, dh)
    x1 = x0 + jnp.dot(attn, wo_ref[...], preferred_element_type=jnp.float32) + bo_ref[...]
    ffn = _ln(x1, ln2_g_ref[...], ln2_b_ref[...])
    h = jax.nn.gelu(jnp.dot(ffn, w1_ref[...], preferred_element_type=jnp.float32) + b1_ref[...],
                    approximate=True)
    o_ref[0] = x1 + jnp.dot(h, w2_ref[...], preferred_element_type=jnp.float32) + b2_ref[...]


def _pde_decoder_kernel(x_ref, w1_ref, b1_ref, w2_ref, b2_ref,
                        ad_wd_ref, ad_bd_ref, ad_wu_ref, ad_bu_ref,
                        o_ref, *, dt, task):
    """PhysicsLayer (periodic diffusion stencil) + optional adapter + decoder MLP, fused."""
    x = x_ref[0]                                          # (N_LAT, D)
    # TODO(synk): PDESolver is not defined in the reference source; modelled as one explicit
    # periodic finite-difference diffusion step over latent tokens (sublane roll stencil, XLU).
    n = x.shape[0]
    x_prev = pltpu.roll(x, shift=1, axis=0)
    x_next = pltpu.roll(x, shift=n - 1, axis=0)
    z = x + dt * (x_prev + x_next - 2.0 * x)

    if task in ("weather", "pollution"):
        # Pfeiffer bottleneck adapter: down -> ReLU -> up -> residual.
        # TODO(synk): AdapterConfig / reverse=True semantics are not defined in the reference
        # source; 'reverse' is modelled as negating the adapter delta.
        h = jnp.maximum(
            jnp.dot(z, ad_wd_ref[...], preferred_element_type=jnp.float32) + ad_bd_ref[...], 0.0)
        delta = jnp.dot(h, ad_wu_ref[...], preferred_element_type=jnp.float32) + ad_bu_ref[...]
        z = z + (-delta if task == "pollution" else delta)

    hdec = jax.nn.gelu(
        jnp.dot(z, w1_ref[...], preferred_element_type=jnp.float32) + b1_ref[...],
        approximate=True)
    o_ref[0] = jnp.dot(hdec, w2_ref[...], preferred_element_type=jnp.float32) + b2_ref[...]


# =============================== pallas_call wrappers ===============================

def _full_spec(a):
    # Whole (batch-independent) array resident each grid step; block == full array shape.
    return pl.BlockSpec(a.shape, lambda b: (0,) * a.ndim)


def cross_block(tokens, p):
    B, S, C = tokens.shape
    N, D = p["latents"].shape
    args = (p["latents"], tokens,
            p["c_ln_q_g"], p["c_ln_q_b"], p["c_ln_kv_g"], p["c_ln_kv_b"],
            p["c_Wq"], p["c_Wkv"], p["c_Wo"], p["c_bo"],
            p["c_ff_ln_g"], p["c_ff_ln_b"], p["c_ff_W1"], p["c_ff_b1"],
            p["c_ff_W2"], p["c_ff_b2"])
    in_specs = ([_full_spec(p["latents"]),
                 pl.BlockSpec((1, S, C), lambda b: (b, 0, 0))]
                + [_full_spec(a) for a in args[2:]])
    return pl.pallas_call(
        functools.partial(_cross_block_kernel, heads=CROSS_HEADS),
        out_shape=jax.ShapeDtypeStruct((B, N, D), jnp.float32),
        grid=(B,),
        in_specs=in_specs,
        out_specs=pl.BlockSpec((1, N, D), lambda b: (b, 0, 0)),
        compiler_params=pltpu.CompilerParams(dimension_semantics=("parallel",)),
    )(*args)


def self_block(lat, blk):
    B, N, D = lat.shape
    args = (lat, blk["ln1_g"], blk["ln1_b"], blk["Wqkv"], blk["Wo"], blk["bo"],
            blk["ln2_g"], blk["ln2_b"], blk["W1"], blk["b1"], blk["W2"], blk["b2"])
    in_specs = [pl.BlockSpec((1, N, D), lambda b: (b, 0, 0))] + [_full_spec(a) for a in args[1:]]
    return pl.pallas_call(
        functools.partial(_self_block_kernel, heads=SELF_HEADS),
        out_shape=jax.ShapeDtypeStruct((B, N, D), jnp.float32),
        grid=(B,),
        in_specs=in_specs,
        out_specs=pl.BlockSpec((1, N, D), lambda b: (b, 0, 0)),
        compiler_params=pltpu.CompilerParams(dimension_semantics=("parallel",)),
    )(*args)


def pde_decode(lat, p, task):
    B, N, D = lat.shape
    args = (lat, p["dec_W1"], p["dec_b1"], p["dec_W2"], p["dec_b2"],
            p["ad_Wd"], p["ad_bd"], p["ad_Wu"], p["ad_bu"])
    in_specs = [pl.BlockSpec((1, N, D), lambda b: (b, 0, 0))] + [_full_spec(a) for a in args[1:]]
    return pl.pallas_call(
        functools.partial(_pde_decoder_kernel, dt=PDE_DT, task=task),
        out_shape=jax.ShapeDtypeStruct((B, N, OUT_PAD), jnp.float32),
        grid=(B,),
        in_specs=in_specs,
        out_specs=pl.BlockSpec((1, N, OUT_PAD), lambda b: (b, 0, 0)),
        compiler_params=pltpu.CompilerParams(dimension_semantics=("parallel",)),
    )(*args)


# =============================== model glue ===============================

def neural_gcm_forward(p, x, task=None):
    """x: (B, H, W, C=num_vars) channels-last grid of atmospheric variables."""
    B, Hh, Ww, C = x.shape
    tokens = x.reshape(B, Hh * Ww, C)

    # TODO(synk): Perceiver is not defined in the reference source; Fourier position encoding
    # and cross-attn weight tying are omitted in this simplified encoder.
    lat = cross_block(tokens, p)                 # (B, NUM_LATENTS, HIDDEN)
    for blk in p["self_blocks"]:
        lat = self_block(lat, blk)

    # PhysicsLayer + adapter + decoder fused in one kernel; ConservationLoss has no effect
    # on the returned tensor in the reference code, so it is not computed.
    out_padded = pde_decode(lat, p, task)        # (B, NUM_LATENTS, OUT_PAD) lane-dense
    return out_padded[..., :NUM_VARS]


# =============================== deterministic init ===============================

def init_params(key):
    keys = iter(jax.random.split(key, 256))

    def w(shape, scale=0.02):
        return scale * jax.random.normal(next(keys), shape, dtype=jnp.float32)

    zeros = lambda s: jnp.zeros(s, jnp.float32)
    ones = lambda s: jnp.ones(s, jnp.float32)
    inner = HIDDEN

    p = {
        "latents": w((NUM_LATENTS, HIDDEN), 1.0),
        # cross-attention (Wk|Wv packed into one matrix)
        "c_ln_q_g": ones((1, HIDDEN)), "c_ln_q_b": zeros((1, HIDDEN)),
        "c_ln_kv_g": ones((1, NUM_VARS)), "c_ln_kv_b": zeros((1, NUM_VARS)),
        "c_Wq": w((HIDDEN, inner)),
        "c_Wkv": w((NUM_VARS, 2 * inner)),
        "c_Wo": w((inner, HIDDEN)), "c_bo": zeros((1, HIDDEN)),
        "c_ff_ln_g": ones((1, HIDDEN)), "c_ff_ln_b": zeros((1, HIDDEN)),
        "c_ff_W1": w((HIDDEN, HIDDEN * FF_MULT)), "c_ff_b1": zeros((1, HIDDEN * FF_MULT)),
        "c_ff_W2": w((HIDDEN * FF_MULT, HIDDEN)), "c_ff_b2": zeros((1, HIDDEN)),
    }
    blocks = []
    for _ in range(DEPTH):
        blocks.append({
            "ln1_g": ones((1, HIDDEN)), "ln1_b": zeros((1, HIDDEN)),
            "Wqkv": w((HIDDEN, 3 * inner)),                      # packed Q|K|V
            "Wo": w((inner, HIDDEN)), "bo": zeros((1, HIDDEN)),
            "ln2_g": ones((1, HIDDEN)), "ln2_b": zeros((1, HIDDEN)),
            "W1": w((HIDDEN, HIDDEN * FF_MULT)), "b1": zeros((1, HIDDEN * FF_MULT)),
            "W2": w((HIDDEN * FF_MULT, HIDDEN)), "b2": zeros((1, HIDDEN)),
        })
    p["self_blocks"] = blocks

    bott = max(1, HIDDEN // ADAPTER_REDUCTION)
    p["ad_Wd"] = w((HIDDEN, bott)); p["ad_bd"] = zeros((1, bott))
    p["ad_Wu"] = w((bott, HIDDEN)); p["ad_bu"] = zeros((1, HIDDEN))

    # decoder; output dim lane-padded to OUT_PAD (zero columns) for unmasked full-lane stores.
    p["dec_W1"] = w((HIDDEN, HIDDEN * 4)); p["dec_b1"] = zeros((1, HIDDEN * 4))
    w2 = w((HIDDEN * 4, NUM_VARS)); b2 = zeros((1, NUM_VARS))
    p["dec_W2"] = jnp.pad(w2, ((0, 0), (0, OUT_PAD - NUM_VARS)))
    p["dec_b2"] = jnp.pad(b2, ((0, 0), (0, OUT_PAD - NUM_VARS)))
    return p


# =============================== main ===============================

if __name__ == "__main__":
    root = jax.random.PRNGKey(0)
    pkey, xkey = jax.random.split(root)

    params = init_params(pkey)
    # input: (batch=2, 8x8 spatial grid, 4 atmospheric variables), channels-last
    x = jax.random.normal(xkey, (2, 8, 8, NUM_VARS), dtype=jnp.float32)

    fwd = jax.jit(functools.partial(neural_gcm_forward, task=None))
    out = jax.block_until_ready(fwd(params, x))

    assert out.shape == (2, NUM_LATENTS, NUM_VARS), out.shape
    assert bool(jnp.all(jnp.isfinite(out)))
    print("KERNEL_OK")
</pallas_src>

<mosaic_0001>
module attributes {stable_mosaic.version = 11 : i64} {
  func.func @_self_block_kernel(%arg0: i32, %arg1: memref<1x8x32xf32, #tpu.memory_space<vmem>>, %arg2: memref<1x32xf32, #tpu.memory_space<vmem>>, %arg3: memref<1x32xf32, #tpu.memory_space<vmem>>, %arg4: memref<32x96xf32, #tpu.memory_space<vmem>>, %arg5: memref<32x32xf32, #tpu.memory_space<vmem>>, %arg6: memref<1x32xf32, #tpu.memory_space<vmem>>, %arg7: memref<1x32xf32, #tpu.memory_space<vmem>>, %arg8: memref<1x32xf32, #tpu.memory_space<vmem>>, %arg9: memref<32x128xf32, #tpu.memory_space<vmem>>, %arg10: memref<1x128xf32, #tpu.memory_space<vmem>>, %arg11: memref<128x32xf32, #tpu.memory_space<vmem>>, %arg12: memref<1x32xf32, #tpu.memory_space<vmem>>, %arg13: memref<1x8x32xf32, #tpu.memory_space<vmem>>) attributes {dimension_semantics = [#tpu.dimension_semantics<parallel>], iteration_bounds = array<i64: 2>, scalar_prefetch = 0 : i64, scratch_operands = 0 : i64, tpu.core_type = #tpu.core_type<tc>, window_params = [{transform_indices = @transform_0, window_bounds = array<i64: 1, 8, 32>}, {pipeline_mode = #tpu.pipeline_mode<synchronous>, transform_indices = @transform_1, window_bounds = array<i64: 1, 32>}, {pipeline_mode = #tpu.pipeline_mode<synchronous>, transform_indices = @transform_2, window_bounds = array<i64: 1, 32>}, {pipeline_mode = #tpu.pipeline_mode<synchronous>, transform_indices = @transform_3, window_bounds = array<i64: 32, 96>}, {pipeline_mode = #tpu.pipeline_mode<synchronous>, transform_indices = @transform_4, window_bounds = array<i64: 32, 32>}, {pipeline_mode = #tpu.pipeline_mode<synchronous>, transform_indices = @transform_5, window_bounds = array<i64: 1, 32>}, {pipeline_mode = #tpu.pipeline_mode<synchronous>, transform_indices = @transform_6, window_bounds = array<i64: 1, 32>}, {pipeline_mode = #tpu.pipeline_mode<synchronous>, transform_indices = @transform_7, window_bounds = array<i64: 1, 32>}, {pipeline_mode = #tpu.pipeline_mode<synchronous>, transform_indices = @transform_8, window_bounds = array<i64: 32, 128>}, {pipeline_mode = #tpu.pipeline_mode<synchronous>, transform_indices = @transform_9, window_bounds = array<i64: 1, 128>}, {pipeline_mode = #tpu.pipeline_mode<synchronous>, transform_indices = @transform_10, window_bounds = array<i64: 128, 32>}, {pipeline_mode = #tpu.pipeline_mode<synchronous>, transform_indices = @transform_11, window_bounds = array<i64: 1, 32>}, {transform_indices = @transform_12, window_bounds = array<i64: 1, 8, 32>}]} {
    %c0 = arith.constant 0 : index
    %c0_0 = arith.constant 0 : index
    %c0_1 = arith.constant 0 : index
    %0 = vector.load %arg1[%c0, %c0_0, %c0_1] : memref<1x8x32xf32, #tpu.memory_space<vmem>>, vector<1x8x32xf32>
    %1 = vector.shape_cast %0 : vector<1x8x32xf32> to vector<8x32xf32>
    %c0_2 = arith.constant 0 : index
    %c0_3 = arith.constant 0 : index
    %2 = vector.load %arg2[%c0_2, %c0_3] : memref<1x32xf32, #tpu.memory_space<vmem>>, vector<1x32xf32>
    %c0_4 = arith.constant 0 : index
    %c0_5 = arith.constant 0 : index
    %3 = vector.load %arg3[%c0_4, %c0_5] : memref<1x32xf32, #tpu.memory_space<vmem>>, vector<1x32xf32>
    %cst = arith.constant dense<0.000000e+00> : vector<8xf32>
    %4 = vector.multi_reduction <add>, %1, %cst [1] : vector<8x32xf32> to vector<8xf32>
    %5 = vector.shape_cast %4 : vector<8xf32> to vector<8x1xf32>
    %cst_6 = arith.constant 3.200000e+01 : f32
    %6 = vector.broadcast %cst_6 : f32 to vector<8x1xf32>
    %7 = arith.divf %5, %6 : vector<8x1xf32>
    %8 = vector.broadcast %7 : vector<8x1xf32> to vector<8x32xf32>
    %9 = arith.subf %1, %8 : vector<8x32xf32>
    %10 = arith.mulf %9, %9 : vector<8x32xf32>
    %cst_7 = arith.constant dense<0.000000e+00> : vector<8xf32>
    %11 = vector.multi_reduction <add>, %10, %cst_7 [1] : vector<8x32xf32> to vector<8xf32>
    %12 = vector.shape_cast %11 : vector<8xf32> to vector<8x1xf32>
    %cst_8 = arith.constant 3.200000e+01 : f32
    %13 = vector.broadcast %cst_8 : f32 to vector<8x1xf32>
    %14 = arith.divf %12, %13 : vector<8x1xf32>
    %cst_9 = arith.constant 9.99999974E-6 : f32
    %15 = vector.broadcast %cst_9 : f32 to vector<8x1xf32>
    %16 = arith.addf %14, %15 : vector<8x1xf32>
    %17 = math.rsqrt %16 : vector<8x1xf32>
    %18 = vector.broadcast %17 : vector<8x1xf32> to vector<8x32xf32>
    %19 = arith.mulf %9, %18 : vector<8x32xf32>
    %20 = vector.broadcast %2 : vector<1x32xf32> to vector<8x32xf32>
    %21 = arith.mulf %19, %20 : vector<8x32xf32>
    %22 = vector.broadcast %3 : vector<1x32xf32> to vector<8x32xf32>
    %23 = arith.addf %21, %22 : vector<8x32xf32>
    %c0_10 = arith.constant 0 : index
    %c0_11 = arith.constant 0 : index
    %24 = vector.load %arg4[%c0_10, %c0_11] : memref<32x96xf32, #tpu.memory_space<vmem>>, vector<32x96xf32>
    %cst_12 = arith.constant dense<0.000000e+00> : vector<8x96xf32>
    %25 = tpu.matmul %23, %24, %cst_12 {dimension_numbers = #tpu.dot_dimension_numbers<[1], [0], [0], [1], [0, 0, 1, 1], [], []>} : vector<8x32xf32>, vector<32x96xf32>, vector<8x96xf32> -> vector<8x96xf32>
    %26 = vector.extract_strided_slice %25 {offsets = [0, 0], sizes = [8, 32], strides = [1, 1]} : vector<8x96xf32> to vector<8x32xf32>
    %27 = vector.extract_strided_slice %25 {offsets = [0, 32], sizes = [8, 32], strides = [1, 1]} : vector<8x96xf32> to vector<8x32xf32>
    %28 = vector.extract_strided_slice %25 {offsets = [0, 64], sizes = [8, 32], strides = [1, 1]} : vector<8x96xf32> to vector<8x32xf32>
    %29 = vector.extract_strided_slice %26 {offsets = [0, 0], sizes = [8, 4], strides = [1, 1]} : vector<8x32xf32> to vector<8x4xf32>
    %30 = vector.extract_strided_slice %27 {offsets = [0, 0], sizes = [8, 4], strides = [1, 1]} : vector<8x32xf32> to vector<8x4xf32>
    %31 = vector.extract_strided_slice %28 {offsets = [0, 0], sizes = [8, 4], strides = [1, 1]} : vector<8x32xf32> to vector<8x4xf32>
    %cst_13 = arith.constant dense<0.000000e+00> : vector<8x8xf32>
    %32 = tpu.matmul %29, %30, %cst_13 {dimension_numbers = #tpu.dot_dimension_numbers<[1], [1], [0], [0], [0, 0, 1, 0], [], []>} : vector<8x4xf32>, vector<8x4xf32>, vector<8x8xf32> -> vector<8x8xf32>
    %cst_14 = arith.constant 5.000000e-01 : f32
    %33 = vector.broadcast %cst_14 : f32 to vector<8x8xf32>
    %34 = arith.mulf %32, %33 : vector<8x8xf32>
    %cst_15 = arith.constant dense<0xFF800000> : vector<8xf32>
    %35 = vector.multi_reduction <maximumf>, %34, %cst_15 [1] : vector<8x8xf32> to vector<8xf32>
    %36 = vector.shape_cast %35 : vector<8xf32> to vector<8x1xf32>
    %37 = vector.broadcast %36 : vector<8x1xf32> to vector<8x8xf32>
    %38 = arith.subf %34, %37 : vector<8x8xf32>
    %39 = math.exp %38 : vector<8x8xf32>
    %cst_16 = arith.constant dense<0.000000e+00> : vector<8xf32>
    %40 = vector.multi_reduction <add>, %39, %cst_16 [1] : vector<8x8xf32> to vector<8xf32>
    %41 = vector.shape_cast %40 : vector<8xf32> to vector<8x1xf32>
    %42 = tpu.reciprocal %41 {approx = true} : vector<8x1xf32> -> vector<8x1xf32>
    %43 = vector.broadcast %42 : vector<8x1xf32> to vector<8x8xf32>
    %44 = arith.mulf %39, %43 : vector<8x8xf32>
    %cst_17 = arith.constant dense<0.000000e+00> : vector<8x4xf32>
    %45 = tpu.matmul %44, %31, %cst_17 {dimension_numbers = #tpu.dot_dimension_numbers<[1], [0], [0], [1], [0, 0, 1, 1], [], []>} : vector<8x8xf32>, vector<8x4xf32>, vector<8x4xf32> -> vector<8x4xf32>
    %46 = vector.extract_strided_slice %26 {offsets = [0, 4], sizes = [8, 4], strides = [1, 1]} : vector<8x32xf32> to vector<8x4xf32>
    %47 = vector.extract_strided_slice %27 {offsets = [0, 4], sizes = [8, 4], strides = [1, 1]} : vector<8x32xf32> to vector<8x4xf32>
    %48 = vector.extract_strided_slice %28 {offsets = [0, 4], sizes = [8, 4], strides = [1, 1]} : vector<8x32xf32> to vector<8x4xf32>
    %cst_18 = arith.constant dense<0.000000e+00> : vector<8x8xf32>
    %49 = tpu.matmul %46, %47, %cst_18 {dimension_numbers = #tpu.dot_dimension_numbers<[1], [1], [0], [0], [0, 0, 1, 0], [], []>} : vector<8x4xf32>, vector<8x4xf32>, vector<8x8xf32> -> vector<8x8xf32>
    %cst_19 = arith.constant 5.000000e-01 : f32
    %50 = vector.broadcast %cst_19 : f32 to vector<8x8xf32>
    %51 = arith.mulf %49, %50 : vector<8x8xf32>
    %cst_20 = arith.constant dense<0xFF800000> : vector<8xf32>
    %52 = vector.multi_reduction <maximumf>, %51, %cst_20 [1] : vector<8x8xf32> to vector<8xf32>
    %53 = vector.shape_cast %52 : vector<8xf32> to vector<8x1xf32>
    %54 = vector.broadcast %53 : vector<8x1xf32> to vector<8x8xf32>
    %55 = arith.subf %51, %54 : vector<8x8xf32>
    %56 = math.exp %55 : vector<8x8xf32>
    %cst_21 = arith.constant dense<0.000000e+00> : vector<8xf32>
    %57 = vector.multi_reduction <add>, %56, %cst_21 [1] : vector<8x8xf32> to vector<8xf32>
    %58 = vector.shape_cast %57 : vector<8xf32> to vector<8x1xf32>
    %59 = tpu.reciprocal %58 {approx = true} : vector<8x1xf32> -> vector<8x1xf32>
    %60 = vector.broadcast %59 : vector<8x1xf32> to vector<8x8xf32>
    %61 = arith.mulf %56, %60 : vector<8x8xf32>
    %cst_22 = arith.constant dense<0.000000e+00> : vector<8x4xf32>
    %62 = tpu.matmul %61, %48, %cst_22 {dimension_numbers = #tpu.dot_dimension_numbers<[1], [0], [0], [1], [0, 0, 1, 1], [], []>} : vector<8x8xf32>, vector<8x4xf32>, vector<8x4xf32> -> vector<8x4xf32>
    %63 = vector.extract_strided_slice %26 {offsets = [0, 8], sizes = [8, 4], strides = [1, 1]} : vector<8x32xf32> to vector<8x4xf32>
    %64 = vector.extract_strided_slice %27 {offsets = [0, 8], sizes = [8, 4], strides = [1, 1]} : vector<8x32xf32> to vector<8x4xf32>
    %65 = vector.extract_strided_slice %28 {offsets = [0, 8], sizes = [8, 4], strides = [1, 1]} : vector<8x32xf32> to vector<8x4xf32>
    %cst_23 = arith.constant dense<0.000000e+00> : vector<8x8xf32>
    %66 = tpu.matmul %63, %64, %cst_23 {dimension_numbers = #tpu.dot_dimension_numbers<[1], [1], [0], [0], [0, 0, 1, 0], [], []>} : vector<8x4xf32>, vector<8x4xf32>, vector<8x8xf32> -> vector<8x8xf32>
    %cst_24 = arith.constant 5.000000e-01 : f32
    %67 = vector.broadcast %cst_24 : f32 to vector<8x8xf32>
    %68 = arith.mulf %66, %67 : vector<8x8xf32>
    %cst_25 = arith.constant dense<0xFF800000> : vector<8xf32>
    %69 = vector.multi_reduction <maximumf>, %68, %cst_25 [1] : vector<8x8xf32> to vector<8xf32>
    %70 = vector.shape_cast %69 : vector<8xf32> to vector<8x1xf32>
    %71 = vector.broadcast %70 : vector<8x1xf32> to vector<8x8xf32>
    %72 = arith.subf %68, %71 : vector<8x8xf32>
    %73 = math.exp %72 : vector<8x8xf32>
    %cst_26 = arith.constant dense<0.000000e+00> : vector<8xf32>
    %74 = vector.multi_reduction <add>, %73, %cst_26 [1] : vector<8x8xf32> to vector<8xf32>
    %75 = vector.shape_cast %74 : vector<8xf32> to vector<8x1xf32>
    %76 = tpu.reciprocal %75 {approx = true} : vector<8x1xf32> -> vector<8x1xf32>
    %77 = vector.broadcast %76 : vector<8x1xf32> to vector<8x8xf32>
    %78 = arith.mulf %73, %77 : vector<8x8xf32>
    %cst_27 = arith.constant dense<0.000000e+00> : vector<8x4xf32>
    %79 = tpu.matmul %78, %65, %cst_27 {dimension_numbers = #tpu.dot_dimension_numbers<[1], [0], [0], [1], [0, 0, 1, 1], [], []>} : vector<8x8xf32>, vector<8x4xf32>, vector<8x4xf32> -> vector<8x4xf32>
    %80 = vector.extract_strided_slice %26 {offsets = [0, 12], sizes = [8, 4], strides = [1, 1]} : vector<8x32xf32> to vector<8x4xf32>
    %81 = vector.extract_strided_slice %27 {offsets = [0, 12], sizes = [8, 4], strides = [1, 1]} : vector<8x32xf32> to vector<8x4xf32>
    %82 = vector.extract_strided_slice %28 {offsets = [0, 12], sizes = [8, 4], strides = [1, 1]} : vector<8x32xf32> to vector<8x4xf32>
    %cst_28 = arith.constant dense<0.000000e+00> : vector<8x8xf32>
    %83 = tpu.matmul %80, %81, %cst_28 {dimension_numbers = #tpu.dot_dimension_numbers<[1], [1], [0], [0], [0, 0, 1, 0], [], []>} : vector<8x4xf32>, vector<8x4xf32>, vector<8x8xf32> -> vector<8x8xf32>
    %cst_29 = arith.constant 5.000000e-01 : f32
    %84 = vector.broadcast %cst_29 : f32 to vector<8x8xf32>
    %85 = arith.mulf %83, %84 : vector<8x8xf32>
    %cst_30 = arith.constant dense<0xFF800000> : vector<8xf32>
    %86 = vector.multi_reduction <maximumf>, %85, %cst_30 [1] : vector<8x8xf32> to vector<8xf32>
    %87 = vector.shape_cast %86 : vector<8xf32> to vector<8x1xf32>
    %88 = vector.broadcast %87 : vector<8x1xf32> to vector<8x8xf32>
    %89 = arith.subf %85, %88 : vector<8x8xf32>
    %90 = math.exp %89 : vector<8x8xf32>
    %cst_31 = arith.constant dense<0.000000e+00> : vector<8xf32>
    %91 = vector.multi_reduction <add>, %90, %cst_31 [1] : vector<8x8xf32> to vector<8xf32>
    %92 = vector.shape_cast %91 : vector<8xf32> to vector<8x1xf32>
    %93 = tpu.reciprocal %92 {approx = true} : vector<8x1xf32> -> vector<8x1xf32>
    %94 = vector.broadcast %93 : vector<8x1xf32> to vector<8x8xf32>
    %95 = arith.mulf %90, %94 : vector<8x8xf32>
    %cst_32 = arith.constant dense<0.000000e+00> : vector<8x4xf32>
    %96 = tpu.matmul %95, %82, %cst_32 {dimension_numbers = #tpu.dot_dimension_numbers<[1], [0], [0], [1], [0, 0, 1, 1], [], []>} : vector<8x8xf32>, vector<8x4xf32>, vector<8x4xf32> -> vector<8x4xf32>
    %97 = vector.extract_strided_slice %26 {offsets = [0, 16], sizes = [8, 4], strides = [1, 1]} : vector<8x32xf32> to vector<8x4xf32>
    %98 = vector.extract_strided_slice %27 {offsets = [0, 16], sizes = [8, 4], strides = [1, 1]} : vector<8x32xf32> to vector<8x4xf32>
    %99 = vector.extract_strided_slice %28 {offsets = [0, 16], sizes = [8, 4], strides = [1, 1]} : vector<8x32xf32> to vector<8x4xf32>
    %cst_33 = arith.constant dense<0.000000e+00> : vector<8x8xf32>
    %100 = tpu.matmul %97, %98, %cst_33 {dimension_numbers = #tpu.dot_dimension_numbers<[1], [1], [0], [0], [0, 0, 1, 0], [], []>} : vector<8x4xf32>, vector<8x4xf32>, vector<8x8xf32> -> vector<8x8xf32>
    %cst_34 = arith.constant 5.000000e-01 : f32
    %101 = vector.broadcast %cst_34 : f32 to vector<8x8xf32>
    %102 = arith.mulf %100, %101 : vector<8x8xf32>
    %cst_35 = arith.constant dense<0xFF800000> : vector<8xf32>
    %103 = vector.multi_reduction <maximumf>, %102, %cst_35 [1] : vector<8x8xf32> to vector<8xf32>
    %104 = vector.shape_cast %103 : vector<8xf32> to vector<8x1xf32>
    %105 = vector.broadcast %104 : vector<8x1xf32> to vector<8x8xf32>
    %106 = arith.subf %102, %105 : vector<8x8xf32>
    %107 = math.exp %106 : vector<8x8xf32>
    %cst_36 = arith.constant dense<0.000000e+00> : vector<8xf32>
    %108 = vector.multi_reduction <add>, %107, %cst_36 [1] : vector<8x8xf32> to vector<8xf32>
    %109 = vector.shape_cast %108 : vector<8xf32> to vector<8x1xf32>
    %110 = tpu.reciprocal %109 {approx = true} : vector<8x1xf32> -> vector<8x1xf32>
    %111 = vector.broadcast %110 : vector<8x1xf32> to vector<8x8xf32>
    %112 = arith.mulf %107, %111 : vector<8x8xf32>
    %cst_37 = arith.constant dense<0.000000e+00> : vector<8x4xf32>
    %113 = tpu.matmul %112, %99, %cst_37 {dimension_numbers = #tpu.dot_dimension_numbers<[1], [0], [0], [1], [0, 0, 1, 1], [], []>} : vector<8x8xf32>, vector<8x4xf32>, vector<8x4xf32> -> vector<8x4xf32>
    %114 = vector.extract_strided_slice %26 {offsets = [0, 20], sizes = [8, 4], strides = [1, 1]} : vector<8x32xf32> to vector<8x4xf32>
    %115 = vector.extract_strided_slice %27 {offsets = [0, 20], sizes = [8, 4], strides = [1, 1]} : vector<8x32xf32> to vector<8x4xf32>
    %116 = vector.extract_strided_slice %28 {offsets = [0, 20], sizes = [8, 4], strides = [1, 1]} : vector<8x32xf32> to vector<8x4xf32>
    %cst_38 = arith.constant dense<0.000000e+00> : vector<8x8xf32>
    %117 = tpu.matmul %114, %115, %cst_38 {dimension_numbers = #tpu.dot_dimension_numbers<[1], [1], [0], [0], [0, 0, 1, 0], [], []>} : vector<8x4xf32>, vector<8x4xf32>, vector<8x8xf32> -> vector<8x8xf32>
    %cst_39 = arith.constant 5.000000e-01 : f32
    %118 = vector.broadcast %cst_39 : f32 to vector<8x8xf32>
    %119 = arith.mulf %117, %118 : vector<8x8xf32>
    %cst_40 = arith.constant dense<0xFF800000> : vector<8xf32>
    %120 = vector.multi_reduction <maximumf>, %119, %cst_40 [1] : vector<8x8xf32> to vector<8xf32>
    %121 = vector.shape_cast %120 : vector<8xf32> to vector<8x1xf32>
    %122 = vector.broadcast %121 : vector<8x1xf32> to vector<8x8xf32>
    %123 = arith.subf %119, %122 : vector<8x8xf32>
    %124 = math.exp %123 : vector<8x8xf32>
    %cst_41 = arith.constant dense<0.000000e+00> : vector<8xf32>
    %125 = vector.multi_reduction <add>, %124, %cst_41 [1] : vector<8x8xf32> to vector<8xf32>
    %126 = vector.shape_cast %125 : vector<8xf32> to vector<8x1xf32>
    %127 = tpu.reciprocal %126 {approx = true} : vector<8x1xf32> -> vector<8x1xf32>
    %128 = vector.broadcast %127 : vector<8x1xf32> to vector<8x8xf32>
    %129 = arith.mulf %124, %128 : vector<8x8xf32>
    %cst_42 = arith.constant dense<0.000000e+00> : vector<8x4xf32>
    %130 = tpu.matmul %129, %116, %cst_42 {dimension_numbers = #tpu.dot_dimension_numbers<[1], [0], [0], [1], [0, 0, 1, 1], [], []>} : vector<8x8xf32>, vector<8x4xf32>, vector<8x4xf32> -> vector<8x4xf32>
    %131 = vector.extract_strided_slice %26 {offsets = [0, 24], sizes = [8, 4], strides = [1, 1]} : vector<8x32xf32> to vector<8x4xf32>
    %132 = vector.extract_strided_slice %27 {offsets = [0, 24], sizes = [8, 4], strides = [1, 1]} : vector<8x32xf32> to vector<8x4xf32>
    %133 = vector.extract_strided_slice %28 {offsets = [0, 24], sizes = [8, 4], strides = [1, 1]} : vector<8x32xf32> to vector<8x4xf32>
    %cst_43 = arith.constant dense<0.000000e+00> : vector<8x8xf32>
    %134 = tpu.matmul %131, %132, %cst_43 {dimension_numbers = #tpu.dot_dimension_numbers<[1], [1], [0], [0], [0, 0, 1, 0], [], []>} : vector<8x4xf32>, vector<8x4xf32>, vector<8x8xf32> -> vector<8x8xf32>
    %cst_44 = arith.constant 5.000000e-01 : f32
    %135 = vector.broadcast %cst_44 : f32 to vector<8x8xf32>
    %136 = arith.mulf %134, %135 : vector<8x8xf32>
    %cst_45 = arith.constant dense<0xFF800000> : vector<8xf32>
    %137 = vector.multi_reduction <maximumf>, %136, %cst_45 [1] : vector<8x8xf32> to vector<8xf32>
    %138 = vector.shape_cast %137 : vector<8xf32> to vector<8x1xf32>
    %139 = vector.broadcast %138 : vector<8x1xf32> to vector<8x8xf32>
    %140 = arith.subf %136, %139 : vector<8x8xf32>
    %141 = math.exp %140 : vector<8x8xf32>
    %cst_46 = arith.constant dense<0.000000e+00> : vector<8xf32>
    %142 = vector.multi_reduction <add>, %141, %cst_46 [1] : vector<8x8xf32> to vector<8xf32>
    %143 = vector.shape_cast %142 : vector<8xf32> to vector<8x1xf32>
    %144 = tpu.reciprocal %143 {approx = true} : vector<8x1xf32> -> vector<8x1xf32>
    %145 = vector.broadcast %144 : vector<8x1xf32> to vector<8x8xf32>
    %146 = arith.mulf %141, %145 : vector<8x8xf32>
    %cst_47 = arith.constant dense<0.000000e+00> : vector<8x4xf32>
    %147 = tpu.matmul %146, %133, %cst_47 {dimension_numbers = #tpu.dot_dimension_numbers<[1], [0], [0], [1], [0, 0, 1, 1], [], []>} : vector<8x8xf32>, vector<8x4xf32>, vector<8x4xf32> -> vector<8x4xf32>
    %148 = vector.extract_strided_slice %26 {offsets = [0, 28], sizes = [8, 4], strides = [1, 1]} : vector<8x32xf32> to vector<8x4xf32>
    %149 = vector.extract_strided_slice %27 {offsets = [0, 28], sizes = [8, 4], strides = [1, 1]} : vector<8x32xf32> to vector<8x4xf32>
    %150 = vector.extract_strided_slice %28 {offsets = [0, 28], sizes = [8, 4], strides = [1, 1]} : vector<8x32xf32> to vector<8x4xf32>
    %cst_48 = arith.constant dense<0.000000e+00> : vector<8x8xf32>
    %151 = tpu.matmul %148, %149, %cst_48 {dimension_numbers = #tpu.dot_dimension_numbers<[1], [1], [0], [0], [0, 0, 1, 0], [], []>} : vector<8x4xf32>, vector<8x4xf32>, vector<8x8xf32> -> vector<8x8xf32>
    %cst_49 = arith.constant 5.000000e-01 : f32
    %152 = vector.broadcast %cst_49 : f32 to vector<8x8xf32>
    %153 = arith.mulf %151, %152 : vector<8x8xf32>
    %cst_50 = arith.constant dense<0xFF800000> : vector<8xf32>
    %154 = vector.multi_reduction <maximumf>, %153, %cst_50 [1] : vector<8x8xf32> to vector<8xf32>
    %155 = vector.shape_cast %154 : vector<8xf32> to vector<8x1xf32>
    %156 = vector.broadcast %155 : vector<8x1xf32> to vector<8x8xf32>
    %157 = arith.subf %153, %156 : vector<8x8xf32>
    %158 = math.exp %157 : vector<8x8xf32>
    %cst_51 = arith.constant dense<0.000000e+00> : vector<8xf32>
    %159 = vector.multi_reduction <add>, %158, %cst_51 [1] : vector<8x8xf32> to vector<8xf32>
    %160 = vector.shape_cast %159 : vector<8xf32> to vector<8x1xf32>
    %161 = tpu.reciprocal %160 {approx = true} : vector<8x1xf32> -> vector<8x1xf32>
    %162 = vector.broadcast %161 : vector<8x1xf32> to vector<8x8xf32>
    %163 = arith.mulf %158, %162 : vector<8x8xf32>
    %cst_52 = arith.constant dense<0.000000e+00> : vector<8x4xf32>
    %164 = tpu.matmul %163, %150, %cst_52 {dimension_numbers = #tpu.dot_dimension_numbers<[1], [0], [0], [1], [0, 0, 1, 1], [], []>} : vector<8x8xf32>, vector<8x4xf32>, vector<8x4xf32> -> vector<8x4xf32>
    %165 = tpu.concatenate %45, %62, %79, %96, %113, %130, %147, %164 in 1 : vector<8x4xf32>, vector<8x4xf32>, vector<8x4xf32>, vector<8x4xf32>, vector<8x4xf32>, vector<8x4xf32>, vector<8x4xf32>, vector<8x4xf32> -> vector<8x32xf32>
    %c0_53 = arith.constant 0 : index
    %c0_54 = arith.constant 0 : index
    %166 = vector.load %arg5[%c0_53, %c0_54] : memref<32x32xf32, #tpu.memory_space<vmem>>, vector<32x32xf32>
    %cst_55 = arith.constant dense<0.000000e+00> : vector<8x32xf32>
    %167 = tpu.matmul %165, %166, %cst_55 {dimension_numbers = #tpu.dot_dimension_numbers<[1], [0], [0], [1], [0, 0, 1, 1], [], []>} : vector<8x32xf32>, vector<32x32xf32>, vector<8x32xf32> -> vector<8x32xf32>
    %168 = arith.addf %1, %167 : vector<8x32xf32>
    %c0_56 = arith.constant 0 : index
    %c0_57 = arith.constant 0 : index
    %169 = vector.load %arg6[%c0_56, %c0_57] : memref<1x32xf32, #tpu.memory_space<vmem>>, vector<1x32xf32>
    %170 = vector.broadcast %169 : vector<1x32xf32> to vector<8x32xf32>
    %171 = arith.addf %168, %170 : vector<8x32xf32>
    %c0_58 = arith.constant 0 : index
    %c0_59 = arith.constant 0 : index
    %172 = vector.load %arg7[%c0_58, %c0_59] : memref<1x32xf32, #tpu.memory_space<vmem>>, vector<1x32xf32>
    %c0_60 = arith.constant 0 : index
    %c0_61 = arith.constant 0 : index
    %173 = vector.load %arg8[%c0_60, %c0_61] : memref<1x32xf32, #tpu.memory_space<vmem>>, vector<1x32xf32>
    %cst_62 = arith.constant dense<0.000000e+00> : vector<8xf32>
    %174 = vector.multi_reduction <add>, %171, %cst_62 [1] : vector<8x32xf32> to vector<8xf32>
    %175 = vector.shape_cast %174 : vector<8xf32> to vector<8x1xf32>
    %cst_63 = arith.constant 3.200000e+01 : f32
    %176 = vector.broadcast %cst_63 : f32 to vector<8x1xf32>
    %177 = arith.divf %175, %176 : vector<8x1xf32>
    %178 = vector.broadcast %177 : vector<8x1xf32> to vector<8x32xf32>
    %179 = arith.subf %171, %178 : vector<8x32xf32>
    %180 = arith.mulf %179, %179 : vector<8x32xf32>
    %cst_64 = arith.constant dense<0.000000e+00> : vector<8xf32>
    %181 = vector.multi_reduction <add>, %180, %cst_64 [1] : vector<8x32xf32> to vector<8xf32>
    %182 = vector.shape_cast %181 : vector<8xf32> to vector<8x1xf32>
    %cst_65 = arith.constant 3.200000e+01 : f32
    %183 = vector.broadcast %cst_65 : f32 to vector<8x1xf32>
    %184 = arith.divf %182, %183 : vector<8x1xf32>
    %cst_66 = arith.constant 9.99999974E-6 : f32
    %185 = vector.broadcast %cst_66 : f32 to vector<8x1xf32>
    %186 = arith.addf %184, %185 : vector<8x1xf32>
    %187 = math.rsqrt %186 : vector<8x1xf32>
    %188 = vector.broadcast %187 : vector<8x1xf32> to vector<8x32xf32>
    %189 = arith.mulf %179, %188 : vector<8x32xf32>
    %190 = vector.broadcast %172 : vector<1x32xf32> to vector<8x32xf32>
    %191 = arith.mulf %189, %190 : vector<8x32xf32>
    %192 = vector.broadcast %173 : vector<1x32xf32> to vector<8x32xf32>
    %193 = arith.addf %191, %192 : vector<8x32xf32>
    %c0_67 = arith.constant 0 : index
    %c0_68 = arith.constant 0 : index
    %194 = vector.load %arg9[%c0_67, %c0_68] : memref<32x128xf32, #tpu.memory_space<vmem>>, vector<32x128xf32>
    %cst_69 = arith.constant dense<0.000000e+00> : vector<8x128xf32>
    %195 = tpu.matmul %193, %194, %cst_69 {dimension_numbers = #tpu.dot_dimension_numbers<[1], [0], [0], [1], [0, 0, 1, 1], [], []>} : vector<8x32xf32>, vector<32x128xf32>, vector<8x128xf32> -> vector<8x128xf32>
    %c0_70 = arith.constant 0 : index
    %c0_71 = arith.constant 0 : index
    %196 = vector.load %arg10[%c0_70, %c0_71] : memref<1x128xf32, #tpu.memory_space<vmem>>, vector<1x128xf32>
    %197 = vector.broadcast %196 : vector<1x128xf32> to vector<8x128xf32>
    %198 = arith.addf %195, %197 : vector<8x128xf32>
    %199 = arith.mulf %198, %198 : vector<8x128xf32>
    %200 = arith.mulf %198, %199 : vector<8x128xf32>
    %cst_72 = arith.constant 4.471500e-02 : f32
    %201 = vector.broadcast %cst_72 : f32 to vector<8x128xf32>
    %202 = arith.mulf %201, %200 : vector<8x128xf32>
    %203 = arith.addf %198, %202 : vector<8x128xf32>
    %cst_73 = arith.constant 0.797884583 : f32
    %204 = vector.broadcast %cst_73 : f32 to vector<8x128xf32>
    %205 = arith.mulf %204, %203 : vector<8x128xf32>
    %206 = math.tanh %205 : vector<8x128xf32>
    %cst_74 = arith.constant 1.000000e+00 : f32
    %207 = vector.broadcast %cst_74 : f32 to vector<8x128xf32>
    %208 = arith.addf %207, %206 : vector<8x128xf32>
    %cst_75 = arith.constant 5.000000e-01 : f32
    %209 = vector.broadcast %cst_75 : f32 to vector<8x128xf32>
    %210 = arith.mulf %209, %208 : vector<8x128xf32>
    %211 = arith.mulf %198, %210 : vector<8x128xf32>
    %c0_76 = arith.constant 0 : index
    %c0_77 = arith.constant 0 : index
    %212 = vector.load %arg11[%c0_76, %c0_77] : memref<128x32xf32, #tpu.memory_space<vmem>>, vector<128x32xf32>
    %cst_78 = arith.constant dense<0.000000e+00> : vector<8x32xf32>
    %213 = tpu.matmul %211, %212, %cst_78 {dimension_numbers = #tpu.dot_dimension_numbers<[1], [0], [0], [1], [0, 0, 1, 1], [], []>} : vector<8x128xf32>, vector<128x32xf32>, vector<8x32xf32> -> vector<8x32xf32>
    %214 = arith.addf %171, %213 : vector<8x32xf32>
    %c0_79 = arith.constant 0 : index
    %c0_80 = arith.constant 0 : index
    %215 = vector.load %arg12[%c0_79, %c0_80] : memref<1x32xf32, #tpu.memory_space<vmem>>, vector<1x32xf32>
    %216 = vector.broadcast %215 : vector<1x32xf32> to vector<8x32xf32>
    %217 = arith.addf %214, %216 : vector<8x32xf32>
    %c0_81 = arith.constant 0 : index
    %c0_82 = arith.constant 0 : index
    %c0_83 = arith.constant 0 : index
    %218 = vector.load %arg13[%c0_81, %c0_82, %c0_83] : memref<1x8x32xf32, #tpu.memory_space<vmem>>, vector<1x8x32xf32>
    %219 = vector.shape_cast %218 : vector<1x8x32xf32> to vector<8x32xf32>
    %220 = vector.shape_cast %217 : vector<8x32xf32> to vector<1x8x32xf32>
    tpu.vector_store %arg13[%c0_81, %c0_82, %c0_83], %220 {strides = array<i32>} : memref<1x8x32xf32, #tpu.memory_space<vmem>>, vector<1x8x32xf32>,
    return
  }
  func.func @transform_0(%arg0: i32) -> (i32, i32, i32) {
    %c0_i32 = arith.constant 0 : i32
    %c0_i32_0 = arith.constant 0 : i32
    %c0_i32_1 = arith.constant 0 : i32
    return %arg0, %c0_i32, %c0_i32_0 : i32, i32, i32
  }
  func.func @transform_1(%arg0: i32) -> (i32, i32) {
    %c0_i32 = arith.constant 0 : i32
    %c0_i32_0 = arith.constant 0 : i32
    %c0_i32_1 = arith.constant 0 : i32
    return %c0_i32, %c0_i32_0 : i32, i32
  }
  func.func @transform_2(%arg0: i32) -> (i32, i32) {
    %c0_i32 = arith.constant 0 : i32
    %c0_i32_0 = arith.constant 0 : i32
    %c0_i32_1 = arith.constant 0 : i32
    return %c0_i32, %c0_i32_0 : i32, i32
  }
  func.func @transform_3(%arg0: i32) -> (i32, i32) {
    %c0_i32 = arith.constant 0 : i32
    %c0_i32_0 = arith.constant 0 : i32
    %c0_i32_1 = arith.constant 0 : i32
    return %c0_i32, %c0_i32_0 : i32, i32
  }
  func.func @transform_4(%arg0: i32) -> (i32, i32) {
    %c0_i32 = arith.constant 0 : i32
    %c0_i32_0 = arith.constant 0 : i32
    %c0_i32_1 = arith.constant 0 : i32
    return %c0_i32, %c0_i32_0 : i32, i32
  }
  func.func @transform_5(%arg0: i32) -> (i32, i32) {
    %c0_i32 = arith.constant 0 : i32
    %c0_i32_0 = arith.constant 0 : i32
    %c0_i32_1 = arith.constant 0 : i32
    return %c0_i32, %c0_i32_0 : i32, i32
  }
  func.func @transform_6(%arg0: i32) -> (i32, i32) {
    %c0_i32 = arith.constant 0 : i32
    %c0_i32_0 = arith.constant 0 : i32
    %c0_i32_1 = arith.constant 0 : i32
    return %c0_i32, %c0_i32_0 : i32, i32
  }
  func.func @transform_7(%arg0: i32) -> (i32, i32) {
    %c0_i32 = arith.constant 0 : i32
    %c0_i32_0 = arith.constant 0 : i32
    %c0_i32_1 = arith.constant 0 : i32
    return %c0_i32, %c0_i32_0 : i32, i32
  }
  func.func @transform_8(%arg0: i32) -> (i32, i32) {
    %c0_i32 = arith.constant 0 : i32
    %c0_i32_0 = arith.constant 0 : i32
    %c0_i32_1 = arith.constant 0 : i32
    return %c0_i32, %c0_i32_0 : i32, i32
  }
  func.func @transform_9(%arg0: i32) -> (i32, i32) {
    %c0_i32 = arith.constant 0 : i32
    %c0_i32_0 = arith.constant 0 : i32
    %c0_i32_1 = arith.constant 0 : i32
    return %c0_i32, %c0_i32_0 : i32, i32
  }
  func.func @transform_10(%arg0: i32) -> (i32, i32) {
    %c0_i32 = arith.constant 0 : i32
    %c0_i32_0 = arith.constant 0 : i32
    %c0_i32_1 = arith.constant 0 : i32
    return %c0_i32, %c0_i32_0 : i32, i32
  }
  func.func @transform_11(%arg0: i32) -> (i32, i32) {
    %c0_i32 = arith.constant 0 : i32
    %c0_i32_0 = arith.constant 0 : i32
    %c0_i32_1 = arith.constant 0 : i32
    return %c0_i32, %c0_i32_0 : i32, i32
  }
  func.func @transform_12(%arg0: i32) -> (i32, i32, i32) {
    %c0_i32 = arith.constant 0 : i32
    %c0_i32_0 = arith.constant 0 : i32
    %c0_i32_1 = arith.constant 0 : i32
    return %arg0, %c0_i32, %c0_i32_0 : i32, i32, i32
  }
}

module attributes {stable_mosaic.version = 11 : i64} {
  func.func @_cross_block_kernel(%arg0: i32, %arg1: memref<8x32xf32, #tpu.memory_space<vmem>>, %arg2: memref<1x64x4xf32, #tpu.memory_space<vmem>>, %arg3: memref<1x32xf32, #tpu.memory_space<vmem>>, %arg4: memref<1x32xf32, #tpu.memory_space<vmem>>, %arg5: memref<1x4xf32, #tpu.memory_space<vmem>>, %arg6: memref<1x4xf32, #tpu.memory_space<vmem>>, %arg7: memref<32x32xf32, #tpu.memory_space<vmem>>, %arg8: memref<4x64xf32, #tpu.memory_space<vmem>>, %arg9: memref<32x32xf32, #tpu.memory_space<vmem>>, %arg10: memref<1x32xf32, #tpu.memory_space<vmem>>, %arg11: memref<1x32xf32, #tpu.memory_space<vmem>>, %arg12: memref<1x32xf32, #tpu.memory_space<vmem>>, %arg13: memref<32x128xf32, #tpu.memory_space<vmem>>, %arg14: memref<1x128xf32, #tpu.memory_space<vmem>>, %arg15: memref<128x32xf32, #tpu.memory_space<vmem>>, %arg16: memref<1x32xf32, #tpu.memory_space<vmem>>, %arg17: memref<1x8x32xf32, #tpu.memory_space<vmem>>) attributes {dimension_semantics = [#tpu.dimension_semantics<parallel>], iteration_bounds = array<i64: 2>, scalar_prefetch = 0 : i64, scratch_operands = 0 : i64, tpu.core_type = #tpu.core_type<tc>, window_params = [{pipeline_mode = #tpu.pipeline_mode<synchronous>, transform_indices = @transform_0, window_bounds = array<i64: 8, 32>}, {transform_indices = @transform_1, window_bounds = array<i64: 1, 64, 4>}, {pipeline_mode = #tpu.pipeline_mode<synchronous>, transform_indices = @transform_2, window_bounds = array<i64: 1, 32>}, {pipeline_mode = #tpu.pipeline_mode<synchronous>, transform_indices = @transform_3, window_bounds = array<i64: 1, 32>}, {pipeline_mode = #tpu.pipeline_mode<synchronous>, transform_indices = @transform_4, window_bounds = array<i64: 1, 4>}, {pipeline_mode = #tpu.pipeline_mode<synchronous>, transform_indices = @transform_5, window_bounds = array<i64: 1, 4>}, {pipeline_mode = #tpu.pipeline_mode<synchronous>, transform_indices = @transform_6, window_bounds = array<i64: 32, 32>}, {pipeline_mode = #tpu.pipeline_mode<synchronous>, transform_indices = @transform_7, window_bounds = array<i64: 4, 64>}, {pipeline_mode = #tpu.pipeline_mode<synchronous>, transform_indices = @transform_8, window_bounds = array<i64: 32, 32>}, {pipeline_mode = #tpu.pipeline_mode<synchronous>, transform_indices = @transform_9, window_bounds = array<i64: 1, 32>}, {pipeline_mode = #tpu.pipeline_mode<synchronous>, transform_indices = @transform_10, window_bounds = array<i64: 1, 32>}, {pipeline_mode = #tpu.pipeline_mode<synchronous>, transform_indices = @transform_11, window_bounds = array<i64: 1, 32>}, {pipeline_mode = #tpu.pipeline_mode<synchronous>, transform_indices = @transform_12, window_bounds = array<i64: 32, 128>}, {pipeline_mode = #tpu.pipeline_mode<synchronous>, transform_indices = @transform_13, window_bounds = array<i64: 1, 128>}, {pipeline_mode = #tpu.pipeline_mode<synchronous>, transform_indices = @transform_14, window_bounds = array<i64: 128, 32>}, {pipeline_mode = #tpu.pipeline_mode<synchronous>, transform_indices = @transform_15, window_bounds = array<i64: 1, 32>}, {transform_indices = @transform_16, window_bounds = array<i64: 1, 8, 32>}]} {
    %c0 = arith.constant 0 : index
    %c0_0 = arith.constant 0 : index
    %0 = vector.load %arg1[%c0, %c0_0] : memref<8x32xf32, #tpu.memory_space<vmem>>, vector<8x32xf32>
    %c0_1 = arith.constant 0 : index
    %c0_2 = arith.constant 0 : index
    %c0_3 = arith.constant 0 : index
    %1 = vector.load %arg2[%c0_1, %c0_2, %c0_3] : memref<1x64x4xf32, #tpu.memory_space<vmem>>, vector<1x64x4xf32>
    %2 = vector.shape_cast %1 : vector<1x64x4xf32> to vector<64x4xf32>
    %c0_4 = arith.constant 0 : index
    %c0_5 = arith.constant 0 : index
    %3 = vector.load %arg3[%c0_4, %c0_5] : memref<1x32xf32, #tpu.memory_space<vmem>>, vector<1x32xf32>
    %c0_6 = arith.constant 0 : index
    %c0_7 = arith.constant 0 : index
    %4 = vector.load %arg4[%c0_6, %c0_7] : memref<1x32xf32, #tpu.memory_space<vmem>>, vector<1x32xf32>
    %cst = arith.constant dense<0.000000e+00> : vector<8xf32>
    %5 = vector.multi_reduction <add>, %0, %cst [1] : vector<8x32xf32> to vector<8xf32>
    %6 = vector.shape_cast %5 : vector<8xf32> to vector<8x1xf32>
    %cst_8 = arith.constant 3.200000e+01 : f32
    %7 = vector.broadcast %cst_8 : f32 to vector<8x1xf32>
    %8 = arith.divf %6, %7 : vector<8x1xf32>
    %9 = vector.broadcast %8 : vector<8x1xf32> to vector<8x32xf32>
    %10 = arith.subf %0, %9 : vector<8x32xf32>
    %11 = arith.mulf %10, %10 : vector<8x32xf32>
    %cst_9 = arith.constant dense<0.000000e+00> : vector<8xf32>
    %12 = vector.multi_reduction <add>, %11, %cst_9 [1] : vector<8x32xf32> to vector<8xf32>
    %13 = vector.shape_cast %12 : vector<8xf32> to vector<8x1xf32>
    %cst_10 = arith.constant 3.200000e+01 : f32
    %14 = vector.broadcast %cst_10 : f32 to vector<8x1xf32>
    %15 = arith.divf %13, %14 : vector<8x1xf32>
    %cst_11 = arith.constant 9.99999974E-6 : f32
    %16 = vector.broadcast %cst_11 : f32 to vector<8x1xf32>
    %17 = arith.addf %15, %16 : vector<8x1xf32>
    %18 = math.rsqrt %17 : vector<8x1xf32>
    %19 = vector.broadcast %18 : vector<8x1xf32> to vector<8x32xf32>
    %20 = arith.mulf %10, %19 : vector<8x32xf32>
    %21 = vector.broadcast %3 : vector<1x32xf32> to vector<8x32xf32>
    %22 = arith.mulf %20, %21 : vector<8x32xf32>
    %23 = vector.broadcast %4 : vector<1x32xf32> to vector<8x32xf32>
    %24 = arith.addf %22, %23 : vector<8x32xf32>
    %c0_12 = arith.constant 0 : index
    %c0_13 = arith.constant 0 : index
    %25 = vector.load %arg5[%c0_12, %c0_13] : memref<1x4xf32, #tpu.memory_space<vmem>>, vector<1x4xf32>
    %c0_14 = arith.constant 0 : index
    %c0_15 = arith.constant 0 : index
    %26 = vector.load %arg6[%c0_14, %c0_15] : memref<1x4xf32, #tpu.memory_space<vmem>>, vector<1x4xf32>
    %cst_16 = arith.constant dense<0.000000e+00> : vector<64xf32>
    %27 = vector.multi_reduction <add>, %2, %cst_16 [1] : vector<64x4xf32> to vector<64xf32>
    %28 = vector.shape_cast %27 : vector<64xf32> to vector<64x1xf32>
    %cst_17 = arith.constant 4.000000e+00 : f32
    %29 = vector.broadcast %cst_17 : f32 to vector<64x1xf32>
    %30 = arith.divf %28, %29 : vector<64x1xf32>
    %31 = vector.broadcast %30 : vector<64x1xf32> to vector<64x4xf32>
    %32 = arith.subf %2, %31 : vector<64x4xf32>
    %33 = arith.mulf %32, %32 : vector<64x4xf32>
    %cst_18 = arith.constant dense<0.000000e+00> : vector<64xf32>
    %34 = vector.multi_reduction <add>, %33, %cst_18 [1] : vector<64x4xf32> to vector<64xf32>
    %35 = vector.shape_cast %34 : vector<64xf32> to vector<64x1xf32>
    %cst_19 = arith.constant 4.000000e+00 : f32
    %36 = vector.broadcast %cst_19 : f32 to vector<64x1xf32>
    %37 = arith.divf %35, %36 : vector<64x1xf32>
    %cst_20 = arith.constant 9.99999974E-6 : f32
    %38 = vector.broadcast %cst_20 : f32 to vector<64x1xf32>
    %39 = arith.addf %37, %38 : vector<64x1xf32>
    %40 = math.rsqrt %39 : vector<64x1xf32>
    %41 = vector.broadcast %40 : vector<64x1xf32> to vector<64x4xf32>
    %42 = arith.mulf %32, %41 : vector<64x4xf32>
    %43 = vector.broadcast %25 : vector<1x4xf32> to vector<64x4xf32>
    %44 = arith.mulf %42, %43 : vector<64x4xf32>
    %45 = vector.broadcast %26 : vector<1x4xf32> to vector<64x4xf32>
    %46 = arith.addf %44, %45 : vector<64x4xf32>
    %c0_21 = arith.constant 0 : index
    %c0_22 = arith.constant 0 : index
    %47 = vector.load %arg7[%c0_21, %c0_22] : memref<32x32xf32, #tpu.memory_space<vmem>>, vector<32x32xf32>
    %cst_23 = arith.constant dense<0.000000e+00> : vector<8x32xf32>
    %48 = tpu.matmul %24, %47, %cst_23 {dimension_numbers = #tpu.dot_dimension_numbers<[1], [0], [0], [1], [0, 0, 1, 1], [], []>} : vector<8x32xf32>, vector<32x32xf32>, vector<8x32xf32> -> vector<8x32xf32>
    %c0_24 = arith.constant 0 : index
    %c0_25 = arith.constant 0 : index
    %49 = vector.load %arg8[%c0_24, %c0_25] : memref<4x64xf32, #tpu.memory_space<vmem>>, vector<4x64xf32>
    %cst_26 = arith.constant dense<0.000000e+00> : vector<64x64xf32>
    %50 = tpu.matmul %46, %49, %cst_26 {dimension_numbers = #tpu.dot_dimension_numbers<[1], [0], [0], [1], [0, 0, 1, 1], [], []>} : vector<64x4xf32>, vector<4x64xf32>, vector<64x64xf32> -> vector<64x64xf32>
    %51 = vector.extract_strided_slice %50 {offsets = [0, 0], sizes = [64, 32], strides = [1, 1]} : vector<64x64xf32> to vector<64x32xf32>
    %52 = vector.extract_strided_slice %50 {offsets = [0, 32], sizes = [64, 32], strides = [1, 1]} : vector<64x64xf32> to vector<64x32xf32>
    %53 = vector.extract_strided_slice %48 {offsets = [0, 0], sizes = [8, 8], strides = [1, 1]} : vector<8x32xf32> to vector<8x8xf32>
    %54 = vector.extract_strided_slice %51 {offsets = [0, 0], sizes = [64, 8], strides = [1, 1]} : vector<64x32xf32> to vector<64x8xf32>
    %55 = vector.extract_strided_slice %52 {offsets = [0, 0], sizes = [64, 8], strides = [1, 1]} : vector<64x32xf32> to vector<64x8xf32>
    %cst_27 = arith.constant dense<0.000000e+00> : vector<8x64xf32>
    %56 = tpu.matmul %53, %54, %cst_27 {dimension_numbers = #tpu.dot_dimension_numbers<[1], [1], [0], [0], [0, 0, 1, 0], [], []>} : vector<8x8xf32>, vector<64x8xf32>, vector<8x64xf32> -> vector<8x64xf32>
    %cst_28 = arith.constant 0.353553385 : f32
    %57 = vector.broadcast %cst_28 : f32 to vector<8x64xf32>
    %58 = arith.mulf %56, %57 : vector<8x64xf32>
    %cst_29 = arith.constant dense<0xFF800000> : vector<8xf32>
    %59 = vector.multi_reduction <maximumf>, %58, %cst_29 [1] : vector<8x64xf32> to vector<8xf32>
    %60 = vector.shape_cast %59 : vector<8xf32> to vector<8x1xf32>
    %61 = vector.broadcast %60 : vector<8x1xf32> to vector<8x64xf32>
    %62 = arith.subf %58, %61 : vector<8x64xf32>
    %63 = math.exp %62 : vector<8x64xf32>
    %cst_30 = arith.constant dense<0.000000e+00> : vector<8xf32>
    %64 = vector.multi_reduction <add>, %63, %cst_30 [1] : vector<8x64xf32> to vector<8xf32>
    %65 = vector.shape_cast %64 : vector<8xf32> to vector<8x1xf32>
    %66 = tpu.reciprocal %65 {approx = true} : vector<8x1xf32> -> vector<8x1xf32>
    %67 = vector.broadcast %66 : vector<8x1xf32> to vector<8x64xf32>
    %68 = arith.mulf %63, %67 : vector<8x64xf32>
    %cst_31 = arith.constant dense<0.000000e+00> : vector<8x8xf32>
    %69 = tpu.matmul %68, %55, %cst_31 {dimension_numbers = #tpu.dot_dimension_numbers<[1], [0], [0], [1], [0, 0, 1, 1], [], []>} : vector<8x64xf32>, vector<64x8xf32>, vector<8x8xf32> -> vector<8x8xf32>
    %70 = vector.extract_strided_slice %48 {offsets = [0, 8], sizes = [8, 8], strides = [1, 1]} : vector<8x32xf32> to vector<8x8xf32>
    %71 = vector.extract_strided_slice %51 {offsets = [0, 8], sizes = [64, 8], strides = [1, 1]} : vector<64x32xf32> to vector<64x8xf32>
    %72 = vector.extract_strided_slice %52 {offsets = [0, 8], sizes = [64, 8], strides = [1, 1]} : vector<64x32xf32> to vector<64x8xf32>
    %cst_32 = arith.constant dense<0.000000e+00> : vector<8x64xf32>
    %73 = tpu.matmul %70, %71, %cst_32 {dimension_numbers = #tpu.dot_dimension_numbers<[1], [1], [0], [0], [0, 0, 1, 0], [], []>} : vector<8x8xf32>, vector<64x8xf32>, vector<8x64xf32> -> vector<8x64xf32>
    %cst_33 = arith.constant 0.353553385 : f32
    %74 = vector.broadcast %cst_33 : f32 to vector<8x64xf32>
    %75 = arith.mulf %73, %74 : vector<8x64xf32>
    %cst_34 = arith.constant dense<0xFF800000> : vector<8xf32>
    %76 = vector.multi_reduction <maximumf>, %75, %cst_34 [1] : vector<8x64xf32> to vector<8xf32>
    %77 = vector.shape_cast %76 : vector<8xf32> to vector<8x1xf32>
    %78 = vector.broadcast %77 : vector<8x1xf32> to vector<8x64xf32>
    %79 = arith.subf %75, %78 : vector<8x64xf32>
    %80 = math.exp %79 : vector<8x64xf32>
    %cst_35 = arith.constant dense<0.000000e+00> : vector<8xf32>
    %81 = vector.multi_reduction <add>, %80, %cst_35 [1] : vector<8x64xf32> to vector<8xf32>
    %82 = vector.shape_cast %81 : vector<8xf32> to vector<8x1xf32>
    %83 = tpu.reciprocal %82 {approx = true} : vector<8x1xf32> -> vector<8x1xf32>
    %84 = vector.broadcast %83 : vector<8x1xf32> to vector<8x64xf32>
    %85 = arith.mulf %80, %84 : vector<8x64xf32>
    %cst_36 = arith.constant dense<0.000000e+00> : vector<8x8xf32>
    %86 = tpu.matmul %85, %72, %cst_36 {dimension_numbers = #tpu.dot_dimension_numbers<[1], [0], [0], [1], [0, 0, 1, 1], [], []>} : vector<8x64xf32>, vector<64x8xf32>, vector<8x8xf32> -> vector<8x8xf32>
    %87 = vector.extract_strided_slice %48 {offsets = [0, 16], sizes = [8, 8], strides = [1, 1]} : vector<8x32xf32> to vector<8x8xf32>
    %88 = vector.extract_strided_slice %51 {offsets = [0, 16], sizes = [64, 8], strides = [1, 1]} : vector<64x32xf32> to vector<64x8xf32>
    %89 = vector.extract_strided_slice %52 {offsets = [0, 16], sizes = [64, 8], strides = [1, 1]} : vector<64x32xf32> to vector<64x8xf32>
    %cst_37 = arith.constant dense<0.000000e+00> : vector<8x64xf32>
    %90 = tpu.matmul %87, %88, %cst_37 {dimension_numbers = #tpu.dot_dimension_numbers<[1], [1], [0], [0], [0, 0, 1, 0], [], []>} : vector<8x8xf32>, vector<64x8xf32>, vector<8x64xf32> -> vector<8x64xf32>
    %cst_38 = arith.constant 0.353553385 : f32
    %91 = vector.broadcast %cst_38 : f32 to vector<8x64xf32>
    %92 = arith.mulf %90, %91 : vector<8x64xf32>
    %cst_39 = arith.constant dense<0xFF800000> : vector<8xf32>
    %93 = vector.multi_reduction <maximumf>, %92, %cst_39 [1] : vector<8x64xf32> to vector<8xf32>
    %94 = vector.shape_cast %93 : vector<8xf32> to vector<8x1xf32>
    %95 = vector.broadcast %94 : vector<8x1xf32> to vector<8x64xf32>
    %96 = arith.subf %92, %95 : vector<8x64xf32>
    %97 = math.exp %96 : vector<8x64xf32>
    %cst_40 = arith.constant dense<0.000000e+00> : vector<8xf32>
    %98 = vector.multi_reduction <add>, %97, %cst_40 [1] : vector<8x64xf32> to vector<8xf32>
    %99 = vector.shape_cast %98 : vector<8xf32> to vector<8x1xf32>
    %100 = tpu.reciprocal %99 {approx = true} : vector<8x1xf32> -> vector<8x1xf32>
    %101 = vector.broadcast %100 : vector<8x1xf32> to vector<8x64xf32>
    %102 = arith.mulf %97, %101 : vector<8x64xf32>
    %cst_41 = arith.constant dense<0.000000e+00> : vector<8x8xf32>
    %103 = tpu.matmul %102, %89, %cst_41 {dimension_numbers = #tpu.dot_dimension_numbers<[1], [0], [0], [1], [0, 0, 1, 1], [], []>} : vector<8x64xf32>, vector<64x8xf32>, vector<8x8xf32> -> vector<8x8xf32>
    %104 = vector.extract_strided_slice %48 {offsets = [0, 24], sizes = [8, 8], strides = [1, 1]} : vector<8x32xf32> to vector<8x8xf32>
    %105 = vector.extract_strided_slice %51 {offsets = [0, 24], sizes = [64, 8], strides = [1, 1]} : vector<64x32xf32> to vector<64x8xf32>
    %106 = vector.extract_strided_slice %52 {offsets = [0, 24], sizes = [64, 8], strides = [1, 1]} : vector<64x32xf32> to vector<64x8xf32>
    %cst_42 = arith.constant dense<0.000000e+00> : vector<8x64xf32>
    %107 = tpu.matmul %104, %105, %cst_42 {dimension_numbers = #tpu.dot_dimension_numbers<[1], [1], [0], [0], [0, 0, 1, 0], [], []>} : vector<8x8xf32>, vector<64x8xf32>, vector<8x64xf32> -> vector<8x64xf32>
    %cst_43 = arith.constant 0.353553385 : f32
    %108 = vector.broadcast %cst_43 : f32 to vector<8x64xf32>
    %109 = arith.mulf %107, %108 : vector<8x64xf32>
    %cst_44 = arith.constant dense<0xFF800000> : vector<8xf32>
    %110 = vector.multi_reduction <maximumf>, %109, %cst_44 [1] : vector<8x64xf32> to vector<8xf32>
    %111 = vector.shape_cast %110 : vector<8xf32> to vector<8x1xf32>
    %112 = vector.broadcast %111 : vector<8x1xf32> to vector<8x64xf32>
    %113 = arith.subf %109, %112 : vector<8x64xf32>
    %114 = math.exp %113 : vector<8x64xf32>
    %cst_45 = arith.constant dense<0.000000e+00> : vector<8xf32>
    %115 = vector.multi_reduction <add>, %114, %cst_45 [1] : vector<8x64xf32> to vector<8xf32>
    %116 = vector.shape_cast %115 : vector<8xf32> to vector<8x1xf32>
    %117 = tpu.reciprocal %116 {approx = true} : vector<8x1xf32> -> vector<8x1xf32>
    %118 = vector.broadcast %117 : vector<8x1xf32> to vector<8x64xf32>
    %119 = arith.mulf %114, %118 : vector<8x64xf32>
    %cst_46 = arith.constant dense<0.000000e+00> : vector<8x8xf32>
    %120 = tpu.matmul %119, %106, %cst_46 {dimension_numbers = #tpu.dot_dimension_numbers<[1], [0], [0], [1], [0, 0, 1, 1], [], []>} : vector<8x64xf32>, vector<64x8xf32>, vector<8x8xf32> -> vector<8x8xf32>
    %121 = tpu.concatenate %69, %86, %103, %120 in 1 : vector<8x8xf32>, vector<8x8xf32>, vector<8x8xf32>, vector<8x8xf32> -> vector<8x32xf32>
    %c0_47 = arith.constant 0 : index
    %c0_48 = arith.constant 0 : index
    %122 = vector.load %arg9[%c0_47, %c0_48] : memref<32x32xf32, #tpu.memory_space<vmem>>, vector<32x32xf32>
    %cst_49 = arith.constant dense<0.000000e+00> : vector<8x32xf32>
    %123 = tpu.matmul %121, %122, %cst_49 {dimension_numbers = #tpu.dot_dimension_numbers<[1], [0], [0], [1], [0, 0, 1, 1], [], []>} : vector<8x32xf32>, vector<32x32xf32>, vector<8x32xf32> -> vector<8x32xf32>
    %124 = arith.addf %0, %123 : vector<8x32xf32>
    %c0_50 = arith.constant 0 : index
    %c0_51 = arith.constant 0 : index
    %125 = vector.load %arg10[%c0_50, %c0_51] : memref<1x32xf32, #tpu.memory_space<vmem>>, vector<1x32xf32>
    %126 = vector.broadcast %125 : vector<1x32xf32> to vector<8x32xf32>
    %127 = arith.addf %124, %126 : vector<8x32xf32>
    %c0_52 = arith.constant 0 : index
    %c0_53 = arith.constant 0 : index
    %128 = vector.load %arg11[%c0_52, %c0_53] : memref<1x32xf32, #tpu.memory_space<vmem>>, vector<1x32xf32>
    %c0_54 = arith.constant 0 : index
    %c0_55 = arith.constant 0 : index
    %129 = vector.load %arg12[%c0_54, %c0_55] : memref<1x32xf32, #tpu.memory_space<vmem>>, vector<1x32xf32>
    %cst_56 = arith.constant dense<0.000000e+00> : vector<8xf32>
    %130 = vector.multi_reduction <add>, %127, %cst_56 [1] : vector<8x32xf32> to vector<8xf32>
    %131 = vector.shape_cast %130 : vector<8xf32> to vector<8x1xf32>
    %cst_57 = arith.constant 3.200000e+01 : f32
    %132 = vector.broadcast %cst_57 : f32 to vector<8x1xf32>
    %133 = arith.divf %131, %132 : vector<8x1xf32>
    %134 = vector.broadcast %133 : vector<8x1xf32> to vector<8x32xf32>
    %135 = arith.subf %127, %134 : vector<8x32xf32>
    %136 = arith.mulf %135, %135 : vector<8x32xf32>
    %cst_58 = arith.constant dense<0.000000e+00> : vector<8xf32>
    %137 = vector.multi_reduction <add>, %136, %cst_58 [1] : vector<8x32xf32> to vector<8xf32>
    %138 = vector.shape_cast %137 : vector<8xf32> to vector<8x1xf32>
    %cst_59 = arith.constant 3.200000e+01 : f32
    %139 = vector.broadcast %cst_59 : f32 to vector<8x1xf32>
    %140 = arith.divf %138, %139 : vector<8x1xf32>
    %cst_60 = arith.constant 9.99999974E-6 : f32
    %141 = vector.broadcast %cst_60 : f32 to vector<8x1xf32>
    %142 = arith.addf %140, %141 : vector<8x1xf32>
    %143 = math.rsqrt %142 : vector<8x1xf32>
    %144 = vector.broadcast %143 : vector<8x1xf32> to vector<8x32xf32>
    %145 = arith.mulf %135, %144 : vector<8x32xf32>
    %146 = vector.broadcast %128 : vector<1x32xf32> to vector<8x32xf32>
    %147 = arith.mulf %145, %146 : vector<8x32xf32>
    %148 = vector.broadcast %129 : vector<1x32xf32> to vector<8x32xf32>
    %149 = arith.addf %147, %148 : vector<8x32xf32>
    %c0_61 = arith.constant 0 : index
    %c0_62 = arith.constant 0 : index
    %150 = vector.load %arg13[%c0_61, %c0_62] : memref<32x128xf32, #tpu.memory_space<vmem>>, vector<32x128xf32>
    %cst_63 = arith.constant dense<0.000000e+00> : vector<8x128xf32>
    %151 = tpu.matmul %149, %150, %cst_63 {dimension_numbers = #tpu.dot_dimension_numbers<[1], [0], [0], [1], [0, 0, 1, 1], [], []>} : vector<8x32xf32>, vector<32x128xf32>, vector<8x128xf32> -> vector<8x128xf32>
    %c0_64 = arith.constant 0 : index
    %c0_65 = arith.constant 0 : index
    %152 = vector.load %arg14[%c0_64, %c0_65] : memref<1x128xf32, #tpu.memory_space<vmem>>, vector<1x128xf32>
    %153 = vector.broadcast %152 : vector<1x128xf32> to vector<8x128xf32>
    %154 = arith.addf %151, %153 : vector<8x128xf32>
    %155 = arith.mulf %154, %154 : vector<8x128xf32>
    %156 = arith.mulf %154, %155 : vector<8x128xf32>
    %cst_66 = arith.constant 4.471500e-02 : f32
    %157 = vector.broadcast %cst_66 : f32 to vector<8x128xf32>
    %158 = arith.mulf %157, %156 : vector<8x128xf32>
    %159 = arith.addf %154, %158 : vector<8x128xf32>
    %cst_67 = arith.constant 0.797884583 : f32
    %160 = vector.broadcast %cst_67 : f32 to vector<8x128xf32>
    %161 = arith.mulf %160, %159 : vector<8x128xf32>
    %162 = math.tanh %161 : vector<8x128xf32>
    %cst_68 = arith.constant 1.000000e+00 : f32
    %163 = vector.broadcast %cst_68 : f32 to vector<8x128xf32>
    %164 = arith.addf %163, %162 : vector<8x128xf32>
    %cst_69 = arith.constant 5.000000e-01 : f32
    %165 = vector.broadcast %cst_69 : f32 to vector<8x128xf32>
    %166 = arith.mulf %165, %164 : vector<8x128xf32>
    %167 = arith.mulf %154, %166 : vector<8x128xf32>
    %c0_70 = arith.constant 0 : index
    %c0_71 = arith.constant 0 : index
    %168 = vector.load %arg15[%c0_70, %c0_71] : memref<128x32xf32, #tpu.memory_space<vmem>>, vector<128x32xf32>
    %cst_72 = arith.constant dense<0.000000e+00> : vector<8x32xf32>
    %169 = tpu.matmul %167, %168, %cst_72 {dimension_numbers = #tpu.dot_dimension_numbers<[1], [0], [0], [1], [0, 0, 1, 1], [], []>} : vector<8x128xf32>, vector<128x32xf32>, vector<8x32xf32> -> vector<8x32xf32>
    %170 = arith.addf %127, %169 : vector<8x32xf32>
    %c0_73 = arith.constant 0 : index
    %c0_74 = arith.constant 0 : index
    %171 = vector.load %arg16[%c0_73, %c0_74] : memref<1x32xf32, #tpu.memory_space<vmem>>, vector<1x32xf32>
    %172 = vector.broadcast %171 : vector<1x32xf32> to vector<8x32xf32>
    %173 = arith.addf %170, %172 : vector<8x32xf32>
    %c0_75 = arith.constant 0 : index
    %c0_76 = arith.constant 0 : index
    %c0_77 = arith.constant 0 : index
    %174 = vector.load %arg17[%c0_75, %c0_76, %c0_77] : memref<1x8x32xf32, #tpu.memory_space<vmem>>, vector<1x8x32xf32>
    %175 = vector.shape_cast %174 : vector<1x8x32xf32> to vector<8x32xf32>
    %176 = vector.shape_cast %173 : vector<8x32xf32> to vector<1x8x32xf32>
    tpu.vector_store %arg17[%c0_75, %c0_76, %c0_77], %176 {strides = array<i32>} : memref<1x8x32xf32, #tpu.memory_space<vmem>>, vector<1x8x32xf32>,
    return
  }
  func.func @transform_0(%arg0: i32) -> (i32, i32) {
    %c0_i32 = arith.constant 0 : i32
    %c0_i32_0 = arith.constant 0 : i32
    %c0_i32_1 = arith.constant 0 : i32
    return %c0_i32, %c0_i32_0 : i32, i32
  }
  func.func @transform_1(%arg0: i32) -> (i32, i32, i32) {
    %c0_i32 = arith.constant 0 : i32
    %c0_i32_0 = arith.constant 0 : i32
    %c0_i32_1 = arith.constant 0 : i32
    return %arg0, %c0_i32, %c0_i32_0 : i32, i32, i32
  }
  func.func @transform_2(%arg0: i32) -> (i32, i32) {
    %c0_i32 = arith.constant 0 : i32
    %c0_i32_0 = arith.constant 0 : i32
    %c0_i32_1 = arith.constant 0 : i32
    return %c0_i32, %c0_i32_0 : i32, i32
  }
  func.func @transform_3(%arg0: i32) -> (i32, i32) {
    %c0_i32 = arith.constant 0 : i32
    %c0_i32_0 = arith.constant 0 : i32
    %c0_i32_1 = arith.constant 0 : i32
    return %c0_i32, %c0_i32_0 : i32, i32
  }
  func.func @transform_4(%arg0: i32) -> (i32, i32) {
    %c0_i32 = arith.constant 0 : i32
    %c0_i32_0 = arith.constant 0 : i32
    %c0_i32_1 = arith.constant 0 : i32
    return %c0_i32, %c0_i32_0 : i32, i32
  }
  func.func @transform_5(%arg0: i32) -> (i32, i32) {
    %c0_i32 = arith.constant 0 : i32
    %c0_i32_0 = arith.constant 0 : i32
    %c0_i32_1 = arith.constant 0 : i32
    return %c0_i32, %c0_i32_0 : i32, i32
  }
  func.func @transform_6(%arg0: i32) -> (i32, i32) {
    %c0_i32 = arith.constant 0 : i32
    %c0_i32_0 = arith.constant 0 : i32
    %c0_i32_1 = arith.constant 0 : i32
    return %c0_i32, %c0_i32_0 : i32, i32
  }
  func.func @transform_7(%arg0: i32) -> (i32, i32) {
    %c0_i32 = arith.constant 0 : i32
    %c0_i32_0 = arith.constant 0 : i32
    %c0_i32_1 = arith.constant 0 : i32
    return %c0_i32, %c0_i32_0 : i32, i32
  }
  func.func @transform_8(%arg0: i32) -> (i32, i32) {
    %c0_i32 = arith.constant 0 : i32
    %c0_i32_0 = arith.constant 0 : i32
    %c0_i32_1 = arith.constant 0 : i32
    return %c0_i32, %c0_i32_0 : i32, i32
  }
  func.func @transform_9(%arg0: i32) -> (i32, i32) {
    %c0_i32 = arith.constant 0 : i32
    %c0_i32_0 = arith.constant 0 : i32
    %c0_i32_1 = arith.constant 0 : i32
    return %c0_i32, %c0_i32_0 : i32, i32
  }
  func.func @transform_10(%arg0: i32) -> (i32, i32) {
    %c0_i32 = arith.constant 0 : i32
    %c0_i32_0 = arith.constant 0 : i32
    %c0_i32_1 = arith.constant 0 : i32
    return %c0_i32, %c0_i32_0 : i32, i32
  }
  func.func @transform_11(%arg0: i32) -> (i32, i32) {
    %c0_i32 = arith.constant 0 : i32
    %c0_i32_0 = arith.constant 0 : i32
    %c0_i32_1 = arith.constant 0 : i32
    return %c0_i32, %c0_i32_0 : i32, i32
  }
  func.func @transform_12(%arg0: i32) -> (i32, i32) {
    %c0_i32 = arith.constant 0 : i32
    %c0_i32_0 = arith.constant 0 : i32
    %c0_i32_1 = arith.constant 0 : i32
    return %c0_i32, %c0_i32_0 : i32, i32
  }
  func.func @transform_13(%arg0: i32) -> (i32, i32) {
    %c0_i32 = arith.constant 0 : i32
    %c0_i32_0 = arith.constant 0 : i32
    %c0_i32_1 = arith.constant 0 : i32
    return %c0_i32, %c0_i32_0 : i32, i32
  }
  func.func @transform_14(%arg0: i32) -> (i32, i32) {
    %c0_i32 = arith.constant 0 : i32
    %c0_i32_0 = arith.constant 0 : i32
    %c0_i32_1 = arith.constant 0 : i32
    return %c0_i32, %c0_i32_0 : i32, i32
  }
  func.func @transform_15(%arg0: i32) -> (i32, i32) {
    %c0_i32 = arith.constant 0 : i32
    %c0_i32_0 = arith.constant 0 : i32
    %c0_i32_1 = arith.constant 0 : i32
    return %c0_i32, %c0_i32_0 : i32, i32
  }
  func.func @transform_16(%arg0: i32) -> (i32, i32, i32) {
    %c0_i32 = arith.constant 0 : i32
    %c0_i32_0 = arith.constant 0 : i32
    %c0_i32_1 = arith.constant 0 : i32
    return %arg0, %c0_i32, %c0_i32_0 : i32, i32, i32
  }
}

module attributes {stable_mosaic.version = 11 : i64} {
  func.func @_pde_decoder_kernel(%arg0: i32, %arg1: memref<1x8x32xf32, #tpu.memory_space<vmem>>, %arg2: memref<32x128xf32, #tpu.memory_space<vmem>>, %arg3: memref<1x128xf32, #tpu.memory_space<vmem>>, %arg4: memref<128x128xf32, #tpu.memory_space<vmem>>, %arg5: memref<1x128xf32, #tpu.memory_space<vmem>>, %arg6: memref<32x2xf32, #tpu.memory_space<vmem>>, %arg7: memref<1x2xf32, #tpu.memory_space<vmem>>, %arg8: memref<2x32xf32, #tpu.memory_space<vmem>>, %arg9: memref<1x32xf32, #tpu.memory_space<vmem>>, %arg10: memref<1x8x128xf32, #tpu.memory_space<vmem>>) attributes {dimension_semantics = [#tpu.dimension_semantics<parallel>], iteration_bounds = array<i64: 2>, scalar_prefetch = 0 : i64, scratch_operands = 0 : i64, tpu.core_type = #tpu.core_type<tc>, window_params = [{transform_indices = @transform_0, window_bounds = array<i64: 1, 8, 32>}, {pipeline_mode = #tpu.pipeline_mode<synchronous>, transform_indices = @transform_1, window_bounds = array<i64: 32, 128>}, {pipeline_mode = #tpu.pipeline_mode<synchronous>, transform_indices = @transform_2, window_bounds = array<i64: 1, 128>}, {pipeline_mode = #tpu.pipeline_mode<synchronous>, transform_indices = @transform_3, window_bounds = array<i64: 128, 128>}, {pipeline_mode = #tpu.pipeline_mode<synchronous>, transform_indices = @transform_4, window_bounds = array<i64: 1, 128>}, {pipeline_mode = #tpu.pipeline_mode<synchronous>, transform_indices = @transform_5, window_bounds = array<i64: 32, 2>}, {pipeline_mode = #tpu.pipeline_mode<synchronous>, transform_indices = @transform_6, window_bounds = array<i64: 1, 2>}, {pipeline_mode = #tpu.pipeline_mode<synchronous>, transform_indices = @transform_7, window_bounds = array<i64: 2, 32>}, {pipeline_mode = #tpu.pipeline_mode<synchronous>, transform_indices = @transform_8, window_bounds = array<i64: 1, 32>}, {transform_indices = @transform_9, window_bounds = array<i64: 1, 8, 128>}]} {
    %c0 = arith.constant 0 : index
    %c0_0 = arith.constant 0 : index
    %c0_1 = arith.constant 0 : index
    %0 = vector.load %arg1[%c0, %c0_0, %c0_1] : memref<1x8x32xf32, #tpu.memory_space<vmem>>, vector<1x8x32xf32>
    %1 = vector.shape_cast %0 : vector<1x8x32xf32> to vector<8x32xf32>
    %c1_i32 = arith.constant 1 : i32
    %2 = tpu.dynamic_rotate %1 by %c1_i32 dim 0 : vector<8x32xf32>, i32 -> vector<8x32xf32>
    %c7_i32 = arith.constant 7 : i32
    %3 = tpu.dynamic_rotate %1 by %c7_i32 dim 0 : vector<8x32xf32>, i32 -> vector<8x32xf32>
    %4 = arith.addf %2, %3 : vector<8x32xf32>
    %cst = arith.constant 2.000000e+00 : f32
    %5 = vector.broadcast %cst : f32 to vector<8x32xf32>
    %6 = arith.mulf %5, %1 : vector<8x32xf32>
    %7 = arith.subf %4, %6 : vector<8x32xf32>
    %cst_2 = arith.constant 1.000000e-01 : f32
    %8 = vector.broadcast %cst_2 : f32 to vector<8x32xf32>
    %9 = arith.mulf %8, %7 : vector<8x32xf32>
    %10 = arith.addf %1, %9 : vector<8x32xf32>
    %c0_3 = arith.constant 0 : index
    %c0_4 = arith.constant 0 : index
    %11 = vector.load %arg2[%c0_3, %c0_4] : memref<32x128xf32, #tpu.memory_space<vmem>>, vector<32x128xf32>
    %cst_5 = arith.constant dense<0.000000e+00> : vector<8x128xf32>
    %12 = tpu.matmul %10, %11, %cst_5 {dimension_numbers = #tpu.dot_dimension_numbers<[1], [0], [0], [1], [0, 0, 1, 1], [], []>} : vector<8x32xf32>, vector<32x128xf32>, vector<8x128xf32> -> vector<8x128xf32>
    %c0_6 = arith.constant 0 : index
    %c0_7 = arith.constant 0 : index
    %13 = vector.load %arg3[%c0_6, %c0_7] : memref<1x128xf32, #tpu.memory_space<vmem>>, vector<1x128xf32>
    %14 = vector.broadcast %13 : vector<1x128xf32> to vector<8x128xf32>
    %15 = arith.addf %12, %14 : vector<8x128xf32>
    %16 = arith.mulf %15, %15 : vector<8x128xf32>
    %17 = arith.mulf %15, %16 : vector<8x128xf32>
    %cst_8 = arith.constant 4.471500e-02 : f32
    %18 = vector.broadcast %cst_8 : f32 to vector<8x128xf32>
    %19 = arith.mulf %18, %17 : vector<8x128xf32>
    %20 = arith.addf %15, %19 : vector<8x128xf32>
    %cst_9 = arith.constant 0.797884583 : f32
    %21 = vector.broadcast %cst_9 : f32 to vector<8x128xf32>
    %22 = arith.mulf %21, %20 : vector<8x128xf32>
    %23 = math.tanh %22 : vector<8x128xf32>
    %cst_10 = arith.constant 1.000000e+00 : f32
    %24 = vector.broadcast %cst_10 : f32 to vector<8x128xf32>
    %25 = arith.addf %24, %23 : vector<8x128xf32>
    %cst_11 = arith.constant 5.000000e-01 : f32
    %26 = vector.broadcast %cst_11 : f32 to vector<8x128xf32>
    %27 = arith.mulf %26, %25 : vector<8x128xf32>
    %28 = arith.mulf %15, %27 : vector<8x128xf32>
    %c0_12 = arith.constant 0 : index
    %c0_13 = arith.constant 0 : index
    %29 = vector.load %arg4[%c0_12, %c0_13] : memref<128x128xf32, #tpu.memory_space<vmem>>, vector<128x128xf32>
    %cst_14 = arith.constant dense<0.000000e+00> : vector<8x128xf32>
    %30 = tpu.matmul %28, %29, %cst_14 {dimension_numbers = #tpu.dot_dimension_numbers<[1], [0], [0], [1], [0, 0, 1, 1], [], []>} : vector<8x128xf32>, vector<128x128xf32>, vector<8x128xf32> -> vector<8x128xf32>
    %c0_15 = arith.constant 0 : index
    %c0_16 = arith.constant 0 : index
    %31 = vector.load %arg5[%c0_15, %c0_16] : memref<1x128xf32, #tpu.memory_space<vmem>>, vector<1x128xf32>
    %32 = vector.broadcast %31 : vector<1x128xf32> to vector<8x128xf32>
    %33 = arith.addf %30, %32 : vector<8x128xf32>
    %c0_17 = arith.constant 0 : index
    %c0_18 = arith.constant 0 : index
    %c0_19 = arith.constant 0 : index
    %34 = vector.load %arg10[%c0_17, %c0_18, %c0_19] : memref<1x8x128xf32, #tpu.memory_space<vmem>>, vector<1x8x128xf32>
    %35 = vector.shape_cast %34 : vector<1x8x128xf32> to vector<8x128xf32>
    %36 = vector.shape_cast %33 : vector<8x128xf32> to vector<1x8x128xf32>
    tpu.vector_store %arg10[%c0_17, %c0_18, %c0_19], %36 {strides = array<i32>} : memref<1x8x128xf32, #tpu.memory_space<vmem>>, vector<1x8x128xf32>,
    return
  }
  func.func @transform_0(%arg0: i32) -> (i32, i32, i32) {
    %c0_i32 = arith.constant 0 : i32
    %c0_i32_0 = arith.constant 0 : i32
    %c0_i32_1 = arith.constant 0 : i32
    return %arg0, %c0_i32, %c0_i32_0 : i32, i32, i32
  }
  func.func @transform_1(%arg0: i32) -> (i32, i32) {
    %c0_i32 = arith.constant 0 : i32
    %c0_i32_0 = arith.constant 0 : i32
    %c0_i32_1 = arith.constant 0 : i32
    return %c0_i32, %c0_i32_0 : i32, i32
  }
  func.func @transform_2(%arg0: i32) -> (i32, i32) {
    %c0_i32 = arith.constant 0 : i32
    %c0_i32_0 = arith.constant 0 : i32
    %c0_i32_1 = arith.constant 0 : i32
    return %c0_i32, %c0_i32_0 : i32, i32
  }
  func.func @transform_3(%arg0: i32) -> (i32, i32) {
    %c0_i32 = arith.constant 0 : i32
    %c0_i32_0 = arith.constant 0 : i32
    %c0_i32_1 = arith.constant 0 : i32
    return %c0_i32, %c0_i32_0 : i32, i32
  }
  func.func @transform_4(%arg0: i32) -> (i32, i32) {
    %c0_i32 = arith.constant 0 : i32
    %c0_i32_0 = arith.constant 0 : i32
    %c0_i32_1 = arith.constant 0 : i32
    return %c0_i32, %c0_i32_0 : i32, i32
  }
  func.func @transform_5(%arg0: i32) -> (i32, i32) {
    %c0_i32 = arith.constant 0 : i32
    %c0_i32_0 = arith.constant 0 : i32
    %c0_i32_1 = arith.constant 0 : i32
    return %c0_i32, %c0_i32_0 : i32, i32
  }
  func.func @transform_6(%arg0: i32) -> (i32, i32) {
    %c0_i32 = arith.constant 0 : i32
    %c0_i32_0 = arith.constant 0 : i32
    %c0_i32_1 = arith.constant 0 : i32
    return %c0_i32, %c0_i32_0 : i32, i32
  }
  func.func @transform_7(%arg0: i32) -> (i32, i32) {
    %c0_i32 = arith.constant 0 : i32
    %c0_i32_0 = arith.constant 0 : i32
    %c0_i32_1 = arith.constant 0 : i32
    return %c0_i32, %c0_i32_0 : i32, i32
  }
  func.func @transform_8(%arg0: i32) -> (i32, i32) {
    %c0_i32 = arith.constant 0 : i32
    %c0_i32_0 = arith.constant 0 : i32
    %c0_i32_1 = arith.constant 0 : i32
    return %c0_i32, %c0_i32_0 : i32, i32
  }
  func.func @transform_9(%arg0: i32) -> (i32, i32, i32) {
    %c0_i32 = arith.constant 0 : i32
    %c0_i32_0 = arith.constant 0 : i32
    %c0_i32_1 = arith.constant 0 : i32
    return %arg0, %c0_i32, %c0_i32_0 : i32, i32, i32
  }
}

</mosaic_0001>

<bundles_post_ra>
// kernel: neural_gcm_forward.7
= control target key start
LH: loop header
LB: loop body
LE: loop exit
PB: predicated region body
PF: predicated region fallthrough
CT: control target
= control target key end

     0   :  { %s761_s30 = smov 0   ;;  %s861_s0 = inlined_call_operand.vmem [shape: f32[2,8,32], index: 0, kind: input, shape index: {}]   ;;  %s862_s1 = inlined_call_operand.vmem [shape: f32[32,128], index: 1, kind: input, shape index: {}]   ;;  %s863_s2 = inlined_call_operand.vmem [shape: f32[1,128], index: 2, kind: input, shape index: {}]   ;;  %s864_s3 = inlined_call_operand.vmem [shape: f32[128,128], index: 3, kind: input, shape index: {}]   ;;  %s865_s4 = inlined_call_operand.vmem [shape: f32[1,128], index: 4, kind: input, shape index: {}]   ;;  %s866_s5 = inlined_call_operand.vmem [shape: f32[32,2], index: 5, kind: input, shape index: {}]   ;;  %s867_s6 = inlined_call_operand.vmem [shape: f32[1,2], index: 6, kind: input, shape index: {}]   ;;  %s868_s7 = inlined_call_operand.vmem [shape: f32[2,32], index: 7, kind: input, shape index: {}]   ;;  %s869_s8 = inlined_call_operand.vmem [shape: f32[1,32], index: 8, kind: input, shape index: {}]   ;;  %s870_s9 = inlined_call_operand.vmem [shape: f32[2,8,128], index: 9, kind: output, shape index: {}]  }
   0x1 LB: > { %s577_s5 = sadd.s32 4294967295, %s706_s30   ;;  %p581_p0 = scmp.ge.s32.totalorder %s706_s30, 1  ;;  %s706_s30 = sphi %s761_s30, %s19_s30  }
   0x2   : > { %p286_p1 = scmp.lt.s32.totalorder %s706_s30, 3 }
   0x4   : > { %p287_p2 = pnand %p581_p0, %p286_p1 }
   0x5   : > { %v336_v0 = vld [vmem:[%s862_s1] sm:$0xff] (!%p287_p2)  ;;  %v337_v1 = vld [vmem:[%s862_s1 + $0x8] sm:$0xff] (!%p287_p2)  ;;  %v338_v2 = vld [vmem:[%s862_s1 + $0x10] sm:$0xff] (!%p287_p2)  ;;  %v708_v3 = vmov (!%p287_p2), 0.0|0.0   ;;  %vm709_vm0 = vmmov (!%p287_p2), 0   ;;  %v710_v6 = vmov (!%p287_p2), 0.0  }
   0x6   : > { %290 = sbr.rel (%p287_p2) target bundleno = 483 (0x1e3), region = 56  ;;  %657 = vmatprep.subr.bf16.mxu0 (!%p287_p2), %v708_v3  ;;  %v658_v4 = vpack.c.bf16 (!%p287_p2), %v337_v1, %v336_v0  ;;  %v339_v5 = vld [vmem:[%s862_s1 + $0x18] sm:$0xff] (!%p287_p2)  ;;  %619 = vmatprep.mubr.msk.f32.mxu0 (!%p287_p2), %vm709_vm0, %v710_v6  ;;  %p320_p3 = scmp.lt.s32.totalorder (!%p287_p2), %s577_s5, 1  ;;  %v430_v7 = vld [vmem:[%s864_s3] sm:$0xff] (!%p287_p2)  ;;  %v431_v8 = vld [vmem:[%s864_s3 + $0x8] sm:$0xff] (!%p287_p2)  ;;  %vm347_vm1 = vcmask (!%p287_p2), 261120  }
   0x7   : > { %663 = vmatprep.subr.bf16.mxu1 (!%p287_p2), %v708_v3  ;;  %v664_v9 = vpack.c.bf16 (!%p287_p2), %v431_v8, %v430_v7  ;;  %654 = vmatprep.mubr.msk.f32.mxu1 (!%p287_p2), %vm709_vm0, %v710_v6  ;;  %v661_v10 = vpack.c.bf16 (!%p287_p2), %v339_v5, %v338_v2  ;;  %v432_v19 = vld [vmem:[%s864_s3 + $0x10] sm:$0xff] (!%p287_p2)  ;;  %v433_v20 = vld [vmem:[%s864_s3 + $0x18] sm:$0xff] (!%p287_p2)  ;;  %v434_v22 = vld [vmem:[%s864_s3 + $0x20] sm:$0xff] (!%p287_p2) }
   0x8   : > { %659 = vmatpush3.bf16.msra.mxu0 (!%p287_p2), %v658_v4  ;;  %v667_v21 = vpack.c.bf16 (!%p287_p2), %v433_v20, %v432_v19  ;;  %v435_v23 = vld [vmem:[%s864_s3 + $0x28] sm:$0xff] (!%p287_p2)  ;;  %v436_v25 = vld [vmem:[%s864_s3 + $0x30] sm:$0xff] (!%p287_p2)  ;;  %v437_v26 = vld [vmem:[%s864_s3 + $0x38] sm:$0xff] (!%p287_p2) }
   0x9   : > { %660 = vmatprep.subr.bf16.mxu0 (!%p287_p2), %v708_v3  ;;  %665 = vmatpush3.bf16.msra.mxu1 (!%p287_p2), %v664_v9  ;;  %v670_v24 = vpack.c.bf16 (!%p287_p2), %v435_v23, %v434_v22  ;;  %v673_v27 = vpack.c.bf16 (!%p287_p2), %v437_v26, %v436_v25  ;;  %v438_v28 = vld [vmem:[%s864_s3 + $0x40] sm:$0xff] (!%p287_p2)  ;;  %v439_v29 = vld [vmem:[%s864_s3 + $0x48] sm:$0xff] (!%p287_p2)  ;;  %v440_v31 = vld [vmem:[%s864_s3 + $0x50] sm:$0xff] (!%p287_p2) }
   0xa   : > { %666 = vmatprep.subr.bf16.mxu1 (!%p287_p2), %v708_v3  ;;  %v676_v30 = vpack.c.bf16 (!%p287_p2), %v439_v29, %v438_v28  ;;  %v441_v32 = vld [vmem:[%s864_s3 + $0x58] sm:$0xff] (!%p287_p2)  ;;  %v442_v34 = vld [vmem:[%s864_s3 + $0x60] sm:$0xff] (!%p287_p2)  ;;  %v443_v35 = vld [vmem:[%s864_s3 + $0x68] sm:$0xff] (!%p287_p2) }
   0xb   : > { %v679_v33 = vpack.c.bf16 (!%p287_p2), %v441_v32, %v440_v31  ;;  %v682_v36 = vpack.c.bf16 (!%p287_p2), %v443_v35, %v442_v34  ;;  %v444_v37 = vld [vmem:[%s864_s3 + $0x70] sm:$0xff] (!%p287_p2)  ;;  %v445_v38 = vld [vmem:[%s864_s3 + $0x78] sm:$0xff] (!%p287_p2)  ;;  %v584_v40 = vld [vmem:[%s863_s2] ss:$0 sm:$0xff] (!%p287_p2) }
   0xc   : > { %662 = vmatpush3.bf16.msra.mxu0 (!%p287_p2), %v661_v10  ;;  %v685_v39 = vpack.c.bf16 (!%p287_p2), %v445_v38, %v444_v37  ;;  %v586_v53 = vld [vmem:[%s865_s4] ss:$0 sm:$0xff] (!%p287_p2) }
   0xd   : > { %s872_s5 = smov (!%p320_p3, %s577_s5), 1  ;;  %668 = vmatpush3.bf16.msra.mxu1 %v667_v21 }
   0xe   : > { %s582_s19 = sshll.u32 %s872_s5, 3  ;;  %669 = vmatprep.subr.bf16.mxu1 %v708_v3 }
   0xf   : > { %s323_s22 = scalar_lea.vmem %s861_s0, %s582_s19  ;;  %s327_s12 = scalar_lea.vmem %s870_s9, %s582_s19 }
  0x10   : > { %v328_v11 = vld [vmem:[%s323_s22] sm:$0xff] }
  0x11   : > { %v329_v12 = vrot.slane %v328_v11, 7  ;;  %v330_v13 = vrot.slane %v328_v11, 1  ;;  %v332_v14 = vmul.f32 2.0, %v328_v11  ;;  %671 = vmatpush3.bf16.msra.mxu1 %v670_v24 }
  0x12   : > { %672 = vmatprep.subr.bf16.mxu1 %v708_v3 }
  0x13   : > { %v331_v15 = vadd.f32 %v330_v13, %v329_v12 }
  0x15   : > { %v333_v16 = vsub.f32 %v331_v15, %v332_v14  ;;  %674 = vmatpush3.bf16.msra.mxu1 %v673_v27 }
  0x16   : > { %675 = vmatprep.subr.bf16.mxu1 %v708_v3 }
  0x17   : > { %v334_v17 = vmul.f32 0.1, %v333_v16 }
  0x19   : > { %v335_v18 = vadd.f32 %v334_v17, %v328_v11  ;;  %677 = vmatpush3.bf16.msra.mxu1 %v676_v30 }
  0x1a   : > { %678 = vmatprep.subr.bf16.mxu1 %v708_v3 }
  0x1b   : > { %620 = vmatmul.mubr.msk.f32.vlgmr.msra.gmra.mrb[0].mxu0 %vm347_vm1, %v335_v18 }
  0x1d   : > { %680 = vmatpush3.bf16.msra.mxu1 %v679_v33 }
  0x1e   : > { %681 = vmatprep.subr.bf16.mxu1 %v708_v3 }
  0x21   : > { %683 = vmatpush3.bf16.msra.mxu1 %v682_v36 }
  0x22   : > { %684 = vmatprep.subr.bf16.mxu1 %v708_v3 }
  0x25   : > { %686 = vmatpush3.bf16.msra.mxu1 %v685_v39 }
  0xee   : > { %v417_v41 = vpop.f32.mrb[0].mxu0 }
  0xef   : > { %v418_v42 = vadd.f32 %v584_v40, %v417_v41  ;;  %v621_v43 = vpop.f32.mrb[1].mxu0 }
  0xf1   : > { %v421_v44 = vmul.f32 %v418_v42, %v418_v42 }
  0xf3   : > { %v422_v45 = vmul.f32 %v421_v44, %v418_v42 }
  0xf5   : > { %v423_v46 = vmul.f32 0.044715, %v422_v45 }
  0xf7   : > { %v424_v47 = vadd.f32 %v423_v46, %v418_v42 }
  0xf9   : > { %v425_v48 = vmul.f32 0.7978846, %v424_v47 }
  0xfb   : > { %698 = vtanh.f32 %v425_v48 }
 0x105   : > { %v699_v49 = vpop.eup %698 }
 0x106   : > { %v427_v50 = vadd.f32 1.0, %v699_v49 }
 0x108   : > { %v428_v51 = vmul.f32 0.5, %v427_v50 }
 0x10a   : > { %v429_v52 = vmul.f32 %v428_v51, %v418_v42 }
 0x10c   : > { %655 = vmatmul.mubr.f32.vlgmr.msra.gmra.mrb[0].mxu1 %v429_v52 }
 0x1df   : > { %v519_v54 = vpop.f32.mrb[0].mxu1 }
 0x1e0   : > { %v520_v55 = vadd.f32 %v586_v53, %v519_v54  ;;  %v656_v56 = vpop.f32.mrb[1].mxu1 }
 0x1e2   : > { %523 = vst [vmem:[%s327_s12] sm:$0xff] %v520_v55 }
 0x1e3 PF: > { %s19_s30 = sadd.s32 1, %s706_s30  }
 0x1e4   : > { %p16_p4 = scmp.ge.s32.totalorder %s19_s30, 4  }
 0x1e6   :  { %18 = sbr.rel (!%p16_p4) target bundleno = 1 (0x1), region = 86 }

// kernel: neural_gcm_forward.4
= control target key start
LH: loop header
LB: loop body
LE: loop exit
PB: predicated region body
PF: predicated region fallthrough
CT: control target
= control target key end

     0   :  { %s3013_s21 = smov 0   ;;  %s3420_s0 = inlined_call_operand.vmem [shape: f32[8,32], index: 0, kind: input, shape index: {}]   ;;  %s3421_s1 = inlined_call_operand.vmem [shape: f32[2,64,4], index: 1, kind: input, shape index: {}]   ;;  %s3422_s2 = inlined_call_operand.vmem [shape: f32[1,32], index: 2, kind: input, shape index: {}]   ;;  %s3423_s3 = inlined_call_operand.vmem [shape: f32[1,32], index: 3, kind: input, shape index: {}]   ;;  %s3424_s4 = inlined_call_operand.vmem [shape: f32[1,4], index: 4, kind: input, shape index: {}]   ;;  %s3425_s5 = inlined_call_operand.vmem [shape: f32[1,4], index: 5, kind: input, shape index: {}]   ;;  %s3426_s6 = inlined_call_operand.vmem [shape: f32[32,32], index: 6, kind: input, shape index: {}]   ;;  %s3427_s7 = inlined_call_operand.vmem [shape: f32[4,64], index: 7, kind: input, shape index: {}]   ;;  %s3428_s8 = inlined_call_operand.vmem [shape: f32[32,32], index: 8, kind: input, shape index: {}]   ;;  %s3429_s9 = inlined_call_operand.vmem [shape: f32[1,32], index: 9, kind: input, shape index: {}]   ;;  %s3430_s10 = inlined_call_operand.vmem [shape: f32[1,32], index: 10, kind: input, shape index: {}]   ;;  %s3431_s11 = inlined_call_operand.vmem [shape: f32[1,32], index: 11, kind: input, shape index: {}]   ;;  %s3432_s12 = inlined_call_operand.vmem [shape: f32[32,128], index: 12, kind: input, shape index: {}]   ;;  %s3433_s13 = inlined_call_operand.vmem [shape: f32[1,128], index: 13, kind: input, shape index: {}]   ;;  %s3434_s14 = inlined_call_operand.vmem [shape: f32[128,32], index: 14, kind: input, shape index: {}]   ;;  %s3435_s15 = inlined_call_operand.vmem [shape: f32[1,32], index: 15, kind: input, shape index: {}]   ;;  %s3436_s16 = inlined_call_operand.vmem [shape: f32[2,8,32], index: 16, kind: output, shape index: {}]  }
   0x1   :  { %3438 = sst [smem:[#allocation2_spill]] %s3420_s0 }
   0x2 LB: > { %s2134_s22 = sadd.s32 4294967295, %s2913_s21   ;;  %p2138_p0 = scmp.ge.s32.totalorder %s2913_s21, 1  ;;  %s2913_s21 = sphi %s3013_s21, %s26_s21  }
   0x3   : > { %p462_p1 = scmp.lt.s32.totalorder %s2913_s21, 3 }
   0x5   : > { %p463_p2 = pnand %p2138_p0, %p462_p1 }
   0x6   : > { %p511_p3 = scmp.lt.s32.totalorder (!%p463_p2), %s2134_s22, 1  ;;  %vm562_vm0 = vcmask (!%p463_p2), 31744   ;;  %s3439_s29 = sld [smem:[#allocation2_spill]] (!%p463_p2)  ;;  %vm531_vm1 = vcmask (!%p463_p2), 261120   ;;  %v773_v63 = vld [vmem:[%s3427_s7] sm:$0xf] (!%p463_p2) }
   0x7   : > { %466 = sbr.rel (%p463_p2) target bundleno = 3566 (0xdee), region = 84  ;;  %vm798_vm2 = vcmask (!%p463_p2), 1043456   ;;  %vm2916_vm3 = vmmov (!%p463_p2), 0   ;;  %vm907_vm4 = vcmask (!%p463_p2), 64512   ;;  %vm1006_vm6 = vcmask (!%p463_p2), 523264   ;;  %s2919_s24 = smov (!%p463_p2), 120  }
   0x8   : > { %2330 = vmatprep.subr.msk.mxu1 (!%p463_p2), %vm798_vm2, %v773_v63  ;;  %vm3141_vm5 = vmpackc.low (!%p463_p2), %vm907_vm4, %vm907_vm4  ;;  %s2920_s25 = smov (!%p463_p2), 112   ;;  %s2922_s27 = smov (!%p463_p2), 80   ;;  %vm1773_vm7 = vcmask (!%p463_p2), 130048   ;;  %vm1775_vm8 = vcmask (!%p463_p2), 195584  }
   0x9   : > { %2331 = vmatpush3.msk.msra.mxu1 (!%p463_p2), %vm798_vm2, %v773_v63  ;;  %s2923_s28 = smov (!%p463_p2), 104   ;;  %s2924_s30 = smov (!%p463_p2), 72  }
   0xa   : > { %s2925_s0 = smov (!%p463_p2), 16   ;;  %s2926_s17 = smov (!%p463_p2), 8  }
   0xc   : > { %v520_v16 = vld [vmem:[%s3439_s29] sm:$0xff] (!%p463_p2) }
   0xd   : > { %v532_v17 = vsel (!%p463_p2), %vm531_vm1, %v520_v16, 0.0 }
   0xe   : > { %s3443_s22 = smov (!%p511_p3, %s2134_s22), 1 }
   0xf   : > { %s2205_s23 = sshll.u32 %s3443_s22, 6 }
  0x10   : > { %s515_s26 = scalar_lea.vmem %s3421_s1, %s2205_s23  ;;  %s2918_s23 = smov 96  }
  0x11   : > { %v521_v0 = vld [vmem:[%s515_s26] sm:$0xff]  ;;  %v523_v1 = vld [vmem:[%s515_s26 + $0x10] sm:$0xff]  ;;  %v522_v2 = vld [vmem:[%s515_s26 + $0x8] sm:$0xff] }
  0x12   : > { %v563_v3 = vsel %vm562_vm0, %v521_v0, 0.0  ;;  %v569_v4 = vsel %vm562_vm0, %v523_v1, 0.0  ;;  %v524_v5 = vld [vmem:[%s515_s26 + $0x18] sm:$0xff]  ;;  %v566_v6 = vsel %vm562_vm0, %v522_v2, 0.0  ;;  %v525_v8 = vld [vmem:[%s515_s26 + $0x20] sm:$0xff]  ;;  %v526_v9 = vld [vmem:[%s515_s26 + $0x28] sm:$0xff] }
  0x13   : > { %564 = vadd.xlane.f32.xlu0 %v563_v3  ;;  %570 = vadd.xlane.f32.xlu1 %v569_v4  ;;  %v572_v7 = vsel %vm562_vm0, %v524_v5, 0.0  ;;  %v575_v10 = vsel %vm562_vm0, %v525_v8, 0.0  ;;  %v578_v11 = vsel %vm562_vm0, %v526_v9, 0.0  ;;  %v527_v12 = vld [vmem:[%s515_s26 + $0x30] sm:$0xff]  ;;  %v528_v13 = vld [vmem:[%s515_s26 + $0x38] sm:$0xff]  ;;  %s2921_s26 = smov 88  }
  0x14   : > { %v581_v14 = vsel %vm562_vm0, %v527_v12, 0.0  ;;  %v584_v15 = vsel %vm562_vm0, %v528_v13, 0.0  ;;  %v698_v4 = vld [vmem:[%s3426_s6 + $0x10] sm:$0xff] }
  0x17   : > { %567 = vadd.xlane.f32.xlu0 %v566_v6  ;;  %573 = vadd.xlane.f32.xlu1 %v572_v7  ;;  %v2917_v7 = vmov 0.0  }
  0x18   : > { %2327 = vmatprep.mubr.msk.f32.mxu0 %vm2916_vm3, %v2917_v7 }
  0x1b   : > { %576 = vadd.xlane.f32.xlu0 %v575_v10  ;;  %579 = vadd.xlane.f32.xlu1 %v578_v11 }
  0x1f   : > { %582 = vadd.xlane.f32.xlu0 %v581_v14  ;;  %585 = vadd.xlane.f32.xlu1 %v584_v15 }
  0x23   : > { %533 = vadd.xlane.f32.xlu0 %v532_v17 }
  0xa0   : > { %v565_v18 = vpop.xlane.xlu0 %564  ;;  %v571_v19 = vpop.xlane.xlu1 %570 }
  0xa1   : > { %v588_v20 = vmul.f32 0.25, %v565_v18  ;;  %v590_v21 = vmul.f32 0.25, %v571_v19 }
  0xa3   : > { %v3039_v22 = vsub.f32 %v521_v0, %v588_v20  ;;  %v3041_v23 = vsub.f32 %v523_v1, %v590_v21  ;;  %v2915_v0 = vmov 0.0|0.0   ;;  %v696_v1 = vld [vmem:[%s3426_s6] sm:$0xff] }
  0xa4   : > { %v568_v24 = vpop.xlane.xlu0 %567  ;;  %v574_v25 = vpop.xlane.xlu1 %573  ;;  %2553 = vmatprep.subr.bf16.mxu0 %v2915_v0  ;;  %2559 = vmatprep.subr.bf16.mxu1 %v2915_v0 }
  0xa5   : > { %v589_v26 = vmul.f32 0.25, %v568_v24  ;;  %v591_v27 = vmul.f32 0.25, %v574_v25  ;;  %v604_v28 = vmul.f32 %v3039_v22, %v3039_v22  ;;  %v606_v29 = vmul.f32 %v3041_v23, %v3041_v23 }
  0xa7   : > { %v3047_v30 = vsub.f32 %v522_v2, %v589_v26  ;;  %v3049_v31 = vsub.f32 %v524_v5, %v591_v27  ;;  %v612_v32 = vsel %vm562_vm0, %v604_v28, 0.0  ;;  %v618_v35 = vsel %vm562_vm0, %v606_v29, 0.0  ;;  %v697_v2 = vld [vmem:[%s3426_s6 + $0x8] sm:$0xff]  ;;  %v699_v5 = vld [vmem:[%s3426_s6 + $0x18] sm:$0xff] }
  0xa8   : > { %613 = vadd.xlane.f32.xlu1 %v612_v32  ;;  %v577_v33 = vpop.xlane.xlu0 %576  ;;  %v580_v34 = vpop.xlane.xlu1 %579  ;;  %v2554_v3 = vpack.c.bf16 %v697_v2, %v696_v1  ;;  %v2557_v6 = vpack.c.bf16 %v699_v5, %v698_v4 }
  0xa9   : > { %v592_v36 = vmul.f32 0.25, %v577_v33  ;;  %v593_v37 = vmul.f32 0.25, %v580_v34  ;;  %v605_v38 = vmul.f32 %v3047_v30, %v3047_v30  ;;  %v607_v39 = vmul.f32 %v3049_v31, %v3049_v31  ;;  %v2144_v34 = vld [vmem:[%s3424_s4] ss:$0 sm:$0xff] }
  0xaa   : > { %2555 = vmatpush3.bf16.msra.mxu0 %v2554_v3 }
  0xab   : > { %v3057_v40 = vsub.f32 %v525_v8, %v592_v36  ;;  %v3059_v41 = vsub.f32 %v526_v9, %v593_v37  ;;  %v615_v42 = vsel %vm562_vm0, %v605_v38, 0.0  ;;  %v621_v45 = vsel %vm562_vm0, %v607_v39, 0.0  ;;  %2556 = vmatprep.subr.bf16.mxu0 %v2915_v0 }
  0xac   : > { %619 = vadd.xlane.f32.xlu1 %v618_v35  ;;  %616 = vadd.xlane.f32.xlu0 %v615_v42  ;;  %v583_v43 = vpop.xlane.xlu0 %582  ;;  %v586_v44 = vpop.xlane.xlu1 %585  ;;  %v2145_v42 = vld [vmem:[%s3425_s5] ss:$0 sm:$0xff] }
  0xad   : > { %v594_v46 = vmul.f32 0.25, %v583_v43  ;;  %v595_v47 = vmul.f32 0.25, %v586_v44  ;;  %v608_v48 = vmul.f32 %v3057_v40, %v3057_v40  ;;  %v609_v49 = vmul.f32 %v3059_v41, %v3059_v41 }
  0xae   : > { %2558 = vmatpush3.bf16.msra.mxu0 %v2557_v6 }
  0xaf   : > { %v3067_v50 = vsub.f32 %v527_v12, %v594_v46  ;;  %v3069_v51 = vsub.f32 %v528_v13, %v595_v47  ;;  %v624_v52 = vsel %vm562_vm0, %v608_v48, 0.0  ;;  %v627_v55 = vsel %vm562_vm0, %v609_v49, 0.0  ;;  %2575 = vmatprep.subr.bf16.mxu0 %v2915_v0 }
  0xb0   : > { %622 = vadd.xlane.f32.xlu0 %v621_v45  ;;  %625 = vadd.xlane.f32.xlu1 %v624_v52  ;;  %v534_v53 = vpop.xlane.xlu0 %533 }
  0xb1   : > { %v536_v54 = vmul.f32 0.03125, %v534_v53  ;;  %v610_v56 = vmul.f32 %v3067_v50, %v3067_v50  ;;  %v611_v57 = vmul.f32 %v3069_v51, %v3069_v51 }
  0xb3   : > { %v3077_v58 = vsub.f32 %v520_v16, %v536_v54  ;;  %v630_v59 = vsel %vm562_vm0, %v610_v56, 0.0  ;;  %v633_v60 = vsel %vm562_vm0, %v611_v57, 0.0 }
  0xb4   : > { %628 = vadd.xlane.f32.xlu0 %v627_v55  ;;  %631 = vadd.xlane.f32.xlu1 %v630_v59 }
  0xb5   : > { %v538_v61 = vmul.f32 %v3077_v58, %v3077_v58 }
  0xb7   : > { %v539_v62 = vsel %vm531_vm1, %v538_v61, 0.0 }
  0xb8   : > { %634 = vadd.xlane.f32.xlu0 %v633_v60  ;;  %540 = vadd.xlane.f32.xlu1 %v539_v62 }
 0x135   : > { %v614_v8 = vpop.xlane.xlu1 %613 }
 0x136   : > { %v636_v9 = vmul.f32 0.25, %v614_v8 }
 0x138   : > { %v644_v10 = vadd.f32 1e-05, %v636_v9 }
 0x139   : > { %v620_v11 = vpop.xlane.xlu1 %619  ;;  %v617_v12 = vpop.xlane.xlu0 %616 }
 0x13a   : > { %2868 = vrsqrt.f32 %v644_v10  ;;  %v638_v13 = vmul.f32 0.25, %v620_v11  ;;  %v637_v14 = vmul.f32 0.25, %v617_v12 }
 0x13c   : > { %v646_v15 = vadd.f32 1e-05, %v638_v13  ;;  %v645_v16 = vadd.f32 1e-05, %v637_v14 }
 0x13d   : > { %v626_v17 = vpop.xlane.xlu1 %625  ;;  %v623_v18 = vpop.xlane.xlu0 %622 }
 0x13e   : > { %2870 = vrsqrt.f32 %v646_v15  ;;  %v640_v19 = vmul.f32 0.25, %v626_v17  ;;  %v639_v20 = vmul.f32 0.25, %v623_v18 }
 0x13f   : > { %2872 = vrsqrt.f32 %v645_v16 }
 0x140   : > { %v648_v21 = vadd.f32 1e-05, %v640_v19  ;;  %v647_v24 = vadd.f32 1e-05, %v639_v20 }
 0x141   : > { %v632_v25 = vpop.xlane.xlu1 %631  ;;  %v629_v26 = vpop.xlane.xlu0 %628 }
 0x142   : > { %2874 = vrsqrt.f32 %v648_v21  ;;  %v642_v27 = vmul.f32 0.25, %v632_v25  ;;  %v641_v28 = vmul.f32 0.25, %v629_v26 }
 0x143   : > { %2876 = vrsqrt.f32 %v647_v24 }
 0x144   : > { %v2869_v29 = vpop.eup %2868  ;;  %v650_v32 = vadd.f32 1e-05, %v642_v27  ;;  %v649_v33 = vadd.f32 1e-05, %v641_v28 }
 0x145   : > { %v541_v35 = vpop.xlane.xlu1 %540  ;;  %v635_v36 = vpop.xlane.xlu0 %634  ;;  %v660_v37 = vmul.f32 %v2869_v29, %v3039_v22 }
 0x146   : > { %2878 = vrsqrt.f32 %v650_v32  ;;  %v542_v38 = vmul.f32 0.03125, %v541_v35  ;;  %v643_v39 = vmul.f32 0.25, %v635_v36 }
 0x147   : > { %2880 = vrsqrt.f32 %v649_v33  ;;  %v674_v43 = vmul.f32 %v2144_v34, %v660_v37 }
 0x148   : > { %v2871_v44 = vpop.eup %2870  ;;  %v543_v45 = vadd.f32 1e-05, %v542_v38  ;;  %v651_v46 = vadd.f32 1e-05, %v643_v39 }
 0x149   : > { %v2873_v47 = vpop.eup %2872  ;;  %v688_v48 = vadd.f32 %v2145_v42, %v674_v43  ;;  %v662_v49 = vmul.f32 %v2871_v44, %v3041_v23 }
 0x14a   : > { %2882 = vrsqrt.f32 %v543_v45  ;;  %v661_v52 = vmul.f32 %v2873_v47, %v3047_v30 }
 0x14b   : > { %2884 = vrsqrt.f32 %v651_v46  ;;  %2332 = vmatprep.mubr.msk.f32.mxu1 %vm562_vm0, %v688_v48  ;;  %v676_v22 = vmul.f32 %v2144_v34, %v662_v49 }
 0x14c   : > { %v2875_v53 = vpop.eup %2874  ;;  %v675_v54 = vmul.f32 %v2144_v34, %v661_v52 }
 0x14d   : > { %v2877_v55 = vpop.eup %2876  ;;  %v690_v56 = vadd.f32 %v2145_v42, %v676_v22  ;;  %v664_v57 = vmul.f32 %v2875_v53, %v3057_v40 }
 0x14e   : > { %v689_v59 = vadd.f32 %v2145_v42, %v675_v54  ;;  %v663_v60 = vmul.f32 %v2877_v55, %v3049_v31  ;;  %v2142_v31 = vld [vmem:[%s3422_s2] ss:$0 sm:$0xff] }
 0x14f   : > { %v678_v61 = vmul.f32 %v2144_v34, %v664_v57 }
 0x150   : > { %v2879_v62 = vpop.eup %2878  ;;  %2333 = vmatmul.mubr.msk.f32.vlgmr.msra.gmra.mrb[0].mxu1 %vm562_vm0, %v689_v59  ;;  %v677_v23 = vmul.f32 %v2144_v34, %v663_v60 }
 0x151   : > { %v2881_v63 = vpop.eup %2880  ;;  %2335 = vmatprep.mubr.msk.f32.mxu1 %vm562_vm0, %v690_v56  ;;  %v692_v30 = vadd.f32 %v2145_v42, %v678_v61  ;;  %v666_v1 = vmul.f32 %v2879_v62, %v3067_v50 }
 0x152   : > { %v691_v2 = vadd.f32 %v2145_v42, %v677_v23  ;;  %v665_v3 = vmul.f32 %v2881_v63, %v3059_v41  ;;  %v2143_v41 = vld [vmem:[%s3423_s3] ss:$0 sm:$0xff] }
 0x153   : > { %v680_v4 = vmul.f32 %v2144_v34, %v666_v1 }
 0x154   : > { %v2883_v5 = vpop.eup %2882  ;;  %2336 = vmatmul.mubr.msk.f32.gmra.mrb[2].mxu1 %vm562_vm0, %v691_v2  ;;  %v679_v40 = vmul.f32 %v2144_v34, %v665_v3 }
 0x155   : > { %v2885_v6 = vpop.eup %2884  ;;  %2338 = vmatprep.mubr.msk.f32.mxu1 %vm562_vm0, %v692_v30  ;;  %v694_v8 = vadd.f32 %v2145_v42, %v680_v4  ;;  %v545_v9 = vmul.f32 %v2883_v5, %v3077_v58 }
 0x156   : > { %v693_v10 = vadd.f32 %v2145_v42, %v679_v40  ;;  %v667_v50 = vmul.f32 %v2885_v6, %v3069_v51 }
 0x157   : > { %v552_v11 = vmul.f32 %v2142_v31, %v545_v9 }
 0x158   : > { %2339 = vmatmul.mubr.msk.f32.gmra.mrb[4].mxu1 %vm562_vm0, %v693_v10  ;;  %v681_v12 = vmul.f32 %v2144_v34, %v667_v50 }
 0x159   : > { %2341 = vmatprep.mubr.msk.f32.mxu1 %vm562_vm0, %v694_v8  ;;  %v559_v13 = vadd.f32 %v2143_v41, %v552_v11 }
 0x15a   : > { %v695_v14 = vadd.f32 %v2145_v42, %v681_v12 }
 0x15b   : > { %2328 = vmatmul.mubr.msk.f32.vlgmr.msra.gmra.mrb[0].mxu0 %vm531_vm1, %v559_v13 }
 0x15c   : > { %2342 = vmatmul.mubr.msk.f32.gmra.mrb[6].mxu1 %vm562_vm0, %v695_v14  ;;  %2379 = vmatprep.mubr.msk.f32.mxu0 %vm2916_vm3, %v2917_v7 }
 0x15d   : > { %2360 = vmatprep.mubr.msk.f32.mxu1 %vm2916_vm3, %v2917_v7 }
 0x223   : > { %v2334_v51 = vpop.f32.mrb[0].mxu1 }
 0x224   : > { %v868_v58 = vpop.f32.mrb[1].mxu1 }
 0x225   : > { %v2560_v16 = vpack.c.bf16 %v2334_v51, %v868_v58  ;;  %v3145_v17 = vpack.i.bf16 %v2334_v51, %v868_v58 }
 0x227   : > { %v2337_v18 = vpop.f32.mrb[2].mxu1  ;;  %2562 = vmatpush3.bf16.xpose.msk.msra.mxu1 %vm3141_vm5, %v2560_v16 }
 0x228   : > { %v878_v19 = vpop.f32.mrb[3].mxu1  ;;  %2563 = vmatprep.subr.bf16.mxu1 %v2915_v0 }
 0x229   : > { %v3150_v20 = vpack.i.bf16 %v2337_v18, %v878_v19  ;;  %v2564_v21 = vpack.c.bf16 %v2337_v18, %v878_v19 }
 0x22b   : > { %2734 = vrot.lane.b32.xlu1 %v3150_v20, %s2918_s23  ;;  %v2340_v24 = vpop.f32.mrb[4].mxu1 }
 0x22c   : > { %v888_v25 = vpop.f32.mrb[5].mxu1 }
 0x22d   : > { %v3153_v26 = vpack.i.bf16 %v2340_v24, %v888_v25  ;;  %v2568_v27 = vpack.c.bf16 %v2340_v24, %v888_v25 }
 0x22e   : > { %v3155_v28 = vpop.f32.mrb[0].mxu0 }
 0x22f   : > { %2566 = vmatpush3.bf16.xpose.msk.msra.mxu1 %vm3141_vm5, %v2564_v21  ;;  %2739 = vrot.lane.b32.xlu1 %v3153_v26, %s2918_s23  ;;  %v2343_v29 = vpop.f32.mrb[6].mxu1  ;;  %v2329_v32 = vpop.f32.mrb[1].mxu0 }
 0x230   : > { %v898_v33 = vpop.f32.mrb[7].mxu1  ;;  %2567 = vmatprep.subr.bf16.mxu1 %v2915_v0 }
 0x231   : > { %v3161_v34 = vpack.i.bf16 %v2343_v29, %v898_v33  ;;  %v2572_v35 = vpack.c.bf16 %v2343_v29, %v898_v33 }
 0x233   : > { %2744 = vrot.lane.b32.xlu1 %v3161_v34, %s2918_s23 }
 0x237   : > { %2570 = vmatpush3.bf16.xpose.msk.msra.mxu1 %vm3141_vm5, %v2568_v27 }
 0x238   : > { %2571 = vmatprep.subr.bf16.mxu1 %v2915_v0 }
 0x23f   : > { %2574 = vmatpush3.bf16.xpose.msk.msra.mxu1 %vm3141_vm5, %v2572_v35 }
 0x240   : > { %2615 = vmatprep.subr.bf16.mxu1 %v2915_v0 }
 0x246   : > { %2361 = vmatmul.mubr.msk.f32.vlgmr.msra.gmra.mrb[8].mxu1 %vm907_vm4, %v3155_v28 }
 0x247   : > { %2436 = vmatprep.mubr.msk.f32.mxu1 %vm2916_vm3, %v2917_v7 }
 0x29d   : > { %v2735_v42 = vpop.permute.xlu1 %2734 }
 0x29e   : > { %v2737_v52 = vunpack.i.h.bf16 %v2735_v42  ;;  %v2736_v22 = vunpack.i.l.bf16 %v2735_v42 }
 0x2a0   : > { %v2579_v54 = vpack.c.bf16 %v2737_v52, %v2736_v22 }
 0x2a1   : > { %v2740_v49 = vpop.permute.xlu1 %2739 }
 0x2a2   : > { %v2742_v55 = vunpack.i.h.bf16 %v2740_v49  ;;  %v2741_v56 = vunpack.i.l.bf16 %v2740_v49 }
 0x2a4   : > { %v2582_v60 = vpack.c.bf16 %v2742_v55, %v2741_v56 }
 0x2a5   : > { %v2745_v57 = vpop.permute.xlu1 %2744 }
 0x2a6   : > { %v2747_v61 = vunpack.i.h.bf16 %v2745_v57  ;;  %v2746_v62 = vunpack.i.l.bf16 %v2745_v57 }
 0x2a8   : > { %v2585_v63 = vpack.c.bf16 %v2747_v61, %v2746_v62 }
 0x319   : > { %v1001_v36 = vpop.f32.mrb[8].mxu1 }
 0x31a   : > { %v1005_v37 = vmul.f32 0.35355338, %v1001_v36  ;;  %v2362_v38 = vpop.f32.mrb[9].mxu1 }
 0x31c   : > { %v1007_v39 = vsel %vm1006_vm6, %v1005_v37, -inf }
 0x31d   : > { %1008 = vmax.xlane.f32.xlu0 %v1007_v39 }
 0x333   : > { %2729 = vrot.lane.b32.xlu0 %v3145_v17, %s2918_s23 }
 0x337   : > { %2749 = vrot.lane.b32.xlu0 %v3145_v17, %s2919_s24 }
 0x33b   : > { %2759 = vrot.lane.b32.xlu0 %v3153_v26, %s2919_s24 }
 0x33f   : > { %2769 = vrot.lane.b32.xlu0 %v3161_v34, %s2919_s24 }
 0x343   : > { %1115 = vrot.lane.b32.xlu0 %v3155_v28, %s2919_s24 }
 0x347   : > { %2784 = vrot.lane.b32.xlu0 %v3161_v34, %s2920_s25 }
 0x3aa   : > { %v1009_v43 = vpop.xlane.xlu0 %1008 }
 0x3ab   : > { %v1010_v44 = vsub.f32 %v1005_v37, %v1009_v43 }
 0x3ad   : > { %v1011_v45 = vmul.f32 1.442695, %v1010_v44 }
 0x3ae   : > { %v2730_v46 = vpop.permute.xlu0 %2729 }
 0x3af   : > { %2886 = vpow2.f32 %v1011_v45  ;;  %v2732_v47 = vunpack.i.h.bf16 %v2730_v46  ;;  %v2731_v48 = vunpack.i.l.bf16 %v2730_v46 }
 0x3b1   : > { %v2576_v53 = vpack.c.bf16 %v2732_v47, %v2731_v48 }
 0x3b2   : > { %v2750_v1 = vpop.permute.xlu0 %2749 }
 0x3b3   : > { %2577 = vmatpush3.bf16.msra.mxu0 %v2576_v53  ;;  %v2752_v4 = vunpack.i.h.bf16 %v2750_v1  ;;  %v2751_v5 = vunpack.i.l.bf16 %v2750_v1 }
 0x3b4   : > { %2578 = vmatprep.subr.bf16.mxu0 %v2915_v0 }
 0x3b5   : > { %v2588_v50 = vpack.c.bf16 %v2752_v4, %v2751_v5 }
 0x3b6   : > { %v2760_v6 = vpop.permute.xlu0 %2759 }
 0x3b7   : > { %2580 = vmatpush3.bf16.msra.mxu0 %v2579_v54  ;;  %v2762_v25 = vunpack.i.h.bf16 %v2760_v6  ;;  %v2761_v27 = vunpack.i.l.bf16 %v2760_v6 }
 0x3b8   : > { %2581 = vmatprep.subr.bf16.mxu0 %v2915_v0 }
 0x3b9   : > { %v2887_v59 = vpop.eup %2886  ;;  %v2596_v33 = vpack.c.bf16 %v2762_v25, %v2761_v27 }
 0x3ba   : > { %v1013_v23 = vsel %vm1006_vm6, %v2887_v59, 0.0  ;;  %v2770_v13 = vpop.permute.xlu0 %2769 }
 0x3bb   : > { %1014 = vadd.xlane.f32.xlu1 %v1013_v23  ;;  %2583 = vmatpush3.bf16.msra.mxu0 %v2582_v60  ;;  %v2772_v37 = vunpack.i.h.bf16 %v2770_v13  ;;  %v2771_v38 = vunpack.i.l.bf16 %v2770_v13 }
 0x3bc   : > { %2584 = vmatprep.subr.bf16.mxu0 %v2915_v0 }
 0x3bd   : > { %v2600_v42 = vpack.c.bf16 %v2772_v37, %v2771_v38 }
 0x3be   : > { %v1116_v19 = vpop.permute.xlu0 %1115 }
 0x3bf   : > { %2586 = vmatpush3.bf16.msra.mxu0 %v2585_v63 }
 0x3c0   : > { %2587 = vmatprep.subr.bf16.mxu0 %v2915_v0 }
 0x3c2   : > { %v2785_v32 = vpop.permute.xlu0 %2784 }
 0x3c3   : > { %v2787_v35 = vunpack.i.h.bf16 %v2785_v32  ;;  %v2786_v36 = vunpack.i.l.bf16 %v2785_v32 }
 0x3c5   : > { %v2628_v39 = vpack.c.bf16 %v2787_v35, %v2786_v36 }
 0x3cc   : > { %2754 = vrot.lane.b32.xlu1 %v3150_v20, %s2919_s24 }
 0x3d0   : > { %2764 = vrot.lane.b32.xlu1 %v3145_v17, %s2920_s25 }
 0x3d4   : > { %2774 = vrot.lane.b32.xlu1 %v3150_v20, %s2920_s25 }
 0x3d8   : > { %2779 = vrot.lane.b32.xlu1 %v3153_v26, %s2920_s25 }
 0x3dc   : > { %1330 = vrot.lane.b32.xlu1 %v3155_v28, %s2920_s25 }
 0x448   : > { %v1015_v30 = vpop.xlane.xlu1 %1014 }
 0x449   : > { %2888 = vrcp.f32 %v1015_v30 }
 0x44c   : > { %v2755_v2 = vpop.permute.xlu1 %2754 }
 0x44d   : > { %v2757_v14 = vunpack.i.h.bf16 %v2755_v2  ;;  %v2756_v51 = vunpack.i.l.bf16 %v2755_v2 }
 0x44f   : > { %v2592_v18 = vpack.c.bf16 %v2757_v14, %v2756_v51 }
 0x450   : > { %v2765_v3 = vpop.permute.xlu1 %2764 }
 0x451   : > { %v2767_v40 = vunpack.i.h.bf16 %v2765_v3  ;;  %v2766_v31 = vunpack.i.l.bf16 %v2765_v3 }
 0x453   : > { %v2889_v8 = vpop.eup %2888  ;;  %v2616_v9 = vpack.c.bf16 %v2767_v40, %v2766_v31 }
 0x454   : > { %v1017_v10 = vmul.f32 %v2889_v8, %v2887_v59  ;;  %v2775_v41 = vpop.permute.xlu1 %2774 }
 0x455   : > { %2618 = vmatpush3.bf16.xpose.msk.msra.mxu1 %vm3141_vm5, %v2616_v9  ;;  %v2777_v11 = vunpack.i.h.bf16 %v2775_v41  ;;  %v2776_v12 = vunpack.i.l.bf16 %v2775_v41 }
 0x456   : > { %2380 = vmatmul.mubr.msk.f32.vlgmr.msra.gmra.mrb[2].mxu0 %vm1006_vm6, %v1017_v10  ;;  %2619 = vmatprep.subr.bf16.mxu1 %v2915_v0 }
 0x457   : > { %2590 = vmatpush3.bf16.xpose.msk.msra.mxu0 %vm3141_vm5, %v2588_v50  ;;  %2398 = vmatprep.mubr.msk.f32.mxu0 %vm2916_vm3, %v2917_v7  ;;  %v2620_v58 = vpack.c.bf16 %v2777_v11, %v2776_v12 }
 0x458   : > { %2591 = vmatprep.subr.bf16.mxu0 %v2915_v0  ;;  %v2780_v16 = vpop.permute.xlu1 %2779 }
 0x459   : > { %v2782_v21 = vunpack.i.h.bf16 %v2780_v16  ;;  %v2781_v24 = vunpack.i.l.bf16 %v2780_v16 }
 0x45b   : > { %v2624_v29 = vpack.c.bf16 %v2782_v21, %v2781_v24 }
 0x45c   : > { %v1331_v43 = vpop.permute.xlu1 %1330 }
 0x45d   : > { %2622 = vmatpush3.bf16.xpose.msk.msra.mxu1 %vm3141_vm5, %v2620_v58 }
 0x45e   : > { %2623 = vmatprep.subr.bf16.mxu1 %v2915_v0 }
 0x45f   : > { %2594 = vmatpush3.bf16.xpose.msk.msra.mxu0 %vm3141_vm5, %v2592_v18 }
 0x460   : > { %2595 = vmatprep.subr.bf16.mxu0 %v2915_v0 }
 0x465   : > { %2626 = vmatpush3.bf16.xpose.msk.msra.mxu1 %vm3141_vm5, %v2624_v29 }
 0x466   : > { %2627 = vmatprep.subr.bf16.mxu1 %v2915_v0 }
 0x467   : > { %2598 = vmatpush3.bf16.xpose.msk.msra.mxu0 %vm3141_vm5, %v2596_v33 }
 0x468   : > { %2599 = vmatprep.subr.bf16.mxu0 %v2915_v0 }
 0x46d   : > { %2630 = vmatpush3.bf16.xpose.msk.msra.mxu1 %vm3141_vm5, %v2628_v39 }
 0x46e   : > { %2659 = vmatprep.subr.bf16.mxu1 %v2915_v0 }
 0x46f   : > { %2602 = vmatpush3.bf16.xpose.msk.msra.mxu0 %vm3141_vm5, %v2600_v42 }
 0x470   : > { %2603 = vmatprep.subr.bf16.mxu0 %v2915_v0 }
 0x474   : > { %2437 = vmatmul.mubr.msk.f32.vlgmr.msra.gmra.mrb[10].mxu1 %vm907_vm4, %v1331_v43 }
 0x475   : > { %2493 = vmatprep.mubr.msk.f32.mxu1 %vm2916_vm3, %v2917_v7 }
 0x476   : > { %2399 = vmatmul.mubr.msk.f32.vlgmr.msra.gmra.mrb[4].mxu0 %vm907_vm4, %v1116_v19 }
 0x477   : > { %2417 = vmatprep.mubr.msk.f32.mxu0 %vm2916_vm3, %v2917_v7 }
 0x529   : > { %v3234_v44 = vpop.f32.mrb[2].mxu0 }
 0x52a   : > { %v2381_v45 = vpop.f32.mrb[3].mxu0 }
 0x547   : > { %v1432_v46 = vpop.f32.mrb[10].mxu1 }
 0x548   : > { %v1436_v47 = vmul.f32 0.35355338, %v1432_v46  ;;  %v2438_v48 = vpop.f32.mrb[11].mxu1 }
 0x549   : > { %v1217_v49 = vpop.f32.mrb[4].mxu0 }
 0x54a   : > { %v1221_v52 = vmul.f32 0.35355338, %v1217_v49  ;;  %v2400_v22 = vpop.f32.mrb[5].mxu0  ;;  %v1437_v53 = vsel %vm1006_vm6, %v1436_v47, -inf }
 0x54b   : > { %1438 = vmax.xlane.f32.xlu1 %v1437_v53 }
 0x54c   : > { %v1222_v54 = vsel %vm1006_vm6, %v1221_v52, -inf }
 0x54d   : > { %1223 = vmax.xlane.f32.xlu0 %v1222_v54 }
 0x55c   : > { %2794 = vrot.lane.b32.xlu1 %v3150_v20, %s2921_s26 }
 0x560   : > { %2799 = vrot.lane.b32.xlu1 %v3153_v26, %s2921_s26 }
 0x563   : > { %2789 = vrot.lane.b32.xlu0 %v3145_v17, %s2921_s26 }
 0x567   : > { %2804 = vrot.lane.b32.xlu0 %v3161_v34, %s2921_s26 }
 0x56b   : > { %2809 = vrot.lane.b32.xlu0 %v3145_v17, %s2922_s27 }
 0x5d8   : > { %v1439_v55 = vpop.xlane.xlu1 %1438 }
 0x5d9   : > { %v1440_v56 = vsub.f32 %v1436_v47, %v1439_v55 }
 0x5da   : > { %v1224_v57 = vpop.xlane.xlu0 %1223 }
 0x5db   : > { %v1441_v59 = vmul.f32 1.442695, %v1440_v56  ;;  %v1225_v60 = vsub.f32 %v1221_v52, %v1224_v57 }
 0x5dc   : > { %v2795_v61 = vpop.permute.xlu1 %2794 }
 0x5dd   : > { %2890 = vpow2.f32 %v1441_v59  ;;  %v1226_v62 = vmul.f32 1.442695, %v1225_v60  ;;  %v2797_v1 = vunpack.i.h.bf16 %v2795_v61  ;;  %v2796_v2 = vunpack.i.l.bf16 %v2795_v61 }
 0x5de   : > { %v2790_v23 = vpop.permute.xlu0 %2789 }
 0x5df   : > { %2892 = vpow2.f32 %v1226_v62  ;;  %v2792_v63 = vunpack.i.h.bf16 %v2790_v23  ;;  %v2791_v30 = vunpack.i.l.bf16 %v2790_v23  ;;  %v2607_v5 = vpack.c.bf16 %v2797_v1, %v2796_v2 }
 0x5e0   : > { %v2800_v4 = vpop.permute.xlu1 %2799 }
 0x5e1   : > { %v2604_v3 = vpack.c.bf16 %v2792_v63, %v2791_v30  ;;  %v2802_v40 = vunpack.i.h.bf16 %v2800_v4  ;;  %v2801_v31 = vunpack.i.l.bf16 %v2800_v4 }
 0x5e2   : > { %v2805_v6 = vpop.permute.xlu0 %2804 }
 0x5e3   : > { %2605 = vmatpush3.bf16.msra.mxu0 %v2604_v3  ;;  %v2610_v41 = vpack.c.bf16 %v2802_v40, %v2801_v31  ;;  %v2807_v50 = vunpack.i.h.bf16 %v2805_v6  ;;  %v2806_v11 = vunpack.i.l.bf16 %v2805_v6 }
 0x5e4   : > { %2606 = vmatprep.subr.bf16.mxu0 %v2915_v0 }
 0x5e5   : > { %v2613_v13 = vpack.c.bf16 %v2807_v50, %v2806_v11 }
 0x5e6   : > { %v2810_v14 = vpop.permute.xlu0 %2809 }
 0x5e7   : > { %v2891_v8 = vpop.eup %2890  ;;  %2608 = vmatpush3.bf16.msra.mxu0 %v2607_v5  ;;  %v2812_v16 = vunpack.i.h.bf16 %v2810_v14  ;;  %v2811_v18 = vunpack.i.l.bf16 %v2810_v14 }
 0x5e8   : > { %v1443_v9 = vsel %vm1006_vm6, %v2891_v8, 0.0  ;;  %2609 = vmatprep.subr.bf16.mxu0 %v2915_v0 }
 0x5e9   : > { %v2893_v10 = vpop.eup %2892  ;;  %1444 = vadd.xlane.f32.xlu1 %v1443_v9  ;;  %v2632_v27 = vpack.c.bf16 %v2812_v16, %v2811_v18 }
 0x5ea   : > { %v1228_v12 = vsel %vm1006_vm6, %v2893_v10, 0.0 }
 0x5eb   : > { %1229 = vadd.xlane.f32.xlu0 %v1228_v12  ;;  %2611 = vmatpush3.bf16.msra.mxu0 %v2610_v41 }
 0x5ec   : > { %2612 = vmatprep.subr.bf16.mxu0 %v2915_v0 }
 0x5ef   : > { %2614 = vmatpush3.bf16.msra.mxu0 %v2613_v13 }
 0x5f0   : > { %2631 = vmatprep.subr.bf16.mxu0 %v2915_v0 }
 0x601   : > { %2814 = vrot.lane.b32.xlu0 %v3150_v20, %s2922_s27 }
 0x605   : > { %2819 = vrot.lane.b32.xlu0 %v3153_v26, %s2922_s27 }
 0x609   : > { %2824 = vrot.lane.b32.xlu0 %v3161_v34, %s2922_s27 }
 0x60d   : > { %2829 = vrot.lane.b32.xlu0 %v3145_v17, %s2923_s28 }
 0x611   : > { %2834 = vrot.lane.b32.xlu0 %v3150_v20, %s2923_s28 }
 0x615   : > { %2839 = vrot.lane.b32.xlu0 %v3153_v26, %s2923_s28 }
 0x619   : > { %2844 = vrot.lane.b32.xlu0 %v3161_v34, %s2923_s28 }
 0x61d   : > { %1545 = vrot.lane.b32.xlu0 %v3155_v28, %s2923_s28  ;;  %s2927_s28 = smov 24  }
 0x676   : > { %v1445_v21 = vpop.xlane.xlu1 %1444 }
 0x678   : > { %v1230_v51 = vpop.xlane.xlu0 %1229 }
 0x679   : > { %2894 = vrcp.f32 %v1230_v51 }
 0x67a   : > { %2896 = vrcp.f32 %v1445_v21 }
 0x67c   : > { %v2815_v58 = vpop.permute.xlu0 %2814 }
 0x67d   : > { %v2817_v29 = vunpack.i.h.bf16 %v2815_v58  ;;  %v2816_v32 = vunpack.i.l.bf16 %v2815_v58 }
 0x67f   : > { %v2635_v28 = vpack.c.bf16 %v2817_v29, %v2816_v32  ;;  %v1777_v29 = vld [vmem:[%s3428_s8] sm:$0xff]  ;;  %v1778_v32 = vld [vmem:[%s3428_s8 + $0x8] sm:$0xff] }
 0x680   : > { %v2820_v25 = vpop.permute.xlu0 %2819 }
 0x681   : > { %v2822_v33 = vunpack.i.h.bf16 %v2820_v25  ;;  %v2821_v35 = vunpack.i.l.bf16 %v2820_v25 }
 0x683   : > { %v2895_v19 = vpop.eup %2894  ;;  %v2638_v37 = vpack.c.bf16 %v2822_v33, %v2821_v35  ;;  %v2672_v33 = vpack.c.bf16 %v1778_v32, %v1777_v29  ;;  %v1780_v35 = vld [vmem:[%s3428_s8 + $0x18] sm:$0xff] }
 0x684   : > { %v1232_v24 = vmul.f32 %v2895_v19, %v2893_v10  ;;  %v2825_v36 = vpop.permute.xlu0 %2824  ;;  %v2897_v42 = vpop.eup %2896  ;;  %v2000_v29 = vld [vmem:[%s3434_s14 + $0x78] sm:$0xff] }
 0x685   : > { %v2827_v38 = vunpack.i.h.bf16 %v2825_v36  ;;  %v2826_v39 = vunpack.i.l.bf16 %v2825_v36  ;;  %v1447_v46 = vmul.f32 %v2897_v42, %v2891_v8 }
 0x686   : > { %2418 = vmatmul.mubr.msk.f32.vlgmr.msra.gmra.mrb[6].mxu0 %vm1006_vm6, %v1232_v24 }
 0x687   : > { %2633 = vmatpush3.bf16.msra.mxu0 %v2632_v27  ;;  %2455 = vmatprep.mubr.msk.f32.mxu0 %vm2916_vm3, %v2917_v7  ;;  %v2641_v43 = vpack.c.bf16 %v2827_v38, %v2826_v39 }
 0x688   : > { %2634 = vmatprep.subr.bf16.mxu0 %v2915_v0  ;;  %v2830_v45 = vpop.permute.xlu0 %2829 }
 0x689   : > { %v2832_v47 = vunpack.i.h.bf16 %v2830_v45  ;;  %v2831_v48 = vunpack.i.l.bf16 %v2830_v45 }
 0x68b   : > { %2636 = vmatpush3.bf16.msra.mxu0 %v2635_v28  ;;  %v2644_v49 = vpack.c.bf16 %v2832_v47, %v2831_v48  ;;  %v1779_v28 = vld [vmem:[%s3428_s8 + $0x10] sm:$0xff] }
 0x68c   : > { %2637 = vmatprep.subr.bf16.mxu0 %v2915_v0  ;;  %v2835_v52 = vpop.permute.xlu0 %2834  ;;  %v2675_v36 = vpack.c.bf16 %v1780_v35, %v1779_v28  ;;  %v2200_v28 = vld [vmem:[%s3433_s13] ss:$0 sm:$0xff] }
 0x68d   : > { %v2837_v22 = vunpack.i.h.bf16 %v2835_v52  ;;  %v2836_v53 = vunpack.i.l.bf16 %v2835_v52  ;;  %v2906_v52 = vld [vmem:[%s3439_s29] sm:$0xff] }
 0x68f   : > { %2639 = vmatpush3.bf16.msra.mxu0 %v2638_v37  ;;  %v2648_v54 = vpack.c.bf16 %v2837_v22, %v2836_v53 }
 0x690   : > { %2640 = vmatprep.subr.bf16.mxu0 %v2915_v0  ;;  %v2840_v55 = vpop.permute.xlu0 %2839 }
 0x691   : > { %v2842_v56 = vunpack.i.h.bf16 %v2840_v55  ;;  %v2841_v57 = vunpack.i.l.bf16 %v2840_v55 }
 0x693   : > { %2642 = vmatpush3.bf16.msra.mxu0 %v2641_v43  ;;  %v2652_v59 = vpack.c.bf16 %v2842_v56, %v2841_v57 }
 0x694   : > { %2643 = vmatprep.subr.bf16.mxu0 %v2915_v0  ;;  %v2845_v60 = vpop.permute.xlu0 %2844 }
 0x695   : > { %v2847_v61 = vunpack.i.h.bf16 %v2845_v60  ;;  %v2846_v62 = vunpack.i.l.bf16 %v2845_v60  ;;  %v1892_v60 = vld [vmem:[%s3432_s12] sm:$0xff] }
 0x696   : > { %2456 = vmatmul.mubr.msk.f32.vlgmr.msra.gmra.mrb[8].mxu0 %vm1006_vm6, %v1447_v46 }
 0x697   : > { %2474 = vmatprep.mubr.msk.f32.mxu0 %vm2916_vm3, %v2917_v7  ;;  %v2656_v23 = vpack.c.bf16 %v2847_v61, %v2846_v62  ;;  %v1893_v61 = vld [vmem:[%s3432_s12 + $0x8] sm:$0xff] }
 0x698   : > { %v1546_v63 = vpop.permute.xlu0 %1545  ;;  %v2678_v62 = vpack.c.bf16 %v1893_v61, %v1892_v60 }
 0x69c   : > { %2646 = vmatpush3.bf16.xpose.msk.msra.mxu0 %vm3141_vm5, %v2644_v49  ;;  %v2197_v49 = vld [vmem:[%s3429_s9] ss:$0 sm:$0xff] }
 0x69d   : > { %2647 = vmatprep.subr.bf16.mxu0 %v2915_v0 }
 0x6a4   : > { %2650 = vmatpush3.bf16.xpose.msk.msra.mxu0 %vm3141_vm5, %v2648_v54 }
 0x6a5   : > { %2651 = vmatprep.subr.bf16.mxu0 %v2915_v0 }
 0x6ac   : > { %2654 = vmatpush3.bf16.xpose.msk.msra.mxu0 %vm3141_vm5, %v2652_v59 }
 0x6ad   : > { %2655 = vmatprep.subr.bf16.mxu0 %v2915_v0 }
 0x6b4   : > { %2658 = vmatpush3.bf16.xpose.msk.msra.mxu0 %vm3141_vm5, %v2656_v23  ;;  %v1894_v23 = vld [vmem:[%s3432_s12 + $0x10] sm:$0xff] }
 0x6b5   : > { %2677 = vmatprep.subr.bf16.mxu0 %v2915_v0 }
 0x6bb   : > { %2475 = vmatmul.mubr.msk.f32.vlgmr.msra.gmra.mrb[10].mxu0 %vm907_vm4, %v1546_v63  ;;  %v1895_v63 = vld [vmem:[%s3432_s12 + $0x18] sm:$0xff] }
 0x6bc   : > { %2515 = vmatprep.mubr.msk.f32.mxu0 %vm2916_vm3, %v2917_v7  ;;  %2679 = vmatpush3.bf16.msra.mxu0 %v2678_v62 }
 0x6bd   : > { %2680 = vmatprep.subr.bf16.mxu0 %v2915_v0 }
 0x759   : > { %v1326_v30 = vpop.f32.mrb[6].mxu0 }
 0x75a   : > { %v2419_v1 = vpop.f32.mrb[7].mxu0 }
 0x75b   : > { %v1985_v1 = vld [vmem:[%s3434_s14] sm:$0xff] }
 0x769   : > { %v1541_v2 = vpop.f32.mrb[8].mxu0 }
 0x76a   : > { %v2457_v3 = vpop.f32.mrb[9].mxu0 }
 0x78e   : > { %v1647_v4 = vpop.f32.mrb[10].mxu0 }
 0x78f   : > { %v1651_v5 = vmul.f32 0.35355338, %v1647_v4  ;;  %v2476_v40 = vpop.f32.mrb[11].mxu0 }
 0x791   : > { %v1652_v31 = vsel %vm1006_vm6, %v1651_v5, -inf }
 0x792   : > { %1653 = vmax.xlane.f32.xlu1 %v1652_v31 }
 0x7a3   : > { %2849 = vrot.lane.b32.xlu1 %v3145_v17, %s2924_s30 }
 0x7a7   : > { %2854 = vrot.lane.b32.xlu1 %v3150_v20, %s2924_s30 }
 0x7ab   : > { %2859 = vrot.lane.b32.xlu1 %v3153_v26, %s2924_s30 }
 0x7af   : > { %2864 = vrot.lane.b32.xlu1 %v3161_v34, %s2924_s30 }
 0x7b3   : > { %1765 = vrot.lane.b32.xlu1 %v1541_v2, %s2925_s0  ;;  %v1986_v2 = vld [vmem:[%s3434_s14 + $0x8] sm:$0xff] }
 0x7b4   : > { %v2684_v3 = vpack.c.bf16 %v1986_v2, %v1985_v1 }
 0x81f   : > { %v1654_v15 = vpop.xlane.xlu1 %1653 }
 0x820   : > { %v1655_v6 = vsub.f32 %v1651_v5, %v1654_v15  ;;  %v2198_v15 = vld [vmem:[%s3430_s10] ss:$0 sm:$0xff] }
 0x822   : > { %v1656_v8 = vmul.f32 1.442695, %v1655_v6 }
 0x823   : > { %v2850_v9 = vpop.permute.xlu1 %2849 }
 0x824   : > { %2898 = vpow2.f32 %v1656_v8  ;;  %v2852_v10 = vunpack.i.h.bf16 %v2850_v9  ;;  %v2851_v41 = vunpack.i.l.bf16 %v2850_v9  ;;  %v2199_v8 = vld [vmem:[%s3431_s11] ss:$0 sm:$0xff] }
 0x826   : > { %v2660_v50 = vpack.c.bf16 %v2852_v10, %v2851_v41  ;;  %v1987_v41 = vld [vmem:[%s3434_s14 + $0x10] sm:$0xff] }
 0x827   : > { %v2855_v11 = vpop.permute.xlu1 %2854 }
 0x828   : > { %v2857_v12 = vunpack.i.h.bf16 %v2855_v11  ;;  %v2856_v13 = vunpack.i.l.bf16 %v2855_v11  ;;  %2661 = vmatpush3.bf16.msra.mxu1 %v2660_v50  ;;  %v1988_v50 = vld [vmem:[%s3434_s14 + $0x18] sm:$0xff] }
 0x829   : > { %2662 = vmatprep.subr.bf16.mxu1 %v2915_v0  ;;  %v2687_v11 = vpack.c.bf16 %v1988_v50, %v1987_v41 }
 0x82a   : > { %v2663_v17 = vpack.c.bf16 %v2857_v12, %v2856_v13  ;;  %v1989_v12 = vld [vmem:[%s3434_s14 + $0x20] sm:$0xff]  ;;  %v1990_v13 = vld [vmem:[%s3434_s14 + $0x28] sm:$0xff] }
 0x82b   : > { %v2860_v20 = vpop.permute.xlu1 %2859 }
 0x82c   : > { %v2862_v26 = vunpack.i.h.bf16 %v2860_v20  ;;  %v2861_v34 = vunpack.i.l.bf16 %v2860_v20  ;;  %2664 = vmatpush3.bf16.msra.mxu1 %v2663_v17  ;;  %v2690_v17 = vpack.c.bf16 %v1990_v13, %v1989_v12  ;;  %v1991_v20 = vld [vmem:[%s3434_s14 + $0x30] sm:$0xff] }
 0x82d   : > { %2665 = vmatprep.subr.bf16.mxu1 %v2915_v0 }
 0x82e   : > { %v2899_v14 = vpop.eup %2898  ;;  %v2666_v51 = vpack.c.bf16 %v2862_v26, %v2861_v34  ;;  %v1992_v26 = vld [vmem:[%s3434_s14 + $0x38] sm:$0xff] }
 0x82f   : > { %v2865_v58 = vpop.permute.xlu1 %2864  ;;  %v1658_v16 = vsel %vm1006_vm6, %v2899_v14, 0.0  ;;  %v2693_v34 = vpack.c.bf16 %v1992_v26, %v1991_v20 }
 0x830   : > { %v2867_v18 = vunpack.i.h.bf16 %v2865_v58  ;;  %v2866_v19 = vunpack.i.l.bf16 %v2865_v58  ;;  %1659 = vadd.xlane.f32.xlu0 %v1658_v16  ;;  %2667 = vmatpush3.bf16.msra.mxu1 %v2666_v51  ;;  %v1994_v51 = vld [vmem:[%s3434_s14 + $0x48] sm:$0xff]  ;;  %v1995_v16 = vld [vmem:[%s3434_s14 + $0x50] sm:$0xff] }
 0x831   : > { %2668 = vmatprep.subr.bf16.mxu1 %v2915_v0 }
 0x832   : > { %v2669_v21 = vpack.c.bf16 %v2867_v18, %v2866_v19  ;;  %v1996_v18 = vld [vmem:[%s3434_s14 + $0x58] sm:$0xff] }
 0x833   : > { %v1766_v42 = vpop.permute.xlu1 %1765  ;;  %v2699_v19 = vpack.c.bf16 %v1996_v18, %v1995_v16 }
 0x834   : > { %2670 = vmatpush3.bf16.msra.mxu1 %v2669_v21  ;;  %v1997_v21 = vld [vmem:[%s3434_s14 + $0x60] sm:$0xff] }
 0x835   : > { %2671 = vmatprep.subr.bf16.mxu1 %v2915_v0 }
 0x846   : > { %1761 = vrot.lane.b32.xlu0 %v1326_v30, %s2926_s17  ;;  %v2681_v30 = vpack.c.bf16 %v1895_v63, %v1894_v23  ;;  %s2141_s17 = sshll.u32 %s3443_s22, 3 }
 0x847   : > { %s519_s24 = scalar_lea.vmem %s3436_s16, %s2141_s17 }
 0x848   : > { %2682 = vmatpush3.bf16.msra.mxu0 %v2681_v30 }
 0x8bd   : > { %v1660_v24 = vpop.xlane.xlu0 %1659 }
 0x8be   : > { %2900 = vrcp.f32 %v1660_v24  ;;  %v1998_v24 = vld [vmem:[%s3434_s14 + $0x68] sm:$0xff] }
 0x8c1   : > { %v1762_v39 = vpop.permute.xlu0 %1761 }
 0x8c2   : > { %v1772_v43 = vsel %vm907_vm4, %v3234_v44, %v1762_v39 }
 0x8c3   : > { %v1774_v45 = vsel %vm1773_vm7, %v1772_v43, %v1766_v42 }
 0x8c8   : > { %v2901_v25 = vpop.eup %2900 }
 0x8c9   : > { %v1662_v27 = vmul.f32 %v2901_v25, %v2899_v14  ;;  %v1993_v14 = vld [vmem:[%s3434_s14 + $0x40] sm:$0xff]  ;;  %v2702_v25 = vpack.c.bf16 %v1998_v24, %v1997_v21 }
 0x8ca   : > { %v2696_v58 = vpack.c.bf16 %v1994_v51, %v1993_v14 }
 0x8cb   : > { %2494 = vmatmul.mubr.msk.f32.vlgmr.msra.gmra.mrb[12].mxu1 %vm1006_vm6, %v1662_v27  ;;  %v1999_v27 = vld [vmem:[%s3434_s14 + $0x70] sm:$0xff] }
 0x8cc   : > { %2504 = vmatprep.mubr.msk.f32.mxu1 %vm2916_vm3, %v2917_v7  ;;  %2673 = vmatpush3.bf16.msra.mxu1 %v2672_v33  ;;  %v2705_v32 = vpack.c.bf16 %v2000_v29, %v1999_v27 }
 0x8cd   : > { %2674 = vmatprep.subr.bf16.mxu1 %v2915_v0 }
 0x8d0   : > { %2676 = vmatpush3.bf16.msra.mxu1 %v2675_v36 }
 0x8d1   : > { %2683 = vmatprep.subr.bf16.mxu1 %v2915_v0 }
 0x99e   : > { %v1756_v37 = vpop.f32.mrb[12].mxu1 }
 0x99f   : > { %1769 = vrot.lane.b32.xlu1 %v1756_v37, %s2927_s28  ;;  %v2495_v38 = vpop.f32.mrb[13].mxu1 }
 0xa11   : > { %v1770_v46 = vpop.permute.xlu1 %1769 }
 0xa12   : > { %v1776_v47 = vsel %vm1775_vm8, %v1774_v45, %v1770_v46 }
 0xa13   : > { %2505 = vmatmul.mubr.msk.f32.vlgmr.msra.gmra.mrb[14].mxu1 %vm531_vm1, %v1776_v47 }
 0xa14   : > { %2550 = vmatprep.mubr.msk.f32.mxu1 %vm2916_vm3, %v2917_v7  ;;  %2685 = vmatpush3.bf16.msra.mxu1 %v2684_v3 }
 0xa15   : > { %2686 = vmatprep.subr.bf16.mxu1 %v2915_v0 }
 0xa18   : > { %2688 = vmatpush3.bf16.msra.mxu1 %v2687_v11 }
 0xa19   : > { %2689 = vmatprep.subr.bf16.mxu1 %v2915_v0 }
 0xa1c   : > { %2691 = vmatpush3.bf16.msra.mxu1 %v2690_v17 }
 0xa1d   : > { %2692 = vmatprep.subr.bf16.mxu1 %v2915_v0 }
 0xa20   : > { %2694 = vmatpush3.bf16.msra.mxu1 %v2693_v34 }
 0xa21   : > { %2695 = vmatprep.subr.bf16.mxu1 %v2915_v0 }
 0xa24   : > { %2697 = vmatpush3.bf16.msra.mxu1 %v2696_v58 }
 0xa25   : > { %2698 = vmatprep.subr.bf16.mxu1 %v2915_v0 }
 0xa28   : > { %2700 = vmatpush3.bf16.msra.mxu1 %v2699_v19 }
 0xa29   : > { %2701 = vmatprep.subr.bf16.mxu1 %v2915_v0 }
 0xa2c   : > { %2703 = vmatpush3.bf16.msra.mxu1 %v2702_v25 }
 0xa2d   : > { %2704 = vmatprep.subr.bf16.mxu1 %v2915_v0 }
 0xa30   : > { %2706 = vmatpush3.bf16.msra.mxu1 %v2705_v32 }
 0xae6   : > { %v1850_v48 = vpop.f32.mrb[14].mxu1 }
 0xae7   : > { %v1854_v44 = vadd.f32 %v2906_v52, %v1850_v48  ;;  %v2506_v22 = vpop.f32.mrb[15].mxu1 }
 0xae9   : > { %v3324_v53 = vadd.f32 %v2197_v49, %v1854_v44  ;;  %v2202_v49 = vld [vmem:[%s3435_s15] ss:$0 sm:$0xff] }
 0xaeb   : > { %v1865_v54 = vsel %vm531_vm1, %v3324_v53, 0.0 }
 0xaec   : > { %1866 = vadd.xlane.f32.xlu1 %v1865_v54 }
 0xb79   : > { %v1867_v55 = vpop.xlane.xlu1 %1866 }
 0xb7a   : > { %v1868_v56 = vmul.f32 0.03125, %v1867_v55 }
 0xb7c   : > { %v1869_v7 = vsub.f32 %v3324_v53, %v1868_v56 }
 0xb7e   : > { %v1870_v57 = vmul.f32 %v1869_v7, %v1869_v7 }
 0xb80   : > { %v1871_v59 = vsel %vm531_vm1, %v1870_v57, 0.0 }
 0xb81   : > { %1872 = vadd.xlane.f32.xlu0 %v1871_v59 }
 0xc0e   : > { %v1873_v4 = vpop.xlane.xlu0 %1872 }
 0xc0f   : > { %v1874_v5 = vmul.f32 0.03125, %v1873_v4 }
 0xc11   : > { %v1875_v40 = vadd.f32 1e-05, %v1874_v5 }
 0xc13   : > { %2902 = vrsqrt.f32 %v1875_v40 }
 0xc1d   : > { %v2903_v31 = vpop.eup %2902 }
 0xc1e   : > { %v1877_v6 = vmul.f32 %v2903_v31, %v1869_v7 }
 0xc20   : > { %v1884_v9 = vmul.f32 %v2198_v15, %v1877_v6 }
 0xc22   : > { %v1891_v10 = vadd.f32 %v2199_v8, %v1884_v9 }
 0xc24   : > { %2516 = vmatmul.mubr.msk.f32.vlgmr.msra.gmra.mrb[12].mxu0 %vm531_vm1, %v1891_v10 }
 0xcf7   : > { %v1972_v33 = vpop.f32.mrb[12].mxu0 }
 0xcf8   : > { %v1973_v35 = vadd.f32 %v2200_v28, %v1972_v33  ;;  %v2517_v36 = vpop.f32.mrb[13].mxu0 }
 0xcfa   : > { %v1976_v37 = vmul.f32 %v1973_v35, %v1973_v35 }
 0xcfc   : > { %v1977_v38 = vmul.f32 %v1976_v37, %v1973_v35 }
 0xcfe   : > { %v1978_v39 = vmul.f32 0.044715, %v1977_v38 }
 0xd00   : > { %v1979_v42 = vadd.f32 %v1978_v39, %v1973_v35 }
 0xd02   : > { %v1980_v43 = vmul.f32 0.7978846, %v1979_v42 }
 0xd04   : > { %2904 = vtanh.f32 %v1980_v43 }
 0xd0e   : > { %v2905_v45 = vpop.eup %2904 }
 0xd0f   : > { %v1982_v46 = vadd.f32 1.0, %v2905_v45 }
 0xd11   : > { %v1983_v47 = vmul.f32 0.5, %v1982_v46 }
 0xd13   : > { %v1984_v48 = vmul.f32 %v1983_v47, %v1973_v35 }
 0xd15   : > { %2551 = vmatmul.mubr.f32.vlgmr.msra.gmra.mrb[16].mxu1 %v1984_v48 }
 0xde8   : > { %v2067_v0 = vpop.f32.mrb[16].mxu1 }
 0xde9   : > { %v2071_v52 = vadd.f32 %v2067_v0, %v3324_v53  ;;  %v2552_v44 = vpop.f32.mrb[17].mxu1 }
 0xdeb   : > { %v2079_v22 = vadd.f32 %v2202_v49, %v2071_v52 }
 0xded   : > { %2080 = vst.msk [vmem:[%s519_s24] sm:$0xff] %vm531_vm1, %v2079_v22 }
 0xdee PF: > { %s26_s21 = sadd.s32 1, %s2913_s21  }
 0xdef   : > { %p23_p4 = scmp.ge.s32.totalorder %s26_s21, 4  }
 0xdf1   :  { %25 = sbr.rel (!%p23_p4) target bundleno = 2 (0x2), region = 114 }

// kernel: neural_gcm_forward.5
= control target key start
LH: loop header
LB: loop body
LE: loop exit
PB: predicated region body
PF: predicated region fallthrough
CT: control target
= control target key end

     0   :  { %s2726_s21 = smov 0   ;;  %s3034_s0 = inlined_call_operand.vmem [shape: f32[2,8,32], index: 0, kind: input, shape index: {}]   ;;  %s3035_s1 = inlined_call_operand.vmem [shape: f32[1,32], index: 1, kind: input, shape index: {}]   ;;  %s3036_s2 = inlined_call_operand.vmem [shape: f32[1,32], index: 2, kind: input, shape index: {}]   ;;  %s3037_s3 = inlined_call_operand.vmem [shape: f32[32,96], index: 3, kind: input, shape index: {}]   ;;  %s3038_s4 = inlined_call_operand.vmem [shape: f32[32,32], index: 4, kind: input, shape index: {}]   ;;  %s3039_s5 = inlined_call_operand.vmem [shape: f32[1,32], index: 5, kind: input, shape index: {}]   ;;  %s3040_s6 = inlined_call_operand.vmem [shape: f32[1,32], index: 6, kind: input, shape index: {}]   ;;  %s3041_s7 = inlined_call_operand.vmem [shape: f32[1,32], index: 7, kind: input, shape index: {}]   ;;  %s3042_s8 = inlined_call_operand.vmem [shape: f32[32,128], index: 8, kind: input, shape index: {}]   ;;  %s3043_s9 = inlined_call_operand.vmem [shape: f32[1,128], index: 9, kind: input, shape index: {}]   ;;  %s3044_s10 = inlined_call_operand.vmem [shape: f32[128,32], index: 10, kind: input, shape index: {}]   ;;  %s3045_s11 = inlined_call_operand.vmem [shape: f32[1,32], index: 11, kind: input, shape index: {}]   ;;  %s3046_s12 = inlined_call_operand.vmem [shape: f32[2,8,32], index: 12, kind: output, shape index: {}]  }
   0x1 LB: > { %s2244_s22 = sadd.s32 4294967295, %s2626_s21   ;;  %p2248_p0 = scmp.ge.s32.totalorder %s2626_s21, 1  ;;  %s2626_s21 = sphi %s2726_s21, %s22_s21  }
   0x2   : > { %p361_p1 = scmp.lt.s32.totalorder %s2626_s21, 3 }
   0x4   : > { %p362_p2 = pnand %p2248_p0, %p361_p1 }
   0x5   : > { %p401_p3 = scmp.lt.s32.totalorder (!%p362_p2), %s2244_s22, 1  ;;  %vm412_vm0 = vcmask (!%p362_p2), 261120   ;;  %v441_v7 = vld [vmem:[%s3037_s3] sm:$0xff] (!%p362_p2)  ;;  %v442_v8 = vld [vmem:[%s3037_s3 + $0x8] sm:$0xff] (!%p362_p2)  ;;  %v443_v9 = vld [vmem:[%s3037_s3 + $0x10] sm:$0xff] (!%p362_p2)  ;;  %v2628_v10 = vmov (!%p362_p2), 0.0|0.0  }
   0x6   : > { %365 = sbr.rel (%p362_p2) target bundleno = 2581 (0xa15), region = 68  ;;  %2499 = vmatprep.subr.bf16.mxu1 (!%p362_p2), %v2628_v10  ;;  %v2500_v11 = vpack.c.bf16 (!%p362_p2), %v442_v8, %v441_v7  ;;  %v444_v12 = vld [vmem:[%s3037_s3 + $0x18] sm:$0xff] (!%p362_p2)  ;;  %vm2629_vm1 = vmmov (!%p362_p2), 0   ;;  %v2630_v13 = vmov (!%p362_p2), 0.0   ;;  %v2251_v19 = vld [vmem:[%s3035_s1] ss:$0 sm:$0xff] (!%p362_p2) }
   0x7   : > { %2359 = vmatprep.mubr.msk.f32.mxu1 (!%p362_p2), %vm2629_vm1, %v2630_v13  ;;  %2372 = vmatprep.subr.mxu0 (!%p362_p2), %v2630_v13  ;;  %v2503_v14 = vpack.c.bf16 (!%p362_p2), %v444_v12, %v443_v9  ;;  %v2252_v21 = vld [vmem:[%s3036_s2] ss:$0 sm:$0xff] (!%p362_p2)  ;;  %s2631_s24 = smov (!%p362_p2), 124   ;;  %s2632_s25 = smov (!%p362_p2), 96   ;;  %vm521_vm2 = vcmask (!%p362_p2), 31744   ;;  %vm597_vm3 = vcmask (!%p362_p2), 64512  }
   0x8   : > { %2374 = vmatprep.mubr.msk.f32.mxu0 (!%p362_p2), %vm2629_vm1, %v2630_v13  ;;  %2501 = vmatpush3.bf16.msra.mxu1 (!%p362_p2), %v2500_v11  ;;  %s2634_s27 = smov (!%p362_p2), 92   ;;  %s2635_s28 = smov (!%p362_p2), 72   ;;  %vm1877_vm4 = vcmask (!%p362_p2), 97280   ;;  %vm1879_vm5 = vcmask (!%p362_p2), 130048   ;;  %vm1881_vm6 = vcmask (!%p362_p2), 162816   ;;  %vm1883_vm7 = vcmask (!%p362_p2), 195584  }
   0x9   : > { %2502 = vmatprep.subr.bf16.mxu1 (!%p362_p2), %v2628_v10  ;;  %s2636_s29 = smov (!%p362_p2), 88   ;;  %s2637_s30 = smov (!%p362_p2), 68   ;;  %vm1885_vm8 = vcmask (!%p362_p2), 228352  }
   0xa   : > { %s2638_s13 = smov (!%p362_p2), 120   ;;  %s2639_s14 = smov (!%p362_p2), 64  }
   0xb   : > { %s2640_s15 = smov (!%p362_p2), 84   ;;  %s2641_s16 = smov (!%p362_p2), 116  }
   0xc   : > { %2504 = vmatpush3.bf16.msra.mxu1 (!%p362_p2), %v2503_v14  ;;  %s2642_s17 = smov (!%p362_p2), 80   ;;  %s2643_s18 = smov (!%p362_p2), 112  }
   0xd   : > { %s3048_s22 = smov (!%p401_p3, %s2244_s22), 1  ;;  %2362 = vmatprep.subr.mxu1 %v2630_v13  ;;  %s2644_s19 = smov 108  }
   0xe   : > { %s2249_s23 = sshll.u32 %s3048_s22, 3  ;;  %s2645_s20 = smov 104  }
   0xf   : > { %s404_s26 = scalar_lea.vmem %s3034_s0, %s2249_s23 }
  0x10   : > { %v2742_v0 = vld [vmem:[%s404_s26] sm:$0xff]  ;;  %s2633_s26 = smov 76  }
  0x11   : > { %v413_v1 = vsel %vm412_vm0, %v2742_v0, 0.0 }
  0x12   : > { %414 = vadd.xlane.f32.xlu0 %v413_v1 }
  0x9f   : > { %v415_v2 = vpop.xlane.xlu0 %414 }
  0xa0   : > { %v417_v3 = vmul.f32 0.03125, %v415_v2 }
  0xa2   : > { %v418_v4 = vsub.f32 %v2742_v0, %v417_v3 }
  0xa4   : > { %v419_v5 = vmul.f32 %v418_v4, %v418_v4 }
  0xa6   : > { %v420_v6 = vsel %vm412_vm0, %v419_v5, 0.0 }
  0xa7   : > { %421 = vadd.xlane.f32.xlu0 %v420_v6 }
 0x134   : > { %v422_v15 = vpop.xlane.xlu0 %421 }
 0x135   : > { %v423_v16 = vmul.f32 0.03125, %v422_v15 }
 0x137   : > { %v424_v17 = vadd.f32 1e-05, %v423_v16 }
 0x139   : > { %2582 = vrsqrt.f32 %v424_v17 }
 0x143   : > { %v2583_v18 = vpop.eup %2582 }
 0x144   : > { %v426_v20 = vmul.f32 %v2583_v18, %v418_v4 }
 0x146   : > { %v433_v22 = vmul.f32 %v2251_v19, %v426_v20 }
 0x148   : > { %v440_v23 = vadd.f32 %v2252_v21, %v433_v22 }
 0x14a   : > { %2360 = vmatmul.mubr.msk.f32.vlgmr.msra.gmra.mrb[0].mxu1 %vm412_vm0, %v440_v23 }
 0x14b   : > { %2364 = vmatprep.mubr.msk.f32.mxu1 %vm2629_vm1, %v2630_v13 }
 0x21d   : > { %v2777_v24 = vpop.f32.mrb[0].mxu1 }
 0x21e   : > { %685 = vrot.lane.b32.xlu0 %v2777_v24, %s2631_s24  ;;  %519 = vrot.lane.b32.xlu1 %v2777_v24, %s2632_s25  ;;  %v2361_v25 = vpop.f32.mrb[1].mxu1  ;;  %s2646_s24 = smov 100   ;;  %s2647_s25 = smov 60  }
 0x222   : > { %1351 = vrot.lane.b32.xlu0 %v2777_v24, %s2633_s26  ;;  %687 = vrot.lane.b32.xlu1 %v2777_v24, %s2634_s27  ;;  %s2648_s26 = smov 52   ;;  %s2649_s27 = smov 56  }
 0x226   : > { %1517 = vrot.lane.b32.xlu0 %v2777_v24, %s2635_s28  ;;  %853 = vrot.lane.b32.xlu1 %v2777_v24, %s2636_s29  ;;  %s2650_s28 = smov 44   ;;  %s2651_s29 = smov 48  }
 0x22a   : > { %1683 = vrot.lane.b32.xlu0 %v2777_v24, %s2637_s30  ;;  %851 = vrot.lane.b32.xlu1 %v2777_v24, %s2638_s13  ;;  %s2652_s30 = smov 36   ;;  %s2653_s13 = smov 40  }
 0x22e   : > { %609 = vrot.lane.b32.xlu0 %v2777_v24, %s2639_s14  ;;  %1019 = vrot.lane.b32.xlu1 %v2777_v24, %s2640_s15  ;;  %s2654_s14 = smov 4   ;;  %s2655_s15 = smov 8  }
 0x232   : > { %1017 = vrot.lane.b32.xlu1 %v2777_v24, %s2641_s16  ;;  %s2656_s16 = smov 12  }
 0x236   : > { %1185 = vrot.lane.b32.xlu1 %v2777_v24, %s2642_s17 }
 0x23a   : > { %1183 = vrot.lane.b32.xlu1 %v2777_v24, %s2643_s18 }
 0x23e   : > { %1349 = vrot.lane.b32.xlu1 %v2777_v24, %s2644_s19 }
 0x242   : > { %1515 = vrot.lane.b32.xlu1 %v2777_v24, %s2645_s20 }
 0x246   : > { %1681 = vrot.lane.b32.xlu1 %v2777_v24, %s2646_s24  ;;  %s2657_s24 = smov 16  }
 0x24a   : > { %775 = vrot.lane.b32.xlu1 %v2777_v24, %s2647_s25 }
 0x290   : > { %v686_v26 = vpop.permute.xlu0 %685  ;;  %v520_v27 = vpop.permute.xlu1 %519 }
 0x291   : > { %2363 = vmatpush3.xpose.msk.msra.mxu1 %vm521_vm2, %v520_v27 }
 0x292   : > { %2367 = vmatprep.subr.mxu1 %v2630_v13 }
 0x294   : > { %v1352_v28 = vpop.permute.xlu0 %1351  ;;  %2365 = vmatmul.mubr.msk.f32.vlgmr.msra.gmra.mrb[2].mxu1 %vm521_vm2, %v2777_v24  ;;  %v688_v29 = vpop.permute.xlu1 %687 }
 0x295   : > { %2373 = vmatpush3.xpose.msk.msra.mxu0 %vm521_vm2, %v688_v29  ;;  %2369 = vmatprep.mubr.msk.f32.mxu1 %vm2629_vm1, %v2630_v13 }
 0x296   : > { %2382 = vmatprep.subr.mxu0 %v2630_v13 }
 0x298   : > { %v1518_v30 = vpop.permute.xlu0 %1517  ;;  %2375 = vmatmul.mubr.msk.f32.vlgmr.msra.gmra.mrb[0].mxu0 %vm521_vm2, %v686_v26  ;;  %v854_v31 = vpop.permute.xlu1 %853 }
 0x299   : > { %2383 = vmatpush3.xpose.msk.msra.mxu0 %vm521_vm2, %v854_v31  ;;  %2384 = vmatprep.mubr.msk.f32.mxu0 %vm2629_vm1, %v2630_v13 }
 0x29a   : > { %2392 = vmatprep.subr.mxu0 %v2630_v13 }
 0x29c   : > { %v1684_v32 = vpop.permute.xlu0 %1683  ;;  %v852_v33 = vpop.permute.xlu1 %851 }
 0x29d   : > { %2385 = vmatmul.mubr.msk.f32.vlgmr.msra.gmra.mrb[2].mxu0 %vm521_vm2, %v852_v33 }
 0x29e   : > { %2394 = vmatprep.mubr.msk.f32.mxu0 %vm2629_vm1, %v2630_v13 }
 0x2a0   : > { %v610_v34 = vpop.permute.xlu0 %609  ;;  %v1020_v35 = vpop.permute.xlu1 %1019 }
 0x2a1   : > { %2368 = vmatpush3.msra.mxu1 %v610_v34  ;;  %2393 = vmatpush3.xpose.msk.msra.mxu0 %vm521_vm2, %v1020_v35 }
 0x2a2   : > { %2402 = vmatprep.subr.mxu0 %v2630_v13  ;;  %2377 = vmatprep.subr.mxu1 %v2630_v13 }
 0x2a4   : > { %v1018_v36 = vpop.permute.xlu1 %1017 }
 0x2a5   : > { %2395 = vmatmul.mubr.msk.f32.vlgmr.msra.gmra.mrb[4].mxu0 %vm521_vm2, %v1018_v36 }
 0x2a6   : > { %2404 = vmatprep.mubr.msk.f32.mxu0 %vm2629_vm1, %v2630_v13 }
 0x2a8   : > { %v1186_v37 = vpop.permute.xlu1 %1185 }
 0x2a9   : > { %2403 = vmatpush3.xpose.msk.msra.mxu0 %vm521_vm2, %v1186_v37 }
 0x2aa   : > { %2412 = vmatprep.subr.mxu0 %v2630_v13 }
 0x2ac   : > { %v1184_v38 = vpop.permute.xlu1 %1183 }
 0x2ad   : > { %2405 = vmatmul.mubr.msk.f32.vlgmr.msra.gmra.mrb[6].mxu0 %vm521_vm2, %v1184_v38 }
 0x2ae   : > { %2413 = vmatpush3.xpose.msk.msra.mxu0 %vm521_vm2, %v1352_v28  ;;  %2414 = vmatprep.mubr.msk.f32.mxu0 %vm2629_vm1, %v2630_v13 }
 0x2af   : > { %2422 = vmatprep.subr.mxu0 %v2630_v13 }
 0x2b0   : > { %v1350_v39 = vpop.permute.xlu1 %1349 }
 0x2b1   : > { %2415 = vmatmul.mubr.msk.f32.vlgmr.msra.gmra.mrb[8].mxu0 %vm521_vm2, %v1350_v39 }
 0x2b2   : > { %2423 = vmatpush3.xpose.msk.msra.mxu0 %vm521_vm2, %v1518_v30  ;;  %2424 = vmatprep.mubr.msk.f32.mxu0 %vm2629_vm1, %v2630_v13 }
 0x2b3   : > { %2432 = vmatprep.subr.mxu0 %v2630_v13 }
 0x2b4   : > { %v1516_v40 = vpop.permute.xlu1 %1515 }
 0x2b5   : > { %2425 = vmatmul.mubr.msk.f32.vlgmr.msra.gmra.mrb[10].mxu0 %vm521_vm2, %v1516_v40 }
 0x2b6   : > { %2433 = vmatpush3.xpose.msk.msra.mxu0 %vm521_vm2, %v1684_v32  ;;  %2434 = vmatprep.mubr.msk.f32.mxu0 %vm2629_vm1, %v2630_v13 }
 0x2b7   : > { %2517 = vmatprep.subr.bf16.mxu0 %v2628_v10 }
 0x2b8   : > { %v1682_v41 = vpop.permute.xlu1 %1681 }
 0x2b9   : > { %2435 = vmatmul.mubr.msk.f32.vlgmr.msra.gmra.mrb[12].mxu0 %vm521_vm2, %v1682_v41 }
 0x2ba   : > { %2496 = vmatprep.mubr.msk.f32.mxu0 %vm2629_vm1, %v2630_v13 }
 0x2bc   : > { %v2848_v12 = vpop.permute.xlu1 %775 }
 0x367   : > { %v592_v42 = vpop.f32.mrb[2].mxu1 }
 0x368   : > { %v596_v43 = vmul.f32 0.5, %v592_v42  ;;  %v2366_v44 = vpop.f32.mrb[3].mxu1 }
 0x36a   : > { %v598_v45 = vsel %vm597_vm3, %v596_v43, -inf }
 0x36b   : > { %v759_v46 = vpop.f32.mrb[0].mxu0  ;;  %599 = vmax.xlane.f32.xlu0 %v598_v45 }
 0x36c   : > { %v763_v47 = vmul.f32 0.5, %v759_v46  ;;  %v2376_v48 = vpop.f32.mrb[1].mxu0 }
 0x36e   : > { %v764_v49 = vsel %vm597_vm3, %v763_v47, -inf }
 0x36f   : > { %765 = vmax.xlane.f32.xlu1 %v764_v49 }
 0x370   : > { %v925_v50 = vpop.f32.mrb[2].mxu0 }
 0x371   : > { %v929_v51 = vmul.f32 0.5, %v925_v50  ;;  %v2386_v52 = vpop.f32.mrb[3].mxu0 }
 0x373   : > { %v930_v53 = vsel %vm597_vm3, %v929_v51, -inf }
 0x374   : > { %931 = vmax.xlane.f32.xlu0 %v930_v53 }
 0x378   : > { %v1091_v54 = vpop.f32.mrb[4].mxu0 }
 0x379   : > { %v1095_v55 = vmul.f32 0.5, %v1091_v54  ;;  %v2396_v56 = vpop.f32.mrb[5].mxu0 }
 0x37b   : > { %v1096_v57 = vsel %vm597_vm3, %v1095_v55, -inf }
 0x37c   : > { %1097 = vmax.xlane.f32.xlu0 %v1096_v57 }
 0x380   : > { %v1257_v58 = vpop.f32.mrb[6].mxu0 }
 0x381   : > { %v1261_v59 = vmul.f32 0.5, %v1257_v58  ;;  %v2406_v60 = vpop.f32.mrb[7].mxu0 }
 0x383   : > { %v1262_v61 = vsel %vm597_vm3, %v1261_v59, -inf }
 0x384   : > { %1263 = vmax.xlane.f32.xlu1 %v1262_v61  ;;  %v1423_v62 = vpop.f32.mrb[8].mxu0 }
 0x385   : > { %v1427_v63 = vmul.f32 0.5, %v1423_v62  ;;  %v2416_v1 = vpop.f32.mrb[9].mxu0 }
 0x387   : > { %v1428_v2 = vsel %vm597_vm3, %v1427_v63, -inf }
 0x388   : > { %v1589_v3 = vpop.f32.mrb[10].mxu0  ;;  %1429 = vmax.xlane.f32.xlu0 %v1428_v2 }
 0x389   : > { %v1593_v4 = vmul.f32 0.5, %v1589_v3  ;;  %v2426_v5 = vpop.f32.mrb[11].mxu0 }
 0x38b   : > { %v1594_v6 = vsel %vm597_vm3, %v1593_v4, -inf }
 0x38c   : > { %1595 = vmax.xlane.f32.xlu1 %v1594_v6  ;;  %v1755_v7 = vpop.f32.mrb[12].mxu0 }
 0x38d   : > { %v1759_v8 = vmul.f32 0.5, %v1755_v7  ;;  %v2436_v9 = vpop.f32.mrb[13].mxu0 }
 0x38f   : > { %v1760_v11 = vsel %vm597_vm3, %v1759_v8, -inf }
 0x390   : > { %1761 = vmax.xlane.f32.xlu0 %v1760_v11 }
 0x39d   : > { %1107 = vrot.lane.b32.xlu1 %v2777_v24, %s2648_s26 }
 0x3a6   : > { %941 = vrot.lane.b32.xlu0 %v2777_v24, %s2649_s27 }
 0x3f8   : > { %v600_v14 = vpop.xlane.xlu0 %599 }
 0x3f9   : > { %v601_v15 = vsub.f32 %v596_v43, %v600_v14 }
 0x3fb   : > { %v602_v16 = vmul.f32 1.442695, %v601_v15 }
 0x3fc   : > { %v766_v17 = vpop.xlane.xlu1 %765 }
 0x3fd   : > { %2584 = vpow2.f32 %v602_v16  ;;  %v767_v18 = vsub.f32 %v763_v47, %v766_v17 }
 0x3ff   : > { %v768_v19 = vmul.f32 1.442695, %v767_v18 }
 0x401   : > { %2586 = vpow2.f32 %v768_v19  ;;  %v932_v20 = vpop.xlane.xlu0 %931 }
 0x402   : > { %v933_v21 = vsub.f32 %v929_v51, %v932_v20 }
 0x404   : > { %v934_v22 = vmul.f32 1.442695, %v933_v21 }
 0x406   : > { %2588 = vpow2.f32 %v934_v22 }
 0x407   : > { %v2585_v23 = vpop.eup %2584 }
 0x408   : > { %v604_v25 = vsel %vm597_vm3, %v2585_v23, 0.0 }
 0x409   : > { %605 = vadd.xlane.f32.xlu1 %v604_v25  ;;  %v1098_v26 = vpop.xlane.xlu0 %1097 }
 0x40a   : > { %v1099_v27 = vsub.f32 %v1095_v55, %v1098_v26 }
 0x40b   : > { %v2587_v28 = vpop.eup %2586 }
 0x40c   : > { %v1100_v29 = vmul.f32 1.442695, %v1099_v27  ;;  %v770_v30 = vsel %vm597_vm3, %v2587_v28, 0.0 }
 0x40d   : > { %771 = vadd.xlane.f32.xlu0 %v770_v30 }
 0x40e   : > { %2590 = vpow2.f32 %v1100_v29 }
 0x410   : > { %v2852_v31 = vpop.eup %2588 }
 0x411   : > { %v936_v32 = vsel %vm597_vm3, %v2852_v31, 0.0  ;;  %v1264_v35 = vpop.xlane.xlu1 %1263 }
 0x412   : > { %937 = vadd.xlane.f32.xlu1 %v936_v32  ;;  %v1265_v36 = vsub.f32 %v1261_v59, %v1264_v35  ;;  %v1887_v32 = vld [vmem:[%s3038_s4] sm:$0xff] }
 0x414   : > { %v1266_v39 = vmul.f32 1.442695, %v1265_v36 }
 0x415   : > { %v1430_v37 = vpop.xlane.xlu0 %1429 }
 0x416   : > { %v1431_v42 = vsub.f32 %v1427_v63, %v1430_v37  ;;  %2592 = vpow2.f32 %v1266_v39  ;;  %v1889_v37 = vld [vmem:[%s3038_s4 + $0x10] sm:$0xff] }
 0x418   : > { %v2856_v33 = vpop.eup %2590  ;;  %v1432_v45 = vmul.f32 1.442695, %v1431_v42 }
 0x419   : > { %v1102_v34 = vsel %vm597_vm3, %v2856_v33, 0.0  ;;  %v1596_v38 = vpop.xlane.xlu1 %1595 }
 0x41a   : > { %1103 = vadd.xlane.f32.xlu0 %v1102_v34  ;;  %v1597_v40 = vsub.f32 %v1593_v4, %v1596_v38  ;;  %v1890_v38 = vld [vmem:[%s3038_s4 + $0x18] sm:$0xff] }
 0x41b   : > { %v2509_v39 = vpack.c.bf16 %v1890_v38, %v1889_v37  ;;  %v2105_v37 = vld [vmem:[%s3044_s10 + $0x50] sm:$0xff] }
 0x41c   : > { %v1598_v43 = vmul.f32 1.442695, %v1597_v40 }
 0x41d   : > { %v1762_v41 = vpop.xlane.xlu0 %1761  ;;  %v1108_v55 = vpop.permute.xlu1 %1107 }
 0x41e   : > { %v1763_v44 = vsub.f32 %v1759_v8, %v1762_v41  ;;  %2594 = vpow2.f32 %v1598_v43 }
 0x41f   : > { %2596 = vpow2.f32 %v1432_v45 }
 0x420   : > { %v1764_v46 = vmul.f32 1.442695, %v1763_v44  ;;  %v2593_v47 = vpop.eup %2592 }
 0x421   : > { %v1268_v48 = vsel %vm597_vm3, %v2593_v47, 0.0  ;;  %v942_v56 = vpop.permute.xlu0 %941 }
 0x422   : > { %2598 = vpow2.f32 %v1764_v46 }
 0x423   : > { %1439 = vrot.lane.b32.xlu1 %v2777_v24, %s2650_s28 }
 0x428   : > { %v2863_v49 = vpop.eup %2594 }
 0x429   : > { %v2865_v50 = vpop.eup %2596  ;;  %v1600_v51 = vsel %vm597_vm3, %v2863_v49, 0.0 }
 0x42a   : > { %v1434_v53 = vsel %vm597_vm3, %v2865_v50, 0.0 }
 0x42c   : > { %v2869_v52 = vpop.eup %2598 }
 0x42d   : > { %v1766_v54 = vsel %vm597_vm3, %v2869_v52, 0.0 }
 0x430   : > { %1273 = vrot.lane.b32.xlu0 %v2777_v24, %s2651_s29  ;;  %s2658_s29 = smov 20  }
 0x447   : > { %1269 = vadd.xlane.f32.xlu1 %v1268_v48 }
 0x44b   : > { %1601 = vadd.xlane.f32.xlu1 %v1600_v51 }
 0x44f   : > { %1435 = vadd.xlane.f32.xlu0 %v1434_v53  ;;  %1767 = vadd.xlane.f32.xlu1 %v1766_v54 }
 0x460   : > { %1771 = vrot.lane.b32.xlu1 %v2777_v24, %s2652_s30  ;;  %s2659_s30 = smov 24  }
 0x465   : > { %1605 = vrot.lane.b32.xlu0 %v2777_v24, %s2653_s13  ;;  %s2660_s13 = smov 28  }
 0x496   : > { %v606_v57 = vpop.xlane.xlu1 %605 }
 0x497   : > { %2600 = vrcp.f32 %v606_v57 }
 0x49a   : > { %v772_v58 = vpop.xlane.xlu0 %771 }
 0x49b   : > { %2602 = vrcp.f32 %v772_v58 }
 0x49f   : > { %v938_v59 = vpop.xlane.xlu1 %937 }
 0x4a0   : > { %2604 = vrcp.f32 %v938_v59 }
 0x4a1   : > { %v2601_v60 = vpop.eup %2600 }
 0x4a2   : > { %v608_v61 = vmul.f32 %v2601_v60, %v2585_v23 }
 0x4a3   : > { %v1440_v6 = vpop.permute.xlu1 %1439 }
 0x4a4   : > { %2370 = vmatmul.mubr.msk.f32.vlgmr.msra.gmra.mrb[4].mxu1 %vm597_vm3, %v608_v61  ;;  %v2279_v61 = vld [vmem:[%s3039_s5] ss:$0 sm:$0xff] }
 0x4a5   : > { %v2603_v62 = vpop.eup %2602  ;;  %2378 = vmatpush3.msra.mxu1 %v2848_v12  ;;  %2379 = vmatprep.mubr.msk.f32.mxu1 %vm2629_vm1, %v2630_v13 }
 0x4a6   : > { %v774_v63 = vmul.f32 %v2603_v62, %v2587_v28  ;;  %2387 = vmatprep.subr.mxu1 %v2630_v13 }
 0x4a7   : > { %v1104_v24 = vpop.xlane.xlu0 %1103 }
 0x4a8   : > { %2606 = vrcp.f32 %v1104_v24  ;;  %2380 = vmatmul.mubr.msk.f32.vlgmr.msra.gmra.mrb[6].mxu1 %vm597_vm3, %v774_v63 }
 0x4a9   : > { %2388 = vmatpush3.msra.mxu1 %v942_v56  ;;  %2389 = vmatprep.mubr.msk.f32.mxu1 %vm2629_vm1, %v2630_v13 }
 0x4aa   : > { %v2605_v1 = vpop.eup %2604  ;;  %2397 = vmatprep.subr.mxu1 %v2630_v13 }
 0x4ab   : > { %v940_v2 = vmul.f32 %v2605_v1, %v2852_v31  ;;  %v1274_v5 = vpop.permute.xlu0 %1273 }
 0x4ad   : > { %2390 = vmatmul.mubr.msk.f32.vlgmr.msra.gmra.mrb[8].mxu1 %vm597_vm3, %v940_v2 }
 0x4ae   : > { %2398 = vmatpush3.msra.mxu1 %v1108_v55  ;;  %2399 = vmatprep.mubr.msk.f32.mxu1 %vm2629_vm1, %v2630_v13 }
 0x4af   : > { %2407 = vmatprep.subr.mxu1 %v2630_v13 }
 0x4b2   : > { %v2607_v3 = vpop.eup %2606 }
 0x4b3   : > { %v1106_v4 = vmul.f32 %v2607_v3, %v2856_v33  ;;  %v1888_v33 = vld [vmem:[%s3038_s4 + $0x8] sm:$0xff] }
 0x4b4   : > { %v2506_v34 = vpack.c.bf16 %v1888_v33, %v1887_v32  ;;  %v2101_v32 = vld [vmem:[%s3044_s10 + $0x30] sm:$0xff]  ;;  %v2102_v33 = vld [vmem:[%s3044_s10 + $0x38] sm:$0xff] }
 0x4b5   : > { %2400 = vmatmul.mubr.msk.f32.vlgmr.msra.gmra.mrb[10].mxu1 %vm597_vm3, %v1106_v4 }
 0x4b6   : > { %2408 = vmatpush3.msra.mxu1 %v1274_v5  ;;  %2409 = vmatprep.mubr.msk.f32.mxu1 %vm2629_vm1, %v2630_v13 }
 0x4b7   : > { %2417 = vmatprep.subr.mxu1 %v2630_v13 }
 0x4d4   : > { %v1270_v7 = vpop.xlane.xlu1 %1269 }
 0x4d5   : > { %2608 = vrcp.f32 %v1270_v7 }
 0x4d8   : > { %v1602_v8 = vpop.xlane.xlu1 %1601 }
 0x4dc   : > { %v1436_v9 = vpop.xlane.xlu0 %1435  ;;  %v1768_v14 = vpop.xlane.xlu1 %1767 }
 0x4dd   : > { %2610 = vrcp.f32 %v1436_v9  ;;  %v2005_v9 = vld [vmem:[%s3042_s8 + $0x18] sm:$0xff] }
 0x4de   : > { %2612 = vrcp.f32 %v1602_v8  ;;  %v2004_v8 = vld [vmem:[%s3042_s8 + $0x10] sm:$0xff] }
 0x4df   : > { %v2609_v11 = vpop.eup %2608  ;;  %2614 = vrcp.f32 %v1768_v14  ;;  %v2096_v14 = vld [vmem:[%s3044_s10 + $0x8] sm:$0xff] }
 0x4e0   : > { %v1272_v12 = vmul.f32 %v2609_v11, %v2593_v47  ;;  %v1606_v18 = vpop.permute.xlu0 %1605  ;;  %v1772_v21 = vpop.permute.xlu1 %1771  ;;  %v2515_v11 = vpack.c.bf16 %v2005_v9, %v2004_v8 }
 0x4e2   : > { %2410 = vmatmul.mubr.msk.f32.vlgmr.msra.gmra.mrb[12].mxu1 %vm597_vm3, %v1272_v12  ;;  %v2095_v12 = vld [vmem:[%s3044_s10] sm:$0xff] }
 0x4e3   : > { %2418 = vmatpush3.msra.mxu1 %v1440_v6  ;;  %2419 = vmatprep.mubr.msk.f32.mxu1 %vm2629_vm1, %v2630_v13  ;;  %v2002_v6 = vld [vmem:[%s3042_s8] sm:$0xff] }
 0x4e4   : > { %2427 = vmatprep.subr.mxu1 %v2630_v13 }
 0x4e7   : > { %v2611_v15 = vpop.eup %2610 }
 0x4e8   : > { %v1438_v16 = vmul.f32 %v2611_v15, %v2865_v50  ;;  %v2613_v17 = vpop.eup %2612  ;;  %v2518_v15 = vpack.c.bf16 %v2096_v14, %v2095_v12 }
 0x4e9   : > { %v1604_v19 = vmul.f32 %v2613_v17, %v2863_v49  ;;  %v2615_v20 = vpop.eup %2614 }
 0x4ea   : > { %2420 = vmatmul.mubr.msk.f32.vlgmr.msra.gmra.mrb[14].mxu1 %vm597_vm3, %v1438_v16  ;;  %v1770_v22 = vmul.f32 %v2615_v20, %v2869_v52  ;;  %2519 = vmatpush3.bf16.msra.mxu0 %v2518_v15  ;;  %v2280_v20 = vld [vmem:[%s3040_s6] ss:$0 sm:$0xff] }
 0x4eb   : > { %2428 = vmatpush3.msra.mxu1 %v1606_v18  ;;  %2429 = vmatprep.mubr.msk.f32.mxu1 %vm2629_vm1, %v2630_v13 }
 0x4ec   : > { %2437 = vmatprep.subr.mxu1 %v2630_v13  ;;  %2520 = vmatprep.subr.bf16.mxu0 %v2628_v10 }
 0x4ee   : > { %2430 = vmatmul.mubr.msk.f32.vlgmr.msra.gmra.mrb[16].mxu1 %vm597_vm3, %v1604_v19 }
 0x4ef   : > { %2438 = vmatpush3.msra.mxu1 %v1772_v21  ;;  %2439 = vmatprep.mubr.msk.f32.mxu1 %vm2629_vm1, %v2630_v13 }
 0x4f0   : > { %2505 = vmatprep.subr.bf16.mxu1 %v2628_v10 }
 0x4f2   : > { %2440 = vmatmul.mubr.msk.f32.vlgmr.msra.gmra.mrb[18].mxu1 %vm597_vm3, %v1770_v22  ;;  %v2281_v22 = vld [vmem:[%s3041_s7] ss:$0 sm:$0xff] }
 0x4f3   : > { %2450 = vmatprep.mubr.msk.f32.mxu1 %vm2629_vm1, %v2630_v13  ;;  %2507 = vmatpush3.bf16.msra.mxu1 %v2506_v34  ;;  %v2527_v34 = vpack.c.bf16 %v2102_v33, %v2101_v32 }
 0x4f4   : > { %2508 = vmatprep.subr.bf16.mxu1 %v2628_v10 }
 0x4f7   : > { %2510 = vmatpush3.bf16.msra.mxu1 %v2509_v39  ;;  %v2106_v39 = vld [vmem:[%s3044_s10 + $0x58] sm:$0xff] }
 0x4f8   : > { %2511 = vmatprep.subr.bf16.mxu1 %v2628_v10 }
 0x577   : > { %v681_v23 = vpop.f32.mrb[4].mxu1 }
 0x578   : > { %v2371_v25 = vpop.f32.mrb[5].mxu1 }
 0x57b   : > { %v847_v26 = vpop.f32.mrb[6].mxu1 }
 0x57c   : > { %1848 = vrot.lane.b32.xlu0 %v847_v26, %s2654_s14  ;;  %v2381_v27 = vpop.f32.mrb[7].mxu1  ;;  %v2097_v26 = vld [vmem:[%s3044_s10 + $0x10] sm:$0xff] }
 0x57d   : > { %v2098_v27 = vld [vmem:[%s3044_s10 + $0x18] sm:$0xff] }
 0x580   : > { %v1013_v28 = vpop.f32.mrb[8].mxu1 }
 0x581   : > { %1852 = vrot.lane.b32.xlu1 %v1013_v28, %s2655_s15  ;;  %v2391_v29 = vpop.f32.mrb[9].mxu1  ;;  %v2521_v28 = vpack.c.bf16 %v2098_v27, %v2097_v26 }
 0x582   : > { %v2099_v29 = vld [vmem:[%s3044_s10 + $0x20] sm:$0xff] }
 0x583   : > { %2522 = vmatpush3.bf16.msra.mxu0 %v2521_v28 }
 0x584   : > { %2523 = vmatprep.subr.bf16.mxu0 %v2628_v10 }
 0x588   : > { %v1179_v30 = vpop.f32.mrb[10].mxu1 }
 0x589   : > { %1856 = vrot.lane.b32.xlu0 %v1179_v30, %s2656_s16  ;;  %v2401_v31 = vpop.f32.mrb[11].mxu1  ;;  %v2100_v30 = vld [vmem:[%s3044_s10 + $0x28] sm:$0xff] }
 0x58a   : > { %v2524_v31 = vpack.c.bf16 %v2100_v30, %v2099_v29 }
 0x58c   : > { %2525 = vmatpush3.bf16.msra.mxu0 %v2524_v31 }
 0x58d   : > { %2526 = vmatprep.subr.bf16.mxu0 %v2628_v10 }
 0x590   : > { %2528 = vmatpush3.bf16.msra.mxu0 %v2527_v34 }
 0x591   : > { %2529 = vmatprep.subr.bf16.mxu0 %v2628_v10 }
 0x5b5   : > { %v1345_v35 = vpop.f32.mrb[12].mxu1 }
 0x5b6   : > { %1860 = vrot.lane.b32.xlu1 %v1345_v35, %s2657_s24  ;;  %v2411_v36 = vpop.f32.mrb[13].mxu1  ;;  %v2103_v35 = vld [vmem:[%s3044_s10 + $0x40] sm:$0xff]  ;;  %s408_s24 = scalar_lea.vmem %s3046_s12, %s2249_s23 }
 0x5b7   : > { %v2104_v36 = vld [vmem:[%s3044_s10 + $0x48] sm:$0xff] }
 0x5b8   : > { %v2530_v38 = vpack.c.bf16 %v2104_v36, %v2103_v35 }
 0x5ba   : > { %2531 = vmatpush3.bf16.msra.mxu0 %v2530_v38 }
 0x5bb   : > { %2532 = vmatprep.subr.bf16.mxu0 %v2628_v10 }
 0x5bd   : > { %v1511_v40 = vpop.f32.mrb[14].mxu1 }
 0x5be   : > { %1864 = vrot.lane.b32.xlu0 %v1511_v40, %s2658_s29  ;;  %v2421_v41 = vpop.f32.mrb[15].mxu1  ;;  %v2533_v40 = vpack.c.bf16 %v2106_v39, %v2105_v37 }
 0x5bf   : > { %v2107_v41 = vld [vmem:[%s3044_s10 + $0x60] sm:$0xff] }
 0x5c0   : > { %2534 = vmatpush3.bf16.msra.mxu0 %v2533_v40 }
 0x5c1   : > { %v1677_v42 = vpop.f32.mrb[16].mxu1  ;;  %2535 = vmatprep.subr.bf16.mxu0 %v2628_v10 }
 0x5c2   : > { %1868 = vrot.lane.b32.xlu1 %v1677_v42, %s2659_s30  ;;  %v2431_v43 = vpop.f32.mrb[17].mxu1  ;;  %v2108_v42 = vld [vmem:[%s3044_s10 + $0x68] sm:$0xff] }
 0x5c3   : > { %v2536_v43 = vpack.c.bf16 %v2108_v42, %v2107_v41 }
 0x5c5   : > { %v1843_v44 = vpop.f32.mrb[18].mxu1  ;;  %2537 = vmatpush3.bf16.msra.mxu0 %v2536_v43 }
 0x5c6   : > { %1872 = vrot.lane.b32.xlu0 %v1843_v44, %s2660_s13  ;;  %v2441_v45 = vpop.f32.mrb[19].mxu1  ;;  %v2109_v44 = vld [vmem:[%s3044_s10 + $0x70] sm:$0xff]  ;;  %2538 = vmatprep.subr.bf16.mxu0 %v2628_v10 }
 0x5c7   : > { %v2110_v45 = vld [vmem:[%s3044_s10 + $0x78] sm:$0xff] }
 0x5ee   : > { %v1849_v46 = vpop.permute.xlu0 %1848 }
 0x5ef   : > { %v1875_v50 = vsel %vm521_vm2, %v681_v23, %v1849_v46  ;;  %v2539_v46 = vpack.c.bf16 %v2110_v45, %v2109_v44 }
 0x5f1   : > { %2540 = vmatpush3.bf16.msra.mxu0 %v2539_v46 }
 0x5f3   : > { %v1853_v47 = vpop.permute.xlu1 %1852 }
 0x5f4   : > { %v1876_v51 = vsel %vm597_vm3, %v1875_v50, %v1853_v47  ;;  %v2282_v47 = vld [vmem:[%s3043_s9] ss:$0 sm:$0xff] }
 0x5fb   : > { %v1857_v48 = vpop.permute.xlu0 %1856 }
 0x5fc   : > { %v1878_v53 = vsel %vm1877_vm4, %v1876_v51, %v1857_v48 }
 0x628   : > { %v1861_v49 = vpop.permute.xlu1 %1860 }
 0x629   : > { %v1880_v55 = vsel %vm1879_vm5, %v1878_v53, %v1861_v49 }
 0x630   : > { %v1865_v52 = vpop.permute.xlu0 %1864 }
 0x631   : > { %v1882_v56 = vsel %vm1881_vm6, %v1880_v55, %v1865_v52 }
 0x634   : > { %v1869_v54 = vpop.permute.xlu1 %1868 }
 0x635   : > { %v1884_v57 = vsel %vm1883_vm7, %v1882_v56, %v1869_v54 }
 0x638   : > { %v1873_v58 = vpop.permute.xlu0 %1872 }
 0x639   : > { %v1886_v59 = vsel %vm1885_vm8, %v1884_v57, %v1873_v58 }
 0x63a   : > { %2451 = vmatmul.mubr.msk.f32.vlgmr.msra.gmra.mrb[20].mxu1 %vm412_vm0, %v1886_v59 }
 0x63b   : > { %2461 = vmatprep.mubr.msk.f32.mxu1 %vm2629_vm1, %v2630_v13 }
 0x70d   : > { %v1960_v60 = vpop.f32.mrb[20].mxu1 }
 0x70e   : > { %v1964_v62 = vadd.f32 %v1960_v60, %v2742_v0  ;;  %v2452_v63 = vpop.f32.mrb[21].mxu1  ;;  %v2003_v0 = vld [vmem:[%s3042_s8 + $0x8] sm:$0xff]  ;;  %v2284_v60 = vld [vmem:[%s3045_s11] ss:$0 sm:$0xff] }
 0x70f   : > { %v2512_v7 = vpack.c.bf16 %v2003_v0, %v2002_v6 }
 0x710   : > { %v2937_v24 = vadd.f32 %v2279_v61, %v1964_v62 }
 0x711   : > { %2513 = vmatpush3.bf16.msra.mxu1 %v2512_v7 }
 0x712   : > { %v1975_v1 = vsel %vm412_vm0, %v2937_v24, 0.0  ;;  %2514 = vmatprep.subr.bf16.mxu1 %v2628_v10 }
 0x713   : > { %1976 = vadd.xlane.f32.xlu1 %v1975_v1 }
 0x715   : > { %2516 = vmatpush3.bf16.msra.mxu1 %v2515_v11 }
 0x7a0   : > { %v1977_v2 = vpop.xlane.xlu1 %1976 }
 0x7a1   : > { %v1978_v3 = vmul.f32 0.03125, %v1977_v2 }
 0x7a3   : > { %v1979_v4 = vsub.f32 %v2937_v24, %v1978_v3 }
 0x7a5   : > { %v1980_v5 = vmul.f32 %v1979_v4, %v1979_v4 }
 0x7a7   : > { %v1981_v13 = vsel %vm412_vm0, %v1980_v5, 0.0 }
 0x7a8   : > { %1982 = vadd.xlane.f32.xlu0 %v1981_v13 }
 0x835   : > { %v1983_v16 = vpop.xlane.xlu0 %1982 }
 0x836   : > { %v1984_v17 = vmul.f32 0.03125, %v1983_v16 }
 0x838   : > { %v1985_v18 = vadd.f32 1e-05, %v1984_v17 }
 0x83a   : > { %2616 = vrsqrt.f32 %v1985_v18 }
 0x844   : > { %v2617_v19 = vpop.eup %2616 }
 0x845   : > { %v1987_v21 = vmul.f32 %v2617_v19, %v1979_v4 }
 0x847   : > { %v1994_v23 = vmul.f32 %v2280_v20, %v1987_v21 }
 0x849   : > { %v2001_v25 = vadd.f32 %v2281_v22, %v1994_v23 }
 0x84b   : > { %2462 = vmatmul.mubr.msk.f32.vlgmr.msra.gmra.mrb[22].mxu1 %vm412_vm0, %v2001_v25 }
 0x91e   : > { %v2082_v48 = vpop.f32.mrb[22].mxu1 }
 0x91f   : > { %v2083_v49 = vadd.f32 %v2282_v47, %v2082_v48  ;;  %v2463_v50 = vpop.f32.mrb[23].mxu1 }
 0x921   : > { %v2086_v51 = vmul.f32 %v2083_v49, %v2083_v49 }
 0x923   : > { %v2087_v52 = vmul.f32 %v2086_v51, %v2083_v49 }
 0x925   : > { %v2088_v53 = vmul.f32 0.044715, %v2087_v52 }
 0x927   : > { %v2089_v54 = vadd.f32 %v2088_v53, %v2083_v49 }
 0x929   : > { %v2090_v55 = vmul.f32 0.7978846, %v2089_v54 }
 0x92b   : > { %2618 = vtanh.f32 %v2090_v55 }
 0x935   : > { %v2619_v56 = vpop.eup %2618 }
 0x936   : > { %v2092_v57 = vadd.f32 1.0, %v2619_v56 }
 0x938   : > { %v2093_v58 = vmul.f32 0.5, %v2092_v57 }
 0x93a   : > { %v2094_v59 = vmul.f32 %v2093_v58, %v2083_v49 }
 0x93c   : > { %2497 = vmatmul.mubr.f32.vlgmr.msra.gmra.mrb[14].mxu0 %v2094_v59 }
 0xa0f   : > { %v2177_v10 = vpop.f32.mrb[14].mxu0 }
 0xa10   : > { %v2181_v61 = vadd.f32 %v2177_v10, %v2937_v24  ;;  %v2498_v62 = vpop.f32.mrb[15].mxu0 }
 0xa12   : > { %v2189_v63 = vadd.f32 %v2284_v60, %v2181_v61 }
 0xa14   : > { %2190 = vst.msk [vmem:[%s408_s24] sm:$0xff] %vm412_vm0, %v2189_v63 }
 0xa15 PF: > { %s22_s21 = sadd.s32 1, %s2626_s21  }
 0xa16   : > { %p19_p4 = scmp.ge.s32.totalorder %s22_s21, 4  }
 0xa18   :  { %21 = sbr.rel (!%p19_p4) target bundleno = 1 (0x1), region = 98 }

</bundles_post_ra>
